<compile_context>
chip_gen: v6e
topology: v6e:2x2x1
jax: 0.10.0
libtpu: 0.0.40
codegen_flags: <defaults>
</compile_context>

<pallas_src>
import functools

import jax
import jax.numpy as jnp
from jax import lax
from jax.experimental import pallas as pl
from jax.experimental.pallas import tpu as pltpu

F32 = jnp.float32


# ---------------------------------------------------------------- fused kernel
def _cnn_fused_kernel(x_ref,
                      m1_ref, b1_ref, m2_ref, b2_ref,
                      r1_ref, q1e_ref, q1o_ref,
                      m3_ref, b3_ref, m4_ref, b4_ref,
                      r2_ref, q2e_ref, q2o_ref,
                      wfc_ref, bfc_ref, o_ref, *, height):
    """Whole CNN forward for ONE image, entirely VMEM/vreg resident.

    Activations are (rows = H, lanes = W*C).
    """

    def conv3x3_relu(a, h_in, m_ref, b_ref):
        # One matmul per ky offset against a block-banded (W_in*C_in, W_out*C_out)
        # weight; kx taps, channel contraction and width compaction are folded in.
        h_out = h_in - 2
        out = (jnp.dot(a[0:h_out, :], m_ref[0], preferred_element_type=F32)
               + jnp.dot(a[1:1 + h_out, :], m_ref[1], preferred_element_type=F32)
               + jnp.dot(a[2:2 + h_out, :], m_ref[2], preferred_element_type=F32)
               + b_ref[...])                       # bias broadcast over rows
        return jnp.maximum(out, 0.0), h_out

    def maxpool2x2(a, h_in, r_ref, qe_ref, qo_ref):
        # Vertical max: one sublane-shifted VPU max.  Row compaction (even rows)
        # and even/odd column selection + max are 0/1 selection matmuls (MXU),
        # so the pooled map is fully compact with no strided/lane-offset slices.
        u = jnp.maximum(a[0:h_in - 1, :], a[1:h_in, :])
        ru = jnp.dot(r_ref[...], u, preferred_element_type=F32)
        pe = jnp.dot(ru, qe_ref[...], preferred_element_type=F32)
        po = jnp.dot(ru, qo_ref[...], preferred_element_type=F32)
        return jnp.maximum(pe, po), h_in // 2

    a = x_ref[...]                                  # (H, W*C_in) f32
    h = height
    a, h = conv3x3_relu(a, h, m1_ref, b1_ref)
    a, h = conv3x3_relu(a, h, m2_ref, b2_ref)
    a, h = maxpool2x2(a, h, r1_ref, q1e_ref, q1o_ref)
    a, h = conv3x3_relu(a, h, m3_ref, b3_ref)
    a, h = conv3x3_relu(a, h, m4_ref, b4_ref)
    a, h = maxpool2x2(a, h, r2_ref, q2e_ref, q2o_ref)

    # LazyLinear: elementwise multiply against re-laid-out FC weight; reduce
    # sublanes (rows) first, one cross-lane reduce last.
    prod = a * wfc_ref[...]
    s = jnp.sum(prod, axis=0, keepdims=True)
    o_ref[...] = jnp.sum(s, axis=1, keepdims=True) + bfc_ref[...]


# ---------------------------------------------------------------- weight prep
def _band_matrices(wt, bias, w_in):
    """Conv2d weight (C_out, C_in, 3, 3) -> stacked banded matrices
    (3, W_in*C_in, W_out*C_out) (one per ky) + bias in (1, W_out*C_out) layout.

    mats[dy][wi*C_in + ci, wo*C_out + co] = wt[co, ci, dy, wi - wo] for
    0 <= wi - wo <= 2, else 0.
    """
    c_out, c_in = wt.shape[0], wt.shape[1]
    w_out = w_in - 2
    wi = jnp.arange(w_in)[:, None]
    wo = jnp.arange(w_out)[None, :]
    dx = wi - wo                                           # (W_in, W_out)
    valid = ((dx >= 0) & (dx <= 2))[:, :, None, None].astype(F32)
    dx_c = jnp.clip(dx, 0, 2)
    mats = []
    for dy in range(3):
        wt_dy = jnp.transpose(wt[:, :, dy, :], (2, 1, 0))  # (kx, C_in, C_out)
        blocks = wt_dy[dx_c] * valid                       # (W_in, W_out, C_in, C_out)
        mats.append(blocks.transpose(0, 2, 1, 3).reshape(w_in * c_in, w_out * c_out))
    mats = jnp.stack(mats).astype(F32)
    bias_l = jnp.tile(bias.reshape(1, 1, c_out), (1, w_out, 1)).reshape(1, w_out * c_out)
    return mats, bias_l.astype(F32)


def _pool_row_sel(h_in, h_out):
    # (h_out, h_in - 1): picks row 2*h' from the vertically-maxed map.
    return (jnp.arange(h_in - 1)[None, :] == 2 * jnp.arange(h_out)[:, None]).astype(F32)


def _pool_col_sel(w_in, w_out, c, parity):
    # (w_in*c, w_out*c): picks column block 2*w' + parity, identity on channels.
    wsel = jnp.arange(w_in)[:, None] == (2 * jnp.arange(w_out) + parity)[None, :]
    eye = jnp.eye(c, dtype=bool)
    q = (wsel[:, None, :, None] & eye[None, :, None, :]).astype(F32)
    return q.reshape(w_in * c, w_out * c)


def _full_spec(arr):
    zeros = (0,) * arr.ndim
    return pl.BlockSpec(arr.shape, lambda i, z=zeros: z)


# ---------------------------------------------------------------- wrapper
def cnn_forward(params, x):
    n, c_in, h, w = x.shape
    # Lane-dense HWC layout: (N, H, W*C), lane index = w*C + c.
    x_l = x.transpose(0, 2, 3, 1).reshape(n, h, w * c_in).astype(F32)

    c2 = params["c2"][0].shape[0]
    c4 = params["c4"][0].shape[0]

    h1, w1 = h - 2, w - 2            # conv1
    h2, w2 = h1 - 2, w1 - 2          # conv2
    hp1, wp1 = h2 // 2, w2 // 2      # pool1
    h3, w3 = hp1 - 2, wp1 - 2        # conv3
    h4, w4 = h3 - 2, w3 - 2          # conv4
    hp2, wp2 = h4 // 2, w4 // 2      # pool2

    m1, bb1 = _band_matrices(*params["c1"], w)
    m2, bb2 = _band_matrices(*params["c2"], w1)
    m3, bb3 = _band_matrices(*params["c3"], wp1)
    m4, bb4 = _band_matrices(*params["c4"], w3)

    r1 = _pool_row_sel(h2, hp1)
    q1e = _pool_col_sel(w2, wp1, c2, 0)
    q1o = _pool_col_sel(w2, wp1, c2, 1)
    r2 = _pool_row_sel(h4, hp2)
    q2e = _pool_col_sel(w4, wp2, c4, 0)
    q2o = _pool_col_sel(w4, wp2, c4, 1)

    # FC weight (feat, 1); PyTorch flatten order is f = c*Hp2*Wp2 + h*Wp2 + w.
    # Re-lay into the kernel's (H, W*C) layout.
    wfc, bfc = params["fc"]
    wfc_l = wfc.reshape(c4, hp2, wp2).transpose(1, 2, 0).reshape(hp2, wp2 * c4).astype(F32)
    bfc_l = bfc.reshape(1, 1).astype(F32)

    weights = [m1, bb1, m2, bb2, r1, q1e, q1o,
               m3, bb3, m4, bb4, r2, q2e, q2o, wfc_l, bfc_l]

    out = pl.pallas_call(
        functools.partial(_cnn_fused_kernel, height=h),
        out_shape=jax.ShapeDtypeStruct((n, 1, 1), F32),
        grid=(n,),
        in_specs=[pl.BlockSpec((None, h, w * c_in), lambda i: (i, 0, 0))]
                 + [_full_spec(a) for a in weights],
        out_specs=pl.BlockSpec((None, 1, 1), lambda i: (i, 0, 0)),
        compiler_params=pltpu.CompilerParams(
            dimension_semantics=("parallel",)),
    )(x_l, *weights)
    return out.reshape(n, 1)


# ---------------------------------------------------------------- params / reference
def init_params(key, in_hw):
    def conv_init(k, c_out, c_in, ksz=3):
        fan_in = c_in * ksz * ksz
        bound = 1.0 / (fan_in ** 0.5)
        kw_, kb_ = jax.random.split(k)
        wgt = jax.random.uniform(kw_, (c_out, c_in, ksz, ksz), F32, -bound, bound)
        b = jax.random.uniform(kb_, (c_out,), F32, -bound, bound)
        return wgt, b

    h, w = in_hw
    h1, w1 = (h - 4) // 2, (w - 4) // 2
    h2, w2 = (h1 - 4) // 2, (w1 - 4) // 2
    feat = 15 * h2 * w2                                      # LazyLinear in_features

    ks = jax.random.split(key, 6)
    params = {
        "c1": conv_init(ks[0], 10, 3),
        "c2": conv_init(ks[1], 10, 10),
        "c3": conv_init(ks[2], 10, 10),
        "c4": conv_init(ks[3], 15, 10),
    }
    bound = 1.0 / (feat ** 0.5)
    params["fc"] = (
        jax.random.uniform(ks[4], (feat, 1), F32, -bound, bound),
        jax.random.uniform(ks[5], (1,), F32, -bound, bound),
    )
    return params


def cnn_reference(params, x):
    """Pure-JAX reference for correctness checking."""
    def conv(z, wgt, b):
        y = lax.conv_general_dilated(
            z, wgt, (1, 1), "VALID",
            dimension_numbers=("NCHW", "OIHW", "NCHW"),
            preferred_element_type=F32)
        return jax.nn.relu(y + b[None, :, None, None])

    def pool(z):
        return lax.reduce_window(z, -jnp.inf, lax.max,
                                 (1, 1, 2, 2), (1, 1, 2, 2), "VALID")

    out = conv(x, *params["c1"])
    out = conv(out, *params["c2"])
    out = pool(out)
    out = conv(out, *params["c3"])
    out = conv(out, *params["c4"])
    out = pool(out)
    flat = out.reshape(out.shape[0], -1)
    return flat @ params["fc"][0] + params["fc"][1]


if __name__ == "__main__":
    key = jax.random.PRNGKey(0)
    k_param, k_x = jax.random.split(key)

    N, C, H, W = 2, 3, 32, 32                                # small CIFAR-like input
    x = jax.random.normal(k_x, (N, C, H, W), F32)
    params = init_params(k_param, (H, W))

    y = jax.block_until_ready(jax.jit(cnn_forward)(params, x))
    y_ref = jax.block_until_ready(jax.jit(cnn_reference)(params, x))

    assert y.shape == (N, 1), y.shape
    assert jnp.allclose(y, y_ref, rtol=1e-2, atol=1e-2), (y, y_ref)

    print("KERNEL_OK")
</pallas_src>

<mosaic_0001>
module attributes {stable_mosaic.version = 11 : i64} {
  func.func @_cnn_fused_kernel(%arg0: i32, %arg1: memref<1x32x96xf32, #tpu.memory_space<vmem>>, %arg2: memref<3x96x300xf32, #tpu.memory_space<vmem>>, %arg3: memref<1x300xf32, #tpu.memory_space<vmem>>, %arg4: memref<3x300x280xf32, #tpu.memory_space<vmem>>, %arg5: memref<1x280xf32, #tpu.memory_space<vmem>>, %arg6: memref<14x27xf32, #tpu.memory_space<vmem>>, %arg7: memref<280x140xf32, #tpu.memory_space<vmem>>, %arg8: memref<280x140xf32, #tpu.memory_space<vmem>>, %arg9: memref<3x140x120xf32, #tpu.memory_space<vmem>>, %arg10: memref<1x120xf32, #tpu.memory_space<vmem>>, %arg11: memref<3x120x150xf32, #tpu.memory_space<vmem>>, %arg12: memref<1x150xf32, #tpu.memory_space<vmem>>, %arg13: memref<5x9xf32, #tpu.memory_space<vmem>>, %arg14: memref<150x75xf32, #tpu.memory_space<vmem>>, %arg15: memref<150x75xf32, #tpu.memory_space<vmem>>, %arg16: memref<5x75xf32, #tpu.memory_space<vmem>>, %arg17: memref<1x1xf32, #tpu.memory_space<vmem>>, %arg18: memref<1x1x1xf32, #tpu.memory_space<vmem>>) attributes {dimension_semantics = [#tpu.dimension_semantics<parallel>], iteration_bounds = array<i64: 2>, scalar_prefetch = 0 : i64, scratch_operands = 0 : i64, tpu.core_type = #tpu.core_type<tc>, window_params = [{transform_indices = @transform_0, window_bounds = array<i64: 1, 32, 96>}, {pipeline_mode = #tpu.pipeline_mode<synchronous>, transform_indices = @transform_1, window_bounds = array<i64: 3, 96, 300>}, {pipeline_mode = #tpu.pipeline_mode<synchronous>, transform_indices = @transform_2, window_bounds = array<i64: 1, 300>}, {pipeline_mode = #tpu.pipeline_mode<synchronous>, transform_indices = @transform_3, window_bounds = array<i64: 3, 300, 280>}, {pipeline_mode = #tpu.pipeline_mode<synchronous>, transform_indices = @transform_4, window_bounds = array<i64: 1, 280>}, {pipeline_mode = #tpu.pipeline_mode<synchronous>, transform_indices = @transform_5, window_bounds = array<i64: 14, 27>}, {pipeline_mode = #tpu.pipeline_mode<synchronous>, transform_indices = @transform_6, window_bounds = array<i64: 280, 140>}, {pipeline_mode = #tpu.pipeline_mode<synchronous>, transform_indices = @transform_7, window_bounds = array<i64: 280, 140>}, {pipeline_mode = #tpu.pipeline_mode<synchronous>, transform_indices = @transform_8, window_bounds = array<i64: 3, 140, 120>}, {pipeline_mode = #tpu.pipeline_mode<synchronous>, transform_indices = @transform_9, window_bounds = array<i64: 1, 120>}, {pipeline_mode = #tpu.pipeline_mode<synchronous>, transform_indices = @transform_10, window_bounds = array<i64: 3, 120, 150>}, {pipeline_mode = #tpu.pipeline_mode<synchronous>, transform_indices = @transform_11, window_bounds = array<i64: 1, 150>}, {pipeline_mode = #tpu.pipeline_mode<synchronous>, transform_indices = @transform_12, window_bounds = array<i64: 5, 9>}, {pipeline_mode = #tpu.pipeline_mode<synchronous>, transform_indices = @transform_13, window_bounds = array<i64: 150, 75>}, {pipeline_mode = #tpu.pipeline_mode<synchronous>, transform_indices = @transform_14, window_bounds = array<i64: 150, 75>}, {pipeline_mode = #tpu.pipeline_mode<synchronous>, transform_indices = @transform_15, window_bounds = array<i64: 5, 75>}, {pipeline_mode = #tpu.pipeline_mode<synchronous>, transform_indices = @transform_16, window_bounds = array<i64: 1, 1>}, {transform_indices = @transform_17, window_bounds = array<i64: 1, 1, 1>}]} {
    %c0 = arith.constant 0 : index
    %c0_0 = arith.constant 0 : index
    %c0_1 = arith.constant 0 : index
    %0 = vector.load %arg1[%c0, %c0_0, %c0_1] : memref<1x32x96xf32, #tpu.memory_space<vmem>>, vector<1x32x96xf32>
    %1 = vector.shape_cast %0 : vector<1x32x96xf32> to vector<32x96xf32>
    %2 = vector.extract_strided_slice %1 {offsets = [0, 0], sizes = [30, 96], strides = [1, 1]} : vector<32x96xf32> to vector<30x96xf32>
    %c0_2 = arith.constant 0 : index
    %c0_3 = arith.constant 0 : index
    %c0_4 = arith.constant 0 : index
    %3 = vector.load %arg2[%c0_2, %c0_3, %c0_4] : memref<3x96x300xf32, #tpu.memory_space<vmem>>, vector<1x96x300xf32>
    %4 = vector.shape_cast %3 : vector<1x96x300xf32> to vector<96x300xf32>
    %cst = arith.constant dense<0.000000e+00> : vector<30x300xf32>
    %5 = tpu.matmul %2, %4, %cst {dimension_numbers = #tpu.dot_dimension_numbers<[1], [0], [0], [1], [0, 0, 1, 1], [], []>} : vector<30x96xf32>, vector<96x300xf32>, vector<30x300xf32> -> vector<30x300xf32>
    %6 = vector.extract_strided_slice %1 {offsets = [1, 0], sizes = [30, 96], strides = [1, 1]} : vector<32x96xf32> to vector<30x96xf32>
    %c1 = arith.constant 1 : index
    %c0_5 = arith.constant 0 : index
    %c0_6 = arith.constant 0 : index
    %7 = vector.load %arg2[%c1, %c0_5, %c0_6] : memref<3x96x300xf32, #tpu.memory_space<vmem>>, vector<1x96x300xf32>
    %8 = vector.shape_cast %7 : vector<1x96x300xf32> to vector<96x300xf32>
    %cst_7 = arith.constant dense<0.000000e+00> : vector<30x300xf32>
    %9 = tpu.matmul %6, %8, %cst_7 {dimension_numbers = #tpu.dot_dimension_numbers<[1], [0], [0], [1], [0, 0, 1, 1], [], []>} : vector<30x96xf32>, vector<96x300xf32>, vector<30x300xf32> -> vector<30x300xf32>
    %10 = arith.addf %5, %9 : vector<30x300xf32>
    %11 = vector.extract_strided_slice %1 {offsets = [2, 0], sizes = [30, 96], strides = [1, 1]} : vector<32x96xf32> to vector<30x96xf32>
    %c2 = arith.constant 2 : index
    %c0_8 = arith.constant 0 : index
    %c0_9 = arith.constant 0 : index
    %12 = vector.load %arg2[%c2, %c0_8, %c0_9] : memref<3x96x300xf32, #tpu.memory_space<vmem>>, vector<1x96x300xf32>
    %13 = vector.shape_cast %12 : vector<1x96x300xf32> to vector<96x300xf32>
    %cst_10 = arith.constant dense<0.000000e+00> : vector<30x300xf32>
    %14 = tpu.matmul %11, %13, %cst_10 {dimension_numbers = #tpu.dot_dimension_numbers<[1], [0], [0], [1], [0, 0, 1, 1], [], []>} : vector<30x96xf32>, vector<96x300xf32>, vector<30x300xf32> -> vector<30x300xf32>
    %15 = arith.addf %10, %14 : vector<30x300xf32>
    %c0_11 = arith.constant 0 : index
    %c0_12 = arith.constant 0 : index
    %16 = vector.load %arg3[%c0_11, %c0_12] : memref<1x300xf32, #tpu.memory_space<vmem>>, vector<1x300xf32>
    %17 = vector.broadcast %16 : vector<1x300xf32> to vector<30x300xf32>
    %18 = arith.addf %15, %17 : vector<30x300xf32>
    %cst_13 = arith.constant 0.000000e+00 : f32
    %19 = vector.broadcast %cst_13 : f32 to vector<30x300xf32>
    %20 = arith.maximumf %18, %19 : vector<30x300xf32>
    %21 = vector.extract_strided_slice %20 {offsets = [0, 0], sizes = [28, 300], strides = [1, 1]} : vector<30x300xf32> to vector<28x300xf32>
    %c0_14 = arith.constant 0 : index
    %c0_15 = arith.constant 0 : index
    %c0_16 = arith.constant 0 : index
    %22 = vector.load %arg4[%c0_14, %c0_15, %c0_16] : memref<3x300x280xf32, #tpu.memory_space<vmem>>, vector<1x300x280xf32>
    %23 = vector.shape_cast %22 : vector<1x300x280xf32> to vector<300x280xf32>
    %cst_17 = arith.constant dense<0.000000e+00> : vector<28x280xf32>
    %24 = tpu.matmul %21, %23, %cst_17 {dimension_numbers = #tpu.dot_dimension_numbers<[1], [0], [0], [1], [0, 0, 1, 1], [], []>} : vector<28x300xf32>, vector<300x280xf32>, vector<28x280xf32> -> vector<28x280xf32>
    %25 = vector.extract_strided_slice %20 {offsets = [1, 0], sizes = [28, 300], strides = [1, 1]} : vector<30x300xf32> to vector<28x300xf32>
    %c1_18 = arith.constant 1 : index
    %c0_19 = arith.constant 0 : index
    %c0_20 = arith.constant 0 : index
    %26 = vector.load %arg4[%c1_18, %c0_19, %c0_20] : memref<3x300x280xf32, #tpu.memory_space<vmem>>, vector<1x300x280xf32>
    %27 = vector.shape_cast %26 : vector<1x300x280xf32> to vector<300x280xf32>
    %cst_21 = arith.constant dense<0.000000e+00> : vector<28x280xf32>
    %28 = tpu.matmul %25, %27, %cst_21 {dimension_numbers = #tpu.dot_dimension_numbers<[1], [0], [0], [1], [0, 0, 1, 1], [], []>} : vector<28x300xf32>, vector<300x280xf32>, vector<28x280xf32> -> vector<28x280xf32>
    %29 = arith.addf %24, %28 : vector<28x280xf32>
    %30 = vector.extract_strided_slice %20 {offsets = [2, 0], sizes = [28, 300], strides = [1, 1]} : vector<30x300xf32> to vector<28x300xf32>
    %c2_22 = arith.constant 2 : index
    %c0_23 = arith.constant 0 : index
    %c0_24 = arith.constant 0 : index
    %31 = vector.load %arg4[%c2_22, %c0_23, %c0_24] : memref<3x300x280xf32, #tpu.memory_space<vmem>>, vector<1x300x280xf32>
    %32 = vector.shape_cast %31 : vector<1x300x280xf32> to vector<300x280xf32>
    %cst_25 = arith.constant dense<0.000000e+00> : vector<28x280xf32>
    %33 = tpu.matmul %30, %32, %cst_25 {dimension_numbers = #tpu.dot_dimension_numbers<[1], [0], [0], [1], [0, 0, 1, 1], [], []>} : vector<28x300xf32>, vector<300x280xf32>, vector<28x280xf32> -> vector<28x280xf32>
    %34 = arith.addf %29, %33 : vector<28x280xf32>
    %c0_26 = arith.constant 0 : index
    %c0_27 = arith.constant 0 : index
    %35 = vector.load %arg5[%c0_26, %c0_27] : memref<1x280xf32, #tpu.memory_space<vmem>>, vector<1x280xf32>
    %36 = vector.broadcast %35 : vector<1x280xf32> to vector<28x280xf32>
    %37 = arith.addf %34, %36 : vector<28x280xf32>
    %cst_28 = arith.constant 0.000000e+00 : f32
    %38 = vector.broadcast %cst_28 : f32 to vector<28x280xf32>
    %39 = arith.maximumf %37, %38 : vector<28x280xf32>
    %40 = vector.extract_strided_slice %39 {offsets = [0, 0], sizes = [27, 280], strides = [1, 1]} : vector<28x280xf32> to vector<27x280xf32>
    %41 = vector.extract_strided_slice %39 {offsets = [1, 0], sizes = [27, 280], strides = [1, 1]} : vector<28x280xf32> to vector<27x280xf32>
    %42 = arith.maximumf %40, %41 : vector<27x280xf32>
    %c0_29 = arith.constant 0 : index
    %c0_30 = arith.constant 0 : index
    %43 = vector.load %arg6[%c0_29, %c0_30] : memref<14x27xf32, #tpu.memory_space<vmem>>, vector<14x27xf32>
    %cst_31 = arith.constant dense<0.000000e+00> : vector<14x280xf32>
    %44 = tpu.matmul %43, %42, %cst_31 {dimension_numbers = #tpu.dot_dimension_numbers<[1], [0], [0], [1], [0, 0, 1, 1], [], []>} : vector<14x27xf32>, vector<27x280xf32>, vector<14x280xf32> -> vector<14x280xf32>
    %c0_32 = arith.constant 0 : index
    %c0_33 = arith.constant 0 : index
    %45 = vector.load %arg7[%c0_32, %c0_33] : memref<280x140xf32, #tpu.memory_space<vmem>>, vector<280x140xf32>
    %cst_34 = arith.constant dense<0.000000e+00> : vector<14x140xf32>
    %46 = tpu.matmul %44, %45, %cst_34 {dimension_numbers = #tpu.dot_dimension_numbers<[1], [0], [0], [1], [0, 0, 1, 1], [], []>} : vector<14x280xf32>, vector<280x140xf32>, vector<14x140xf32> -> vector<14x140xf32>
    %c0_35 = arith.constant 0 : index
    %c0_36 = arith.constant 0 : index
    %47 = vector.load %arg8[%c0_35, %c0_36] : memref<280x140xf32, #tpu.memory_space<vmem>>, vector<280x140xf32>
    %cst_37 = arith.constant dense<0.000000e+00> : vector<14x140xf32>
    %48 = tpu.matmul %44, %47, %cst_37 {dimension_numbers = #tpu.dot_dimension_numbers<[1], [0], [0], [1], [0, 0, 1, 1], [], []>} : vector<14x280xf32>, vector<280x140xf32>, vector<14x140xf32> -> vector<14x140xf32>
    %49 = arith.maximumf %46, %48 : vector<14x140xf32>
    %50 = vector.extract_strided_slice %49 {offsets = [0, 0], sizes = [12, 140], strides = [1, 1]} : vector<14x140xf32> to vector<12x140xf32>
    %c0_38 = arith.constant 0 : index
    %c0_39 = arith.constant 0 : index
    %c0_40 = arith.constant 0 : index
    %51 = vector.load %arg9[%c0_38, %c0_39, %c0_40] : memref<3x140x120xf32, #tpu.memory_space<vmem>>, vector<1x140x120xf32>
    %52 = vector.shape_cast %51 : vector<1x140x120xf32> to vector<140x120xf32>
    %cst_41 = arith.constant dense<0.000000e+00> : vector<12x120xf32>
    %53 = tpu.matmul %50, %52, %cst_41 {dimension_numbers = #tpu.dot_dimension_numbers<[1], [0], [0], [1], [0, 0, 1, 1], [], []>} : vector<12x140xf32>, vector<140x120xf32>, vector<12x120xf32> -> vector<12x120xf32>
    %54 = vector.extract_strided_slice %49 {offsets = [1, 0], sizes = [12, 140], strides = [1, 1]} : vector<14x140xf32> to vector<12x140xf32>
    %c1_42 = arith.constant 1 : index
    %c0_43 = arith.constant 0 : index
    %c0_44 = arith.constant 0 : index
    %55 = vector.load %arg9[%c1_42, %c0_43, %c0_44] : memref<3x140x120xf32, #tpu.memory_space<vmem>>, vector<1x140x120xf32>
    %56 = vector.shape_cast %55 : vector<1x140x120xf32> to vector<140x120xf32>
    %cst_45 = arith.constant dense<0.000000e+00> : vector<12x120xf32>
    %57 = tpu.matmul %54, %56, %cst_45 {dimension_numbers = #tpu.dot_dimension_numbers<[1], [0], [0], [1], [0, 0, 1, 1], [], []>} : vector<12x140xf32>, vector<140x120xf32>, vector<12x120xf32> -> vector<12x120xf32>
    %58 = arith.addf %53, %57 : vector<12x120xf32>
    %59 = vector.extract_strided_slice %49 {offsets = [2, 0], sizes = [12, 140], strides = [1, 1]} : vector<14x140xf32> to vector<12x140xf32>
    %c2_46 = arith.constant 2 : index
    %c0_47 = arith.constant 0 : index
    %c0_48 = arith.constant 0 : index
    %60 = vector.load %arg9[%c2_46, %c0_47, %c0_48] : memref<3x140x120xf32, #tpu.memory_space<vmem>>, vector<1x140x120xf32>
    %61 = vector.shape_cast %60 : vector<1x140x120xf32> to vector<140x120xf32>
    %cst_49 = arith.constant dense<0.000000e+00> : vector<12x120xf32>
    %62 = tpu.matmul %59, %61, %cst_49 {dimension_numbers = #tpu.dot_dimension_numbers<[1], [0], [0], [1], [0, 0, 1, 1], [], []>} : vector<12x140xf32>, vector<140x120xf32>, vector<12x120xf32> -> vector<12x120xf32>
    %63 = arith.addf %58, %62 : vector<12x120xf32>
    %c0_50 = arith.constant 0 : index
    %c0_51 = arith.constant 0 : index
    %64 = vector.load %arg10[%c0_50, %c0_51] : memref<1x120xf32, #tpu.memory_space<vmem>>, vector<1x120xf32>
    %65 = vector.broadcast %64 : vector<1x120xf32> to vector<12x120xf32>
    %66 = arith.addf %63, %65 : vector<12x120xf32>
    %cst_52 = arith.constant 0.000000e+00 : f32
    %67 = vector.broadcast %cst_52 : f32 to vector<12x120xf32>
    %68 = arith.maximumf %66, %67 : vector<12x120xf32>
    %69 = vector.extract_strided_slice %68 {offsets = [0, 0], sizes = [10, 120], strides = [1, 1]} : vector<12x120xf32> to vector<10x120xf32>
    %c0_53 = arith.constant 0 : index
    %c0_54 = arith.constant 0 : index
    %c0_55 = arith.constant 0 : index
    %70 = vector.load %arg11[%c0_53, %c0_54, %c0_55] : memref<3x120x150xf32, #tpu.memory_space<vmem>>, vector<1x120x150xf32>
    %71 = vector.shape_cast %70 : vector<1x120x150xf32> to vector<120x150xf32>
    %cst_56 = arith.constant dense<0.000000e+00> : vector<10x150xf32>
    %72 = tpu.matmul %69, %71, %cst_56 {dimension_numbers = #tpu.dot_dimension_numbers<[1], [0], [0], [1], [0, 0, 1, 1], [], []>} : vector<10x120xf32>, vector<120x150xf32>, vector<10x150xf32> -> vector<10x150xf32>
    %73 = vector.extract_strided_slice %68 {offsets = [1, 0], sizes = [10, 120], strides = [1, 1]} : vector<12x120xf32> to vector<10x120xf32>
    %c1_57 = arith.constant 1 : index
    %c0_58 = arith.constant 0 : index
    %c0_59 = arith.constant 0 : index
    %74 = vector.load %arg11[%c1_57, %c0_58, %c0_59] : memref<3x120x150xf32, #tpu.memory_space<vmem>>, vector<1x120x150xf32>
    %75 = vector.shape_cast %74 : vector<1x120x150xf32> to vector<120x150xf32>
    %cst_60 = arith.constant dense<0.000000e+00> : vector<10x150xf32>
    %76 = tpu.matmul %73, %75, %cst_60 {dimension_numbers = #tpu.dot_dimension_numbers<[1], [0], [0], [1], [0, 0, 1, 1], [], []>} : vector<10x120xf32>, vector<120x150xf32>, vector<10x150xf32> -> vector<10x150xf32>
    %77 = arith.addf %72, %76 : vector<10x150xf32>
    %78 = vector.extract_strided_slice %68 {offsets = [2, 0], sizes = [10, 120], strides = [1, 1]} : vector<12x120xf32> to vector<10x120xf32>
    %c2_61 = arith.constant 2 : index
    %c0_62 = arith.constant 0 : index
    %c0_63 = arith.constant 0 : index
    %79 = vector.load %arg11[%c2_61, %c0_62, %c0_63] : memref<3x120x150xf32, #tpu.memory_space<vmem>>, vector<1x120x150xf32>
    %80 = vector.shape_cast %79 : vector<1x120x150xf32> to vector<120x150xf32>
    %cst_64 = arith.constant dense<0.000000e+00> : vector<10x150xf32>
    %81 = tpu.matmul %78, %80, %cst_64 {dimension_numbers = #tpu.dot_dimension_numbers<[1], [0], [0], [1], [0, 0, 1, 1], [], []>} : vector<10x120xf32>, vector<120x150xf32>, vector<10x150xf32> -> vector<10x150xf32>
    %82 = arith.addf %77, %81 : vector<10x150xf32>
    %c0_65 = arith.constant 0 : index
    %c0_66 = arith.constant 0 : index
    %83 = vector.load %arg12[%c0_65, %c0_66] : memref<1x150xf32, #tpu.memory_space<vmem>>, vector<1x150xf32>
    %84 = vector.broadcast %83 : vector<1x150xf32> to vector<10x150xf32>
    %85 = arith.addf %82, %84 : vector<10x150xf32>
    %cst_67 = arith.constant 0.000000e+00 : f32
    %86 = vector.broadcast %cst_67 : f32 to vector<10x150xf32>
    %87 = arith.maximumf %85, %86 : vector<10x150xf32>
    %88 = vector.extract_strided_slice %87 {offsets = [0, 0], sizes = [9, 150], strides = [1, 1]} : vector<10x150xf32> to vector<9x150xf32>
    %89 = vector.extract_strided_slice %87 {offsets = [1, 0], sizes = [9, 150], strides = [1, 1]} : vector<10x150xf32> to vector<9x150xf32>
    %90 = arith.maximumf %88, %89 : vector<9x150xf32>
    %c0_68 = arith.constant 0 : index
    %c0_69 = arith.constant 0 : index
    %91 = vector.load %arg13[%c0_68, %c0_69] : memref<5x9xf32, #tpu.memory_space<vmem>>, vector<5x9xf32>
    %cst_70 = arith.constant dense<0.000000e+00> : vector<5x150xf32>
    %92 = tpu.matmul %91, %90, %cst_70 {dimension_numbers = #tpu.dot_dimension_numbers<[1], [0], [0], [1], [0, 0, 1, 1], [], []>} : vector<5x9xf32>, vector<9x150xf32>, vector<5x150xf32> -> vector<5x150xf32>
    %c0_71 = arith.constant 0 : index
    %c0_72 = arith.constant 0 : index
    %93 = vector.load %arg14[%c0_71, %c0_72] : memref<150x75xf32, #tpu.memory_space<vmem>>, vector<150x75xf32>
    %cst_73 = arith.constant dense<0.000000e+00> : vector<5x75xf32>
    %94 = tpu.matmul %92, %93, %cst_73 {dimension_numbers = #tpu.dot_dimension_numbers<[1], [0], [0], [1], [0, 0, 1, 1], [], []>} : vector<5x150xf32>, vector<150x75xf32>, vector<5x75xf32> -> vector<5x75xf32>
    %c0_74 = arith.constant 0 : index
    %c0_75 = arith.constant 0 : index
    %95 = vector.load %arg15[%c0_74, %c0_75] : memref<150x75xf32, #tpu.memory_space<vmem>>, vector<150x75xf32>
    %cst_76 = arith.constant dense<0.000000e+00> : vector<5x75xf32>
    %96 = tpu.matmul %92, %95, %cst_76 {dimension_numbers = #tpu.dot_dimension_numbers<[1], [0], [0], [1], [0, 0, 1, 1], [], []>} : vector<5x150xf32>, vector<150x75xf32>, vector<5x75xf32> -> vector<5x75xf32>
    %97 = arith.maximumf %94, %96 : vector<5x75xf32>
    %c0_77 = arith.constant 0 : index
    %c0_78 = arith.constant 0 : index
    %98 = vector.load %arg16[%c0_77, %c0_78] : memref<5x75xf32, #tpu.memory_space<vmem>>, vector<5x75xf32>
    %99 = arith.mulf %97, %98 : vector<5x75xf32>
    %cst_79 = arith.constant dense<0.000000e+00> : vector<75xf32>
    %100 = vector.multi_reduction <add>, %99, %cst_79 [0] : vector<5x75xf32> to vector<75xf32>
    %101 = vector.shape_cast %100 : vector<75xf32> to vector<1x75xf32>
    %cst_80 = arith.constant dense<0.000000e+00> : vector<1xf32>
    %102 = vector.multi_reduction <add>, %101, %cst_80 [1] : vector<1x75xf32> to vector<1xf32>
    %103 = vector.shape_cast %102 : vector<1xf32> to vector<1x1xf32>
    %c0_81 = arith.constant 0 : index
    %c0_82 = arith.constant 0 : index
    %104 = vector.load %arg17[%c0_81, %c0_82] : memref<1x1xf32, #tpu.memory_space<vmem>>, vector<1x1xf32>
    %105 = arith.addf %103, %104 : vector<1x1xf32>
    %c0_83 = arith.constant 0 : index
    %c0_84 = arith.constant 0 : index
    %c0_85 = arith.constant 0 : index
    %106 = vector.load %arg18[%c0_83, %c0_84, %c0_85] : memref<1x1x1xf32, #tpu.memory_space<vmem>>, vector<1x1x1xf32>
    %107 = vector.shape_cast %106 : vector<1x1x1xf32> to vector<1x1xf32>
    %108 = vector.shape_cast %105 : vector<1x1xf32> to vector<1x1x1xf32>
    tpu.vector_store %arg18[%c0_83, %c0_84, %c0_85], %108 {strides = array<i32>} : memref<1x1x1xf32, #tpu.memory_space<vmem>>, vector<1x1x1xf32>,
    return
  }
  func.func @transform_0(%arg0: i32) -> (i32, i32, i32) {
    %c0_i32 = arith.constant 0 : i32
    %c0_i32_0 = arith.constant 0 : i32
    %c0_i32_1 = arith.constant 0 : i32
    return %arg0, %c0_i32, %c0_i32_0 : i32, i32, i32
  }
  func.func @transform_1(%arg0: i32) -> (i32, i32, i32) {
    %c0_i32 = arith.constant 0 : i32
    %c0_i32_0 = arith.constant 0 : i32
    %c0_i32_1 = arith.constant 0 : i32
    %c0_i32_2 = arith.constant 0 : i32
    return %c0_i32, %c0_i32_0, %c0_i32_1 : i32, i32, i32
  }
  func.func @transform_2(%arg0: i32) -> (i32, i32) {
    %c0_i32 = arith.constant 0 : i32
    %c0_i32_0 = arith.constant 0 : i32
    %c0_i32_1 = arith.constant 0 : i32
    return %c0_i32, %c0_i32_0 : i32, i32
  }
  func.func @transform_3(%arg0: i32) -> (i32, i32, i32) {
    %c0_i32 = arith.constant 0 : i32
    %c0_i32_0 = arith.constant 0 : i32
    %c0_i32_1 = arith.constant 0 : i32
    %c0_i32_2 = arith.constant 0 : i32
    return %c0_i32, %c0_i32_0, %c0_i32_1 : i32, i32, i32
  }
  func.func @transform_4(%arg0: i32) -> (i32, i32) {
    %c0_i32 = arith.constant 0 : i32
    %c0_i32_0 = arith.constant 0 : i32
    %c0_i32_1 = arith.constant 0 : i32
    return %c0_i32, %c0_i32_0 : i32, i32
  }
  func.func @transform_5(%arg0: i32) -> (i32, i32) {
    %c0_i32 = arith.constant 0 : i32
    %c0_i32_0 = arith.constant 0 : i32
    %c0_i32_1 = arith.constant 0 : i32
    return %c0_i32, %c0_i32_0 : i32, i32
  }
  func.func @transform_6(%arg0: i32) -> (i32, i32) {
    %c0_i32 = arith.constant 0 : i32
    %c0_i32_0 = arith.constant 0 : i32
    %c0_i32_1 = arith.constant 0 : i32
    return %c0_i32, %c0_i32_0 : i32, i32
  }
  func.func @transform_7(%arg0: i32) -> (i32, i32) {
    %c0_i32 = arith.constant 0 : i32
    %c0_i32_0 = arith.constant 0 : i32
    %c0_i32_1 = arith.constant 0 : i32
    return %c0_i32, %c0_i32_0 : i32, i32
  }
  func.func @transform_8(%arg0: i32) -> (i32, i32, i32) {
    %c0_i32 = arith.constant 0 : i32
    %c0_i32_0 = arith.constant 0 : i32
    %c0_i32_1 = arith.constant 0 : i32
    %c0_i32_2 = arith.constant 0 : i32
    return %c0_i32, %c0_i32_0, %c0_i32_1 : i32, i32, i32
  }
  func.func @transform_9(%arg0: i32) -> (i32, i32) {
    %c0_i32 = arith.constant 0 : i32
    %c0_i32_0 = arith.constant 0 : i32
    %c0_i32_1 = arith.constant 0 : i32
    return %c0_i32, %c0_i32_0 : i32, i32
  }
  func.func @transform_10(%arg0: i32) -> (i32, i32, i32) {
    %c0_i32 = arith.constant 0 : i32
    %c0_i32_0 = arith.constant 0 : i32
    %c0_i32_1 = arith.constant 0 : i32
    %c0_i32_2 = arith.constant 0 : i32
    return %c0_i32, %c0_i32_0, %c0_i32_1 : i32, i32, i32
  }
  func.func @transform_11(%arg0: i32) -> (i32, i32) {
    %c0_i32 = arith.constant 0 : i32
    %c0_i32_0 = arith.constant 0 : i32
    %c0_i32_1 = arith.constant 0 : i32
    return %c0_i32, %c0_i32_0 : i32, i32
  }
  func.func @transform_12(%arg0: i32) -> (i32, i32) {
    %c0_i32 = arith.constant 0 : i32
    %c0_i32_0 = arith.constant 0 : i32
    %c0_i32_1 = arith.constant 0 : i32
    return %c0_i32, %c0_i32_0 : i32, i32
  }
  func.func @transform_13(%arg0: i32) -> (i32, i32) {
    %c0_i32 = arith.constant 0 : i32
    %c0_i32_0 = arith.constant 0 : i32
    %c0_i32_1 = arith.constant 0 : i32
    return %c0_i32, %c0_i32_0 : i32, i32
  }
  func.func @transform_14(%arg0: i32) -> (i32, i32) {
    %c0_i32 = arith.constant 0 : i32
    %c0_i32_0 = arith.constant 0 : i32
    %c0_i32_1 = arith.constant 0 : i32
    return %c0_i32, %c0_i32_0 : i32, i32
  }
  func.func @transform_15(%arg0: i32) -> (i32, i32) {
    %c0_i32 = arith.constant 0 : i32
    %c0_i32_0 = arith.constant 0 : i32
    %c0_i32_1 = arith.constant 0 : i32
    return %c0_i32, %c0_i32_0 : i32, i32
  }
  func.func @transform_16(%arg0: i32) -> (i32, i32) {
    %c0_i32 = arith.constant 0 : i32
    %c0_i32_0 = arith.constant 0 : i32
    %c0_i32_1 = arith.constant 0 : i32
    return %c0_i32, %c0_i32_0 : i32, i32
  }
  func.func @transform_17(%arg0: i32) -> (i32, i32, i32) {
    %c0_i32 = arith.constant 0 : i32
    %c0_i32_0 = arith.constant 0 : i32
    %c0_i32_1 = arith.constant 0 : i32
    return %arg0, %c0_i32, %c0_i32_0 : i32, i32, i32
  }
}

</mosaic_0001>

<bundles_post_ra>
// kernel: cnn_forward.1
= control target key start
LH: loop header
LB: loop body
LE: loop exit
PB: predicated region body
PF: predicated region fallthrough
CT: control target
= control target key end

     0   :  { %s5570_s26 = smov 0   ;;  %s8683_s0 = inlined_call_operand.vmem [shape: f32[2,32,96], index: 0, kind: input, shape index: {}]   ;;  %s8684_s1 = inlined_call_operand.vmem [shape: f32[3,96,300], index: 1, kind: input, shape index: {}]   ;;  %s8685_s2 = inlined_call_operand.vmem [shape: f32[1,300], index: 2, kind: input, shape index: {}]   ;;  %s8686_s3 = inlined_call_operand.vmem [shape: f32[3,300,280], index: 3, kind: input, shape index: {}]   ;;  %s8687_s4 = inlined_call_operand.vmem [shape: f32[1,280], index: 4, kind: input, shape index: {}]   ;;  %s8688_s5 = inlined_call_operand.vmem [shape: f32[14,27], index: 5, kind: input, shape index: {}]   ;;  %s8689_s6 = inlined_call_operand.vmem [shape: f32[280,140], index: 6, kind: input, shape index: {}]   ;;  %s8690_s7 = inlined_call_operand.vmem [shape: f32[280,140], index: 7, kind: input, shape index: {}]   ;;  %s8691_s8 = inlined_call_operand.vmem [shape: f32[3,140,120], index: 8, kind: input, shape index: {}]   ;;  %s8692_s9 = inlined_call_operand.vmem [shape: f32[1,120], index: 9, kind: input, shape index: {}]   ;;  %s8693_s10 = inlined_call_operand.vmem [shape: f32[3,120,150], index: 10, kind: input, shape index: {}]   ;;  %s8694_s11 = inlined_call_operand.vmem [shape: f32[1,150], index: 11, kind: input, shape index: {}]   ;;  %s8695_s12 = inlined_call_operand.vmem [shape: f32[5,9], index: 12, kind: input, shape index: {}]   ;;  %s8696_s13 = inlined_call_operand.vmem [shape: f32[150,75], index: 13, kind: input, shape index: {}]   ;;  %s8697_s14 = inlined_call_operand.vmem [shape: f32[150,75], index: 14, kind: input, shape index: {}]   ;;  %s8698_s15 = inlined_call_operand.vmem [shape: f32[5,75], index: 15, kind: input, shape index: {}]   ;;  %s8699_s16 = inlined_call_operand.<no memory space> [shape: f32[1,1], index: 16, kind: input, shape index: {}]   ;;  %s8700_s17 = inlined_call_operand.vmem [shape: f32[2,1,1], index: 17, kind: output, shape index: {}]  }
   0x1   :  { %8705 = sst [smem:[#allocation17_spill]] %s8683_s0  ;;  %v22_v0 = vstv %s8699_s16 }
   0x2   :  { %8706 = sst [smem:[#allocation18_spill]] %s8684_s1  ;;  %23 = vst [vmem:[#allocation2] sm:$0x1] %v22_v0 }
   0x3 LB: > { %s4591_s27 = sadd.s32 4294967295, %s5474_s26   ;;  %p4595_p0 = scmp.ge.s32.totalorder %s5474_s26, 1  ;;  %s5474_s26 = sphi %s5570_s26, %s29_s26  }
   0x4   : > { %p489_p1 = scmp.lt.s32.totalorder %s5474_s26, 3 }
   0x6   : > { %p490_p2 = pnand %p4595_p0, %p489_p1 }
   0x8   : > { %493 = sbr.rel (%p490_p2) target bundleno = 2245 (0x8c5), region = 88 }
   0xd   : > { %s8707_s0 = sld [smem:[#allocation18_spill]]  ;;  %p5596_p3 = scmp.lt.s32.totalorder %s4591_s27, 1  ;;  %vm628_vm0 = vcmask 1046528   ;;  %vm636_vm1 = vcmask 785408   ;;  %v8702_v47 = vmov 0.0   ;;  %vm1038_vm2 = vcmask 1045504  }
   0xe   : > { %s8709_s28 = sld [smem:[#allocation17_spill]]  ;;  %709 = vmatprep.mubr.f32.mxu0 %v8702_v47  ;;  %vm1560_vm3 = vcmask 1043456   ;;  %vm1551_vm4 = vcmask 359424   ;;  %vm2911_vm5 = vcmask 1042432   ;;  %vm2904_vm6 = vcmask 220160  }
   0xf   : > { %s8741_s27 = smov (!%p5596_p3, %s4591_s27), 1  ;;  %vm3143_vm7 = vcmask 195584   ;;  %vm3581_vm8 = vcmask 97280   ;;  %vm3934_vm9 = vcmask 982016   ;;  %vm4259_vm10 = vcmask 1040384  }
  0x10   : > { %s5087_s24 = sshll.u32 %s8741_s27, 5  ;;  %vm4255_vm11 = vcmask 72704   ;;  %vm4356_vm12 = vcmask 179200   ;;  %vm4528_vm13 = vcmask 610304   ;;  %vm4536_vm14 = vcmask 613376   ;;  %s546_s16 = scalar_lea.vmem %s8700_s17, %s8741_s27 }
  0x11   : > { %vm4542_vm15 = vcmask 0  }
  0x13   : > { %v4632_v1 = vld [vmem:[%s8707_s0 + $0x230] sm:$0xff]  ;;  %v4633_v2 = vld [vmem:[%s8707_s0 + $0x238] sm:$0xff]  ;;  %v4631_v3 = vld [vmem:[%s8707_s0 + $0x228] sm:$0xff] }
  0x14   : > { %653 = vmatprep.subr.mxu0 %v4632_v1  ;;  %5304 = vmatprep.subr.mxu1 %v4633_v2  ;;  %v4629_v4 = vld [vmem:[%s8707_s0 + $0x218] sm:$0xff]  ;;  %v4630_v5 = vld [vmem:[%s8707_s0 + $0x220] sm:$0xff]  ;;  %v4628_v6 = vld [vmem:[%s8707_s0 + $0x210] sm:$0xff]  ;;  %s5659_s29 = scalar_lea.vmem %s8709_s28, %s5087_s24 }
  0x15   : > { %654 = vmatpush1.msra.mxu0 %v4631_v3  ;;  %5305 = vmatpush3.msra.mxu1 %v4633_v2  ;;  %v4626_v7 = vld [vmem:[%s8707_s0 + $0x200] sm:$0xff]  ;;  %v4627_v8 = vld [vmem:[%s8707_s0 + $0x208] sm:$0xff]  ;;  %v4625_v9 = vld [vmem:[%s8707_s0 + $0x1f8] sm:$0xff] }
  0x16   : > { %655 = vmatprep.subr.mxu0 %v4629_v4  ;;  %5306 = vmatprep.subr.mxu1 %v4630_v5  ;;  %v4623_v10 = vld [vmem:[%s8707_s0 + $0x1e8] sm:$0xff]  ;;  %v4624_v11 = vld [vmem:[%s8707_s0 + $0x1f0] sm:$0xff]  ;;  %v4622_v12 = vld [vmem:[%s8707_s0 + $0x1e0] sm:$0xff] }
  0x17   : > { %656 = vmatpush1.msra.mxu0 %v4628_v6  ;;  %5307 = vmatpush3.msra.mxu1 %v4630_v5  ;;  %v4620_v13 = vld [vmem:[%s8707_s0 + $0x1d0] sm:$0xff]  ;;  %v4621_v14 = vld [vmem:[%s8707_s0 + $0x1d8] sm:$0xff]  ;;  %v4619_v15 = vld [vmem:[%s8707_s0 + $0x1c8] sm:$0xff] }
  0x18   : > { %657 = vmatprep.subr.mxu0 %v4626_v7  ;;  %5308 = vmatprep.subr.mxu1 %v4627_v8  ;;  %v4617_v16 = vld [vmem:[%s8707_s0 + $0x1b8] sm:$0xff]  ;;  %v4618_v17 = vld [vmem:[%s8707_s0 + $0x1c0] sm:$0xff]  ;;  %v4616_v18 = vld [vmem:[%s8707_s0 + $0x1b0] sm:$0xff] }
  0x19   : > { %658 = vmatpush1.msra.mxu0 %v4625_v9  ;;  %5309 = vmatpush3.msra.mxu1 %v4627_v8  ;;  %v4614_v19 = vld [vmem:[%s8707_s0 + $0x1a0] sm:$0xff]  ;;  %v4615_v20 = vld [vmem:[%s8707_s0 + $0x1a8] sm:$0xff]  ;;  %v4613_v21 = vld [vmem:[%s8707_s0 + $0x198] sm:$0xff] }
  0x1a   : > { %659 = vmatprep.subr.mxu0 %v4623_v10  ;;  %5310 = vmatprep.subr.mxu1 %v4624_v11  ;;  %v4611_v22 = vld [vmem:[%s8707_s0 + $0x188] sm:$0xff]  ;;  %v4612_v23 = vld [vmem:[%s8707_s0 + $0x190] sm:$0xff]  ;;  %v4610_v24 = vld [vmem:[%s8707_s0 + $0x180] sm:$0xff] }
  0x1b   : > { %660 = vmatpush1.msra.mxu0 %v4622_v12  ;;  %5311 = vmatpush3.msra.mxu1 %v4624_v11  ;;  %v4608_v25 = vld [vmem:[%s8707_s0 + $0x170] sm:$0xff]  ;;  %v4609_v26 = vld [vmem:[%s8707_s0 + $0x178] sm:$0xff]  ;;  %v4607_v27 = vld [vmem:[%s8707_s0 + $0x168] sm:$0xff] }
  0x1c   : > { %661 = vmatprep.subr.mxu0 %v4620_v13  ;;  %5312 = vmatprep.subr.mxu1 %v4621_v14  ;;  %v5674_v28 = vld [vmem:[%s5659_s29] sm:$0xff]  ;;  %v5677_v29 = vld [vmem:[%s5659_s29 + $0x8] sm:$0xff]  ;;  %v4605_v30 = vld [vmem:[%s8707_s0 + $0x158] sm:$0xff] }
  0x1d   : > { %662 = vmatpush1.msra.mxu0 %v4619_v15  ;;  %5313 = vmatpush3.msra.mxu1 %v4621_v14  ;;  %v4606_v31 = vld [vmem:[%s8707_s0 + $0x160] sm:$0xff]  ;;  %v5686_v32 = vld [vmem:[%s5659_s29 + $0x10] sm:$0xff]  ;;  %v4603_v35 = vld [vmem:[%s8707_s0 + $0x148] sm:$0xff]  ;;  %v629_v36 = vrot.slane %v5674_v28, 1  ;;  %v630_v37 = vrot.slane %v5677_v29, 1 }
  0x1e   : > { %663 = vmatprep.subr.mxu0 %v4617_v16  ;;  %5314 = vmatprep.subr.mxu1 %v4618_v17  ;;  %v4604_v33 = vld [vmem:[%s8707_s0 + $0x150] sm:$0xff]  ;;  %v4602_v34 = vld [vmem:[%s8707_s0 + $0x140] sm:$0xff]  ;;  %v4601_v38 = vld [vmem:[%s8707_s0 + $0x138] sm:$0xff]  ;;  %v632_v39 = vrot.slane %v5686_v32, 1 }
  0x1f   : > { %664 = vmatpush1.msra.mxu0 %v4616_v18  ;;  %5315 = vmatpush3.msra.mxu1 %v4618_v17  ;;  %v4599_v40 = vld [vmem:[%s8707_s0 + $0x128] sm:$0xff]  ;;  %v4600_v41 = vld [vmem:[%s8707_s0 + $0x130] sm:$0xff]  ;;  %v4598_v42 = vld [vmem:[%s8707_s0 + $0x120] sm:$0xff]  ;;  %v631_v43 = vsel %vm628_vm0, %v629_v36, %v630_v37 }
  0x20   : > { %665 = vmatprep.subr.mxu0 %v4614_v19  ;;  %5316 = vmatprep.subr.mxu1 %v4615_v20  ;;  %v633_v44 = vsel %vm628_vm0, %v630_v37, %v632_v39  ;;  %v585_v45 = vld [vmem:[%s8707_s0 + $0x110] sm:$0xff]  ;;  %v586_v46 = vld [vmem:[%s8707_s0 + $0x118] sm:$0xff]  ;;  %v584_v48 = vld [vmem:[%s8707_s0 + $0x108] sm:$0xff] }
  0x21   : > { %666 = vmatpush1.msra.mxu0 %v4613_v21  ;;  %5317 = vmatpush3.msra.mxu1 %v4615_v20  ;;  %v582_v49 = vld [vmem:[%s8707_s0 + $0xf8] sm:$0xff]  ;;  %v583_v50 = vld [vmem:[%s8707_s0 + $0x100] sm:$0xff]  ;;  %v581_v51 = vld [vmem:[%s8707_s0 + $0xf0] sm:$0xff] }
  0x22   : > { %667 = vmatprep.subr.mxu0 %v4611_v22  ;;  %5318 = vmatprep.subr.mxu1 %v4612_v23  ;;  %v579_v52 = vld [vmem:[%s8707_s0 + $0xe0] sm:$0xff]  ;;  %v580_v53 = vld [vmem:[%s8707_s0 + $0xe8] sm:$0xff]  ;;  %v578_v54 = vld [vmem:[%s8707_s0 + $0xd8] sm:$0xff] }
  0x23   : > { %668 = vmatpush1.msra.mxu0 %v4610_v24  ;;  %5319 = vmatpush3.msra.mxu1 %v4612_v23  ;;  %v576_v55 = vld [vmem:[%s8707_s0 + $0xc8] sm:$0xff]  ;;  %v577_v56 = vld [vmem:[%s8707_s0 + $0xd0] sm:$0xff]  ;;  %v575_v57 = vld [vmem:[%s8707_s0 + $0xc0] sm:$0xff] }
  0x24   : > { %669 = vmatprep.subr.mxu0 %v4608_v25  ;;  %5320 = vmatprep.subr.mxu1 %v4609_v26  ;;  %v573_v58 = vld [vmem:[%s8707_s0 + $0xb0] sm:$0xff]  ;;  %v574_v59 = vld [vmem:[%s8707_s0 + $0xb8] sm:$0xff]  ;;  %v572_v60 = vld [vmem:[%s8707_s0 + $0xa8] sm:$0xff] }
  0x25   : > { %670 = vmatpush1.msra.mxu0 %v4607_v27  ;;  %5321 = vmatpush3.msra.mxu1 %v4609_v26  ;;  %v570_v61 = vld [vmem:[%s8707_s0 + $0x98] sm:$0xff]  ;;  %v571_v62 = vld [vmem:[%s8707_s0 + $0xa0] sm:$0xff]  ;;  %v569_v63 = vld [vmem:[%s8707_s0 + $0x90] sm:$0xff] }
  0x26   : > { %671 = vmatprep.subr.mxu0 %v4605_v30  ;;  %5322 = vmatprep.subr.mxu1 %v4606_v31  ;;  %v5775_v0 = vld [vmem:[%s5659_s29 + $0x18] sm:$0xff]  ;;  %v567_v1 = vld [vmem:[%s8707_s0 + $0x80] sm:$0xff]  ;;  %v568_v2 = vld [vmem:[%s8707_s0 + $0x88] sm:$0xff] }
  0x27   : > { %672 = vmatpush1.msra.mxu0 %v4604_v33  ;;  %5323 = vmatpush3.msra.mxu1 %v4606_v31  ;;  %v566_v3 = vld [vmem:[%s8707_s0 + $0x78] sm:$0xff]  ;;  %v634_v4 = vrot.slane %v5775_v0, 1  ;;  %v564_v5 = vld [vmem:[%s8707_s0 + $0x68] sm:$0xff]  ;;  %v565_v6 = vld [vmem:[%s8707_s0 + $0x70] sm:$0xff] }
  0x28   : > { %673 = vmatprep.subr.mxu0 %v4602_v34  ;;  %5324 = vmatprep.subr.mxu1 %v4603_v35  ;;  %v563_v7 = vld [vmem:[%s8707_s0 + $0x60] sm:$0xff]  ;;  %v561_v8 = vld [vmem:[%s8707_s0 + $0x50] sm:$0xff]  ;;  %v562_v9 = vld [vmem:[%s8707_s0 + $0x58] sm:$0xff] }
  0x29   : > { %674 = vmatpush1.msra.mxu0 %v4601_v38  ;;  %5325 = vmatpush3.msra.mxu1 %v4603_v35  ;;  %v635_v10 = vsel %vm628_vm0, %v632_v39, %v634_v4  ;;  %v560_v11 = vld [vmem:[%s8707_s0 + $0x48] sm:$0xff]  ;;  %v558_v12 = vld [vmem:[%s8707_s0 + $0x38] sm:$0xff]  ;;  %v559_v13 = vld [vmem:[%s8707_s0 + $0x40] sm:$0xff] }
  0x2a   : > { %675 = vmatprep.subr.mxu0 %v4599_v40  ;;  %5326 = vmatprep.subr.mxu1 %v4600_v41  ;;  %v557_v14 = vld [vmem:[%s8707_s0 + $0x30] sm:$0xff]  ;;  %v555_v15 = vld [vmem:[%s8707_s0 + $0x20] sm:$0xff]  ;;  %v556_v16 = vld [vmem:[%s8707_s0 + $0x28] sm:$0xff] }
  0x2b   : > { %676 = vmatpush1.msra.mxu0 %v4598_v42  ;;  %5327 = vmatpush3.msra.mxu1 %v4600_v41  ;;  %v554_v17 = vld [vmem:[%s8707_s0 + $0x18] sm:$0xff]  ;;  %v552_v18 = vld [vmem:[%s8707_s0 + $0x8] sm:$0xff]  ;;  %v553_v19 = vld [vmem:[%s8707_s0 + $0x10] sm:$0xff] }
  0x2c   : > { %5328 = vmatprep.mubr.msk.f32.mxu1 %vm636_vm1, %v631_v43  ;;  %835 = vmatprep.subr.mxu0 %v585_v45  ;;  %v551_v20 = vld [vmem:[%s8707_s0] sm:$0xff]  ;;  %v4684_v21 = vld [vmem:[%s8707_s0 + $0x350] sm:$0xff]  ;;  %v4685_v22 = vld [vmem:[%s8707_s0 + $0x358] sm:$0xff] }
  0x2d   : > { %5329 = vmatmul.mubr.msk.f32.vlgmr.msra.gmra.mxu1 %vm636_vm1, %v633_v44  ;;  %5334 = vmatprep.subr.mxu1 %v586_v46  ;;  %v4683_v23 = vld [vmem:[%s8707_s0 + $0x348] sm:$0xff]  ;;  %v4681_v24 = vld [vmem:[%s8707_s0 + $0x338] sm:$0xff]  ;;  %v4682_v25 = vld [vmem:[%s8707_s0 + $0x340] sm:$0xff] }
  0x2e   : > { %4634 = vmatmul.mubr.msk.f32.vlgmr.msra.gmra.mxu0 %vm636_vm1, %v631_v43  ;;  %5335 = vmatpush3.msra.mxu1 %v586_v46  ;;  %v4680_v26 = vld [vmem:[%s8707_s0 + $0x330] sm:$0xff]  ;;  %v4678_v27 = vld [vmem:[%s8707_s0 + $0x320] sm:$0xff]  ;;  %v4679_v30 = vld [vmem:[%s8707_s0 + $0x328] sm:$0xff] }
  0x2f   : > { %836 = vmatpush1.msra.mxu0 %v584_v48  ;;  %5336 = vmatprep.subr.mxu1 %v583_v50  ;;  %v4677_v31 = vld [vmem:[%s8707_s0 + $0x318] sm:$0xff]  ;;  %v4675_v33 = vld [vmem:[%s8707_s0 + $0x308] sm:$0xff]  ;;  %v4676_v34 = vld [vmem:[%s8707_s0 + $0x310] sm:$0xff] }
  0x30   : > { %837 = vmatprep.subr.mxu0 %v582_v49  ;;  %5337 = vmatpush3.msra.mxu1 %v583_v50  ;;  %v4674_v35 = vld [vmem:[%s8707_s0 + $0x300] sm:$0xff]  ;;  %v4672_v36 = vld [vmem:[%s8707_s0 + $0x2f0] sm:$0xff]  ;;  %v4673_v37 = vld [vmem:[%s8707_s0 + $0x2f8] sm:$0xff] }
  0x31   : > { %838 = vmatpush1.msra.mxu0 %v581_v51  ;;  %5338 = vmatprep.subr.mxu1 %v580_v53  ;;  %v4671_v38 = vld [vmem:[%s8707_s0 + $0x2e8] sm:$0xff]  ;;  %v4669_v39 = vld [vmem:[%s8707_s0 + $0x2d8] sm:$0xff]  ;;  %v4670_v40 = vld [vmem:[%s8707_s0 + $0x2e0] sm:$0xff] }
  0x32   : > { %839 = vmatprep.subr.mxu0 %v579_v52  ;;  %5339 = vmatpush3.msra.mxu1 %v580_v53  ;;  %v4668_v41 = vld [vmem:[%s8707_s0 + $0x2d0] sm:$0xff]  ;;  %v4666_v42 = vld [vmem:[%s8707_s0 + $0x2c0] sm:$0xff]  ;;  %v4667_v43 = vld [vmem:[%s8707_s0 + $0x2c8] sm:$0xff] }
  0x33   : > { %840 = vmatpush1.msra.mxu0 %v578_v54  ;;  %5340 = vmatprep.subr.mxu1 %v577_v56  ;;  %v4663_v45 = vld [vmem:[%s8707_s0 + $0x2a8] sm:$0xff]  ;;  %v4664_v46 = vld [vmem:[%s8707_s0 + $0x2b0] sm:$0xff]  ;;  %v4662_v48 = vld [vmem:[%s8707_s0 + $0x2a0] sm:$0xff] }
  0x34   : > { %841 = vmatprep.subr.mxu0 %v576_v55  ;;  %5341 = vmatpush3.msra.mxu1 %v577_v56  ;;  %v4660_v49 = vld [vmem:[%s8707_s0 + $0x290] sm:$0xff]  ;;  %v4661_v50 = vld [vmem:[%s8707_s0 + $0x298] sm:$0xff]  ;;  %v4659_v51 = vld [vmem:[%s8707_s0 + $0x288] sm:$0xff] }
  0x35   : > { %842 = vmatpush1.msra.mxu0 %v575_v57  ;;  %5342 = vmatprep.subr.mxu1 %v574_v59  ;;  %v4657_v52 = vld [vmem:[%s8707_s0 + $0x278] sm:$0xff]  ;;  %v4658_v53 = vld [vmem:[%s8707_s0 + $0x280] sm:$0xff]  ;;  %v4656_v54 = vld [vmem:[%s8707_s0 + $0x270] sm:$0xff]  ;;  %v1039_v57 = vrot.slane %v5674_v28, 2 }
  0x36   : > { %843 = vmatprep.subr.mxu0 %v573_v58  ;;  %5343 = vmatpush3.msra.mxu1 %v574_v59  ;;  %v4654_v55 = vld [vmem:[%s8707_s0 + $0x260] sm:$0xff]  ;;  %v4655_v56 = vld [vmem:[%s8707_s0 + $0x268] sm:$0xff]  ;;  %v1040_v58 = vrot.slane %v5677_v29, 2  ;;  %v4653_v59 = vld [vmem:[%s8707_s0 + $0x258] sm:$0xff] }
  0x37   : > { %844 = vmatpush1.msra.mxu0 %v572_v60  ;;  %5344 = vmatprep.subr.mxu1 %v571_v62  ;;  %v1042_v60 = vrot.slane %v5686_v32, 2 }
  0x38   : > { %845 = vmatprep.subr.mxu0 %v570_v61  ;;  %5345 = vmatpush3.msra.mxu1 %v571_v62  ;;  %v1044_v61 = vrot.slane %v5775_v0, 2  ;;  %v1041_v62 = vsel %vm1038_vm2, %v1039_v57, %v1040_v58  ;;  %v4763_v57 = vld [vmem:[%s8686_s3 + $0x5b8] sm:$0xff] }
  0x39   : > { %846 = vmatpush1.msra.mxu0 %v569_v63  ;;  %715 = vmatprep.mubr.f32.mxu0 %v8702_v47  ;;  %v1043_v63 = vsel %vm1038_vm2, %v1040_v58, %v1042_v60  ;;  %v4802_v58 = vld [vmem:[%s8686_s3 + $0x6f0] sm:$0xff] }
  0x3a   : > { %847 = vmatprep.subr.mxu0 %v567_v1  ;;  %5346 = vmatprep.subr.mxu1 %v568_v2  ;;  %v1045_v1 = vsel %vm1038_vm2, %v1042_v60, %v1044_v61  ;;  %v4800_v60 = vld [vmem:[%s8686_s3 + $0x6e0] sm:$0xff] }
  0x3b   : > { %4635 = vmatmul.mubr.msk.f32.gmra.mxu0 %vm636_vm1, %v633_v44  ;;  %5347 = vmatpush3.msra.mxu1 %v568_v2  ;;  %v4665_v44 = vld [vmem:[%s8707_s0 + $0x2b8] sm:$0xff] }
  0x3c   : > { %848 = vmatpush1.msra.mxu0 %v566_v3  ;;  %5348 = vmatprep.subr.mxu1 %v565_v6  ;;  %v4739_v2 = vld [vmem:[%s8686_s3 + $0x4f8] sm:$0xff]  ;;  %v4737_v3 = vld [vmem:[%s8686_s3 + $0x4e8] sm:$0xff] }
  0x3d   : > { %849 = vmatprep.subr.mxu0 %v564_v5  ;;  %5349 = vmatpush3.msra.mxu1 %v565_v6  ;;  %v4734_v5 = vld [vmem:[%s8686_s3 + $0x4d0] sm:$0xff]  ;;  %v4733_v6 = vld [vmem:[%s8686_s3 + $0x4c8] sm:$0xff] }
  0x3e   : > { %850 = vmatpush1.msra.mxu0 %v563_v7  ;;  %721 = vmatprep.mubr.f32.mxu0 %v8702_v47  ;;  %v4731_v7 = vld [vmem:[%s8686_s3 + $0x4b8] sm:$0xff] }
  0x3f   : > { %851 = vmatprep.subr.mxu0 %v561_v8  ;;  %5350 = vmatprep.subr.mxu1 %v562_v9  ;;  %v4730_v8 = vld [vmem:[%s8686_s3 + $0x4b0] sm:$0xff] }
  0x40   : > { %4636 = vmatmul.mubr.msk.f32.gmra.mxu0 %vm636_vm1, %v635_v10  ;;  %5351 = vmatpush3.msra.mxu1 %v562_v9  ;;  %v4728_v9 = vld [vmem:[%s8686_s3 + $0x4a0] sm:$0xff] }
  0x41   : > { %852 = vmatpush1.msra.mxu0 %v560_v11  ;;  %5331 = vmatprep.mubr.msk.f32.mxu1 %vm636_vm1, %v635_v10  ;;  %v4727_v10 = vld [vmem:[%s8686_s3 + $0x498] sm:$0xff]  ;;  %v4725_v11 = vld [vmem:[%s8686_s3 + $0x488] sm:$0xff] }
  0x42   : > { %853 = vmatprep.subr.mxu0 %v558_v12  ;;  %5352 = vmatprep.subr.mxu1 %v559_v13  ;;  %v4724_v12 = vld [vmem:[%s8686_s3 + $0x480] sm:$0xff] }
  0x43   : > { %5332 = vmatmul.mubr.msk.f32.gmra.mxu1 %vm636_vm1, %v634_v4  ;;  %854 = vmatpush1.msra.mxu0 %v557_v14  ;;  %v4721_v14 = vld [vmem:[%s8686_s3 + $0x468] sm:$0xff] }
  0x44   : > { %5353 = vmatpush3.msra.mxu1 %v559_v13  ;;  %727 = vmatprep.mubr.f32.mxu0 %v8702_v47  ;;  %v4722_v13 = vld [vmem:[%s8686_s3 + $0x470] sm:$0xff] }
  0x45   : > { %855 = vmatprep.subr.mxu0 %v555_v15  ;;  %5354 = vmatprep.subr.mxu1 %v556_v16  ;;  %v4719_v15 = vld [vmem:[%s8686_s3 + $0x458] sm:$0xff] }
  0x46   : > { %4637 = vmatmul.mubr.msk.f32.gmra.mxu0 %vm636_vm1, %v634_v4  ;;  %5355 = vmatpush3.msra.mxu1 %v556_v16  ;;  %v4736_v4 = vld [vmem:[%s8686_s3 + $0x4e0] sm:$0xff]  ;;  %v4718_v16 = vld [vmem:[%s8686_s3 + $0x450] sm:$0xff] }
  0x47   : > { %856 = vmatpush1.msra.mxu0 %v554_v17  ;;  %5356 = vmatprep.subr.mxu1 %v553_v19  ;;  %v4716_v17 = vld [vmem:[%s8686_s3 + $0x440] sm:$0xff] }
  0x48   : > { %857 = vmatprep.subr.mxu0 %v552_v18  ;;  %5357 = vmatpush3.msra.mxu1 %v553_v19  ;;  %v4715_v18 = vld [vmem:[%s8686_s3 + $0x438] sm:$0xff]  ;;  %v4713_v19 = vld [vmem:[%s8686_s3 + $0x428] sm:$0xff] }
  0x49   : > { %858 = vmatpush1.msra.mxu0 %v551_v20  ;;  %5358 = vmatprep.mubr.msk.f32.mxu1 %vm636_vm1, %v5674_v28  ;;  %v4712_v20 = vld [vmem:[%s8686_s3 + $0x420] sm:$0xff] }
  0x4a   : > { %891 = vmatprep.mubr.f32.mxu0 %v8702_v47  ;;  %5359 = vmatmul.mubr.msk.f32.vlgmr.msra.gmra.mxu1 %vm636_vm1, %v5677_v29 }
  0x4b   : > { %1062 = vmatprep.subr.mxu0 %v4684_v21  ;;  %5364 = vmatprep.subr.mxu1 %v4685_v22  ;;  %v4710_v21 = vld [vmem:[%s8686_s3 + $0x410] sm:$0xff] }
  0x4c   : > { %4642 = vmatmul.mubr.msk.f32.vlgmr.msra.gmra.mxu0 %vm636_vm1, %v5674_v28  ;;  %5365 = vmatpush3.msra.mxu1 %v4685_v22  ;;  %v4651_v28 = vld [vmem:[%s8707_s0 + $0x248] sm:$0xff] }
  0x4d   : > { %1063 = vmatpush1.msra.mxu0 %v4683_v23  ;;  %5366 = vmatprep.subr.mxu1 %v4682_v25  ;;  %v4709_v22 = vld [vmem:[%s8686_s3 + $0x408] sm:$0xff]  ;;  %v4707_v23 = vld [vmem:[%s8686_s3 + $0x3f8] sm:$0xff] }
  0x4e   : > { %1064 = vmatprep.subr.mxu0 %v4681_v24  ;;  %5361 = vmatprep.mubr.msk.f32.mxu1 %vm636_vm1, %v5686_v32  ;;  %v4706_v24 = vld [vmem:[%s8686_s3 + $0x3f0] sm:$0xff] }
  0x4f   : > { %1065 = vmatpush1.msra.mxu0 %v4680_v26  ;;  %5367 = vmatpush3.msra.mxu1 %v4682_v25  ;;  %v4704_v25 = vld [vmem:[%s8686_s3 + $0x3e0] sm:$0xff]  ;;  %v4703_v26 = vld [vmem:[%s8686_s3 + $0x3d8] sm:$0xff] }
  0x50   : > { %1066 = vmatprep.subr.mxu0 %v4678_v27  ;;  %5362 = vmatmul.mubr.msk.f32.gmra.mxu1 %vm636_vm1, %v5775_v0  ;;  %v4701_v27 = vld [vmem:[%s8686_s3 + $0x3c8] sm:$0xff] }
  0x51   : > { %5368 = vmatprep.subr.mxu1 %v4679_v30  ;;  %1067 = vmatpush1.msra.mxu0 %v4677_v31  ;;  %v4698_v31 = vld [vmem:[%s8686_s3 + $0x3b0] sm:$0xff] }
  0x52   : > { %5369 = vmatpush3.msra.mxu1 %v4679_v30  ;;  %1068 = vmatprep.subr.mxu0 %v4675_v33  ;;  %v4700_v30 = vld [vmem:[%s8686_s3 + $0x3c0] sm:$0xff]  ;;  %v4697_v33 = vld [vmem:[%s8686_s3 + $0x3a8] sm:$0xff] }
  0x53   : > { %5370 = vmatprep.subr.mxu1 %v4676_v34  ;;  %1069 = vmatpush1.msra.mxu0 %v4674_v35  ;;  %v4694_v35 = vld [vmem:[%s8686_s3 + $0x390] sm:$0xff] }
  0x54   : > { %5371 = vmatpush3.msra.mxu1 %v4676_v34  ;;  %1070 = vmatprep.subr.mxu0 %v4672_v36  ;;  %v4695_v34 = vld [vmem:[%s8686_s3 + $0x398] sm:$0xff]  ;;  %v4788_v36 = vld [vmem:[%s8686_s3 + $0x680] sm:$0xff] }
  0x55   : > { %5372 = vmatprep.subr.mxu1 %v4673_v37  ;;  %1071 = vmatpush1.msra.mxu0 %v4671_v38  ;;  %v4785_v38 = vld [vmem:[%s8686_s3 + $0x668] sm:$0xff] }
  0x56   : > { %5373 = vmatpush3.msra.mxu1 %v4673_v37  ;;  %1072 = vmatprep.subr.mxu0 %v4669_v39  ;;  %v4787_v37 = vld [vmem:[%s8686_s3 + $0x678] sm:$0xff]  ;;  %v4784_v39 = vld [vmem:[%s8686_s3 + $0x660] sm:$0xff] }
  0x57   : > { %5374 = vmatprep.subr.mxu1 %v4670_v40  ;;  %897 = vmatprep.mubr.f32.mxu0 %v8702_v47 }
  0x58   : > { %1073 = vmatpush1.msra.mxu0 %v4668_v41  ;;  %5375 = vmatpush3.msra.mxu1 %v4670_v40  ;;  %v4782_v40 = vld [vmem:[%s8686_s3 + $0x650] sm:$0xff]  ;;  %v4781_v41 = vld [vmem:[%s8686_s3 + $0x648] sm:$0xff] }
  0x59   : > { %4643 = vmatmul.mubr.msk.f32.gmra.mxu0 %vm636_vm1, %v5677_v29  ;;  %1074 = vmatprep.subr.mxu0 %v4666_v42  ;;  %v4652_v29 = vld [vmem:[%s8707_s0 + $0x250] sm:$0xff]  ;;  %v4779_v42 = vld [vmem:[%s8686_s3 + $0x638] sm:$0xff] }
  0x5a   : > { %5376 = vmatprep.subr.mxu1 %v4667_v43  ;;  %1075 = vmatpush1.msra.mxu0 %v4665_v44  ;;  %v4776_v44 = vld [vmem:[%s8686_s3 + $0x620] sm:$0xff] }
  0x5b   : > { %5377 = vmatpush3.msra.mxu1 %v4667_v43  ;;  %1076 = vmatprep.subr.mxu0 %v4663_v45  ;;  %v4778_v43 = vld [vmem:[%s8686_s3 + $0x630] sm:$0xff]  ;;  %v4775_v45 = vld [vmem:[%s8686_s3 + $0x618] sm:$0xff] }
  0x5c   : > { %5378 = vmatprep.subr.mxu1 %v4664_v46  ;;  %903 = vmatprep.mubr.f32.mxu0 %v8702_v47 }
  0x5d   : > { %1077 = vmatpush1.msra.mxu0 %v4662_v48  ;;  %5379 = vmatpush3.msra.mxu1 %v4664_v46  ;;  %v4773_v46 = vld [vmem:[%s8686_s3 + $0x608] sm:$0xff]  ;;  %v4772_v48 = vld [vmem:[%s8686_s3 + $0x600] sm:$0xff] }
  0x5e   : > { %4644 = vmatmul.mubr.msk.f32.gmra.mxu0 %vm636_vm1, %v5686_v32  ;;  %1078 = vmatprep.subr.mxu0 %v4660_v49  ;;  %v4650_v32 = vld [vmem:[%s8707_s0 + $0x240] sm:$0xff]  ;;  %v4770_v49 = vld [vmem:[%s8686_s3 + $0x5f0] sm:$0xff] }
  0x5f   : > { %5380 = vmatprep.subr.mxu1 %v4661_v50  ;;  %1079 = vmatpush1.msra.mxu0 %v4659_v51  ;;  %v4767_v51 = vld [vmem:[%s8686_s3 + $0x5d8] sm:$0xff] }
  0x60   : > { %5381 = vmatpush3.msra.mxu1 %v4661_v50  ;;  %1080 = vmatprep.subr.mxu0 %v4657_v52  ;;  %v4769_v50 = vld [vmem:[%s8686_s3 + $0x5e8] sm:$0xff]  ;;  %v4806_v52 = vld [vmem:[%s8686_s3 + $0x710] sm:$0xf] }
  0x61   : > { %5382 = vmatprep.subr.mxu1 %v4658_v53  ;;  %909 = vmatprep.mubr.f32.mxu0 %v8702_v47 }
  0x62   : > { %1081 = vmatpush1.msra.mxu0 %v4656_v54  ;;  %5383 = vmatpush3.msra.mxu1 %v4658_v53  ;;  %v4766_v53 = vld [vmem:[%s8686_s3 + $0x5d0] sm:$0xff]  ;;  %v4805_v54 = vld [vmem:[%s8686_s3 + $0x708] sm:$0xf] }
  0x63   : > { %4645 = vmatmul.mubr.msk.f32.gmra.mxu0 %vm636_vm1, %v5775_v0  ;;  %1082 = vmatprep.subr.mxu0 %v4654_v55  ;;  %v4740_v0 = vld [vmem:[%s8686_s3 + $0x500] sm:$0xff] }
  0x64   : > { %5384 = vmatprep.subr.mxu1 %v4655_v56  ;;  %1083 = vmatpush1.msra.mxu0 %v4653_v59  ;;  %v4764_v55 = vld [vmem:[%s8686_s3 + $0x5c0] sm:$0xff]  ;;  %v4761_v59 = vld [vmem:[%s8686_s3 + $0x5a8] sm:$0xff] }
  0x65   : > { %5385 = vmatpush3.msra.mxu1 %v4655_v56  ;;  %1084 = vmatprep.subr.mxu0 %v4651_v28  ;;  %v4803_v56 = vld [vmem:[%s8686_s3 + $0x6f8] sm:$0xff]  ;;  %v4760_v28 = vld [vmem:[%s8686_s3 + $0x5a0] sm:$0xff] }
  0x66   : > { %5386 = vmatprep.subr.mxu1 %v4652_v29  ;;  %1085 = vmatpush1.msra.mxu0 %v4650_v32  ;;  %v4797_v32 = vld [vmem:[%s8686_s3 + $0x6c8] sm:$0xff] }
  0x67   : > { %1118 = vmatprep.mubr.f32.mxu0 %v8702_v47  ;;  %5387 = vmatpush3.msra.mxu1 %v4652_v29  ;;  %v4799_v29 = vld [vmem:[%s8686_s3 + $0x6d8] sm:$0xff] }
  0x68   : > { %5388 = vmatprep.mubr.msk.f32.mxu1 %vm636_vm1, %v1041_v62  ;;  %4686 = vmatmul.mubr.msk.f32.vlgmr.msra.gmra.mxu0 %vm636_vm1, %v1041_v62  ;;  %v4757_v62 = vld [vmem:[%s8686_s3 + $0x588] sm:$0xff] }
  0x69   : > { %5389 = vmatmul.mubr.msk.f32.vlgmr.msra.gmra.mxu1 %vm636_vm1, %v1043_v63  ;;  %1124 = vmatprep.mubr.f32.mxu0 %v8702_v47 }
  0x6a   : > { %5391 = vmatprep.mubr.msk.f32.mxu1 %vm636_vm1, %v1045_v1  ;;  %1570 = vmatprep.subr.mxu0 %v4740_v0  ;;  %v4794_v0 = vld [vmem:[%s8686_s3 + $0x6b0] sm:$0xff] }
  0x6b   : > { %1571 = vmatpush1.msra.mxu0 %v4739_v2  ;;  %4808 = vmatprep.subr.msk.mxu1 %vm1560_vm3, %v4806_v52  ;;  %v4754_v2 = vld [vmem:[%s8686_s3 + $0x570] sm:$0xff] }
  0x6c   : > { %4687 = vmatmul.mubr.msk.f32.gmra.mxu0 %vm636_vm1, %v1043_v63  ;;  %1572 = vmatprep.subr.mxu0 %v4737_v3  ;;  %v4796_v63 = vld [vmem:[%s8686_s3 + $0x6c0] sm:$0xff]  ;;  %v4793_v3 = vld [vmem:[%s8686_s3 + $0x6a8] sm:$0xff] }
  0x6d   : > { %5392 = vmatmul.mubr.msk.f32.gmra.mxu1 %vm636_vm1, %v1044_v61  ;;  %1130 = vmatprep.mubr.f32.mxu0 %v8702_v47 }
  0x6e   : > { %1723 = vmatprep.mubr.f32.mxu1 %v8702_v47  ;;  %1573 = vmatpush1.msra.mxu0 %v4736_v4  ;;  %v4752_v4 = vld [vmem:[%s8686_s3 + $0x560] sm:$0xff] }
  0x6f   : > { %1574 = vmatprep.subr.mxu0 %v4734_v5  ;;  %4809 = vmatpush1.msk.msra.mxu1 %vm1560_vm3, %v4805_v54  ;;  %v4791_v5 = vld [vmem:[%s8686_s3 + $0x698] sm:$0xff] }
  0x70   : > { %4688 = vmatmul.mubr.msk.f32.gmra.mxu0 %vm636_vm1, %v1045_v1  ;;  %1681 = vmatprep.subr.mxu1 %v4803_v56  ;;  %v4755_v1 = vld [vmem:[%s8686_s3 + $0x578] sm:$0xff] }
  0x71   : > { %1136 = vmatprep.mubr.f32.mxu0 %v8702_v47  ;;  %1575 = vmatpush1.msra.mxu0 %v4733_v6  ;;  %v4751_v6 = vld [vmem:[%s8686_s3 + $0x558] sm:$0xff] }
  0x72   : > { %1576 = vmatprep.subr.mxu0 %v4731_v7  ;;  %1682 = vmatpush1.msra.mxu1 %v4802_v58  ;;  %v4790_v7 = vld [vmem:[%s8686_s3 + $0x690] sm:$0xff] }
  0x73   : > { %1577 = vmatpush1.msra.mxu0 %v4730_v8  ;;  %1683 = vmatprep.subr.mxu1 %v4800_v60  ;;  %v4749_v8 = vld [vmem:[%s8686_s3 + $0x548] sm:$0xff] }
  0x74   : > { %4689 = vmatmul.mubr.msk.f32.gmra.mxu0 %vm636_vm1, %v1044_v61  ;;  %1578 = vmatprep.subr.mxu0 %v4728_v9  ;;  %v4758_v61 = vld [vmem:[%s8686_s3 + $0x590] sm:$0xff]  ;;  %v4789_v9 = vld [vmem:[%s8686_s3 + $0x688] sm:$0xff] }
  0x75   : > { %1579 = vmatpush1.msra.mxu0 %v4727_v10  ;;  %1684 = vmatpush1.msra.mxu1 %v4799_v29  ;;  %v4748_v10 = vld [vmem:[%s8686_s3 + $0x540] sm:$0xff] }
  0x76   : > { %1580 = vmatprep.subr.mxu0 %v4725_v11  ;;  %1685 = vmatprep.subr.mxu1 %v4797_v32  ;;  %v4746_v11 = vld [vmem:[%s8686_s3 + $0x530] sm:$0xff] }
  0x77   : > { %1581 = vmatpush1.msra.mxu0 %v4724_v12  ;;  %1686 = vmatpush1.msra.mxu1 %v4796_v63  ;;  %v4745_v12 = vld [vmem:[%s8686_s3 + $0x528] sm:$0xff] }
  0x78   : > { %1582 = vmatprep.subr.mxu0 %v4722_v13  ;;  %1687 = vmatprep.subr.mxu1 %v4794_v0  ;;  %v4743_v13 = vld [vmem:[%s8686_s3 + $0x518] sm:$0xff] }
  0x79   : > { %1583 = vmatpush1.msra.mxu0 %v4721_v14  ;;  %1688 = vmatpush1.msra.mxu1 %v4793_v3  ;;  %v4742_v14 = vld [vmem:[%s8686_s3 + $0x510] sm:$0xff] }
  0x7a   : > { %1584 = vmatprep.subr.mxu0 %v4719_v15  ;;  %1689 = vmatprep.subr.mxu1 %v4791_v5  ;;  %v1393_v15 = vld [vmem:[%s8686_s3 + $0x380] sm:$0xf] }
  0x7b   : > { %1585 = vmatpush1.msra.mxu0 %v4718_v16  ;;  %1690 = vmatpush1.msra.mxu1 %v4790_v7 }
  0x7c   : > { %1586 = vmatprep.subr.mxu0 %v4716_v17  ;;  %5136 = vmatprep.subr.mxu1 %v4789_v9 }
  0x7d   : > { %1587 = vmatpush1.msra.mxu0 %v4715_v18 }
  0x7e   : > { %1588 = vmatprep.subr.mxu0 %v4713_v19 }
  0x7f   : > { %1589 = vmatpush1.msra.mxu0 %v4712_v20 }
  0x80   : > { %1590 = vmatprep.subr.mxu0 %v4710_v21 }
  0x81   : > { %1591 = vmatpush1.msra.mxu0 %v4709_v22 }
  0x82   : > { %1592 = vmatprep.subr.mxu0 %v4707_v23 }
  0x83   : > { %1593 = vmatpush1.msra.mxu0 %v4706_v24 }
  0x84   : > { %1594 = vmatprep.subr.mxu0 %v4704_v25 }
  0x85   : > { %1595 = vmatpush1.msra.mxu0 %v4703_v26 }
  0x86   : > { %1596 = vmatprep.subr.mxu0 %v4701_v27 }
  0x87   : > { %1597 = vmatpush1.msra.mxu0 %v4700_v30 }
  0x88   : > { %1598 = vmatprep.subr.mxu0 %v4698_v31 }
  0x89   : > { %1599 = vmatpush1.msra.mxu0 %v4697_v33 }
  0x8a   : > { %1600 = vmatprep.subr.mxu0 %v4695_v34 }
  0x8b   : > { %1601 = vmatpush1.msra.mxu0 %v4694_v35 }
  0x8c   : > { %1602 = vmatprep.subr.mxu0 %v4788_v36  ;;  %v1242_v36 = vlaneseq }
  0x8d   : > { %1603 = vmatpush2.msra.mxu0 %v4787_v37 }
  0x8e   : > { %1604 = vmatprep.subr.mxu0 %v4785_v38 }
  0x8f   : > { %1605 = vmatpush2.msra.mxu0 %v4784_v39 }
  0x90   : > { %1606 = vmatprep.subr.mxu0 %v4782_v40  ;;  %v6230_v40 = vshrl.u32 %v1242_v36, 7 }
  0x91   : > { %1607 = vmatpush2.msra.mxu0 %v4781_v41 }
  0x92   : > { %1608 = vmatprep.subr.mxu0 %v4779_v42 }
  0x93   : > { %1609 = vmatpush2.msra.mxu0 %v4778_v43  ;;  %v8704_v43 = vsub.s32 2, %v6230_v40 }
  0x94   : > { %1610 = vmatprep.subr.mxu0 %v4776_v44 }
  0x95   : > { %1611 = vmatpush2.msra.mxu0 %v4775_v45  ;;  %v1240_v45 = vld [vmem:[%s8685_s2] sm:$0x7] }
  0x96   : > { %1612 = vmatprep.subr.mxu0 %v4773_v46  ;;  %v6237_v46 = vsub.s32 1, %v6230_v40 }
  0x97   : > { %1613 = vmatpush2.msra.mxu0 %v4772_v48 }
  0x98   : > { %1614 = vmatprep.subr.mxu0 %v4770_v49  ;;  %v6240_v49 = vsub.s32 0, %v6230_v40  ;;  %v6245_v54 = vrot.slane %v1240_v45, %v6237_v46 }
  0x99   : > { %1615 = vmatpush2.msra.mxu0 %v4769_v50 }
  0x9a   : > { %1616 = vmatprep.subr.mxu0 %v4767_v51  ;;  %v1253_v51 = vrot.slane %v1240_v45, %v8704_v43 }
  0x9b   : > { %1617 = vmatpush2.msra.mxu0 %v4766_v53 }
  0x9c   : > { %1618 = vmatprep.subr.mxu0 %v4764_v55 }
  0x9d   : > { %1619 = vmatpush2.msra.mxu0 %v4763_v57 }
  0x9e   : > { %1620 = vmatprep.subr.mxu0 %v4761_v59  ;;  %v6248_v59 = vrot.slane %v1240_v45, %v6240_v49 }
  0x9f   : > { %1621 = vmatpush2.msra.mxu0 %v4760_v28 }
  0xa0   : > { %1622 = vmatprep.subr.mxu0 %v4758_v61 }
  0xa1   : > { %1623 = vmatpush2.msra.mxu0 %v4757_v62 }
  0xa2   : > { %1624 = vmatprep.subr.mxu0 %v4755_v1 }
  0xa3   : > { %1625 = vmatpush2.msra.mxu0 %v4754_v2 }
  0xa4   : > { %1626 = vmatprep.subr.mxu0 %v4752_v4 }
  0xa5   : > { %1627 = vmatpush2.msra.mxu0 %v4751_v6 }
  0xa6   : > { %1628 = vmatprep.subr.mxu0 %v4749_v8 }
  0xa7   : > { %1629 = vmatpush2.msra.mxu0 %v4748_v10 }
  0xa8   : > { %1630 = vmatprep.subr.mxu0 %v4746_v11 }
  0xa9   : > { %1631 = vmatpush2.msra.mxu0 %v4745_v12 }
  0xaa   : > { %1632 = vmatprep.subr.mxu0 %v4743_v13 }
  0xab   : > { %1633 = vmatpush2.msra.mxu0 %v4742_v14 }
  0xac   : > { %4819 = vmatprep.subr.msk.mxu0 %vm1560_vm3, %v1393_v15 }
  0xed   : > { %v5330_v23 = vpop.f32.mrf.mxu1 }
  0xee   : > { %v711_v16 = vpop.f32.mrf.mxu0 }
  0xef   : > { %v800_v25 = vpop.f32.mrf.mxu1 }
  0xf0   : > { %v713_v17 = vpop.f32.mrf.mxu0 }
  0xfb   : > { %v717_v18 = vpop.f32.mrf.mxu0 }
  0xfd   : > { %v719_v19 = vpop.f32.mrf.mxu0 }
 0x100   : > { %v723_v20 = vpop.f32.mrf.mxu0 }
 0x102   : > { %v725_v21 = vpop.f32.mrf.mxu0 }
 0x103   : > { %v5333_v26 = vpop.f32.mrf.mxu1 }
 0x105   : > { %v810_v30 = vpop.f32.mrf.mxu1 }
 0x106   : > { %v729_v22 = vpop.f32.mrf.mxu0 }
 0x108   : > { %v6228_v24 = vpop.f32.mrf.mxu0 }
 0x10a   : > { %v5360_v34 = vpop.f32.mrf.mxu1 }
 0x10b   : > { %v988_v50 = vadd.f32 %v5360_v34, %v5330_v23 }
 0x10c   : > { %v893_v27 = vpop.f32.mrf.mxu0  ;;  %v982_v38 = vpop.f32.mrf.mxu1 }
 0x10d   : > { %v894_v55 = vadd.f32 %v893_v27, %v711_v16  ;;  %v983_v56 = vadd.f32 %v982_v38, %v800_v25 }
 0x10e   : > { %v895_v31 = vpop.f32.mrf.mxu0 }
 0x10f   : > { %v896_v57 = vadd.f32 %v895_v31, %v713_v17 }
 0x110   : > { %v5363_v41 = vpop.f32.mrf.mxu1 }
 0x111   : > { %v998_v63 = vadd.f32 %v5363_v41, %v5333_v26 }
 0x112   : > { %v992_v48 = vpop.f32.mrf.mxu1 }
 0x113   : > { %v993_v6 = vadd.f32 %v992_v48, %v810_v30 }
 0x119   : > { %v899_v33 = vpop.f32.mrf.mxu0 }
 0x11a   : > { %v900_v1 = vadd.f32 %v899_v33, %v717_v18 }
 0x11b   : > { %v901_v35 = vpop.f32.mrf.mxu0 }
 0x11c   : > { %v902_v7 = vadd.f32 %v901_v35, %v719_v19 }
 0x11e   : > { %v905_v37 = vpop.f32.mrf.mxu0 }
 0x11f   : > { %v906_v12 = vadd.f32 %v905_v37, %v723_v20 }
 0x120   : > { %v907_v39 = vpop.f32.mrf.mxu0 }
 0x121   : > { %v908_v13 = vadd.f32 %v907_v39, %v725_v21  ;;  %v4786_v39 = vld [vmem:[%s8686_s3 + $0x670] sm:$0xff] }
 0x123   : > { %v911_v42 = vpop.f32.mrf.mxu0 }
 0x124   : > { %v912_v16 = vadd.f32 %v911_v42, %v729_v22  ;;  %v4741_v22 = vld [vmem:[%s8686_s3 + $0x508] sm:$0xff] }
 0x125   : > { %v913_v44 = vpop.f32.mrf.mxu0 }
 0x126   : > { %v914_v41 = vadd.f32 %v913_v44, %v6228_v24  ;;  %v4783_v24 = vld [vmem:[%s8686_s3 + $0x658] sm:$0xff] }
 0x128   : > { %v1120_v52 = vpop.f32.mrf.mxu0 }
 0x129   : > { %v5390_v53 = vpop.f32.mrf.mxu1  ;;  %v1228_v29 = vadd.f32 %v1120_v52, %v894_v55 }
 0x12a   : > { %v1233_v58 = vadd.f32 %v5390_v53, %v988_v50  ;;  %v1122_v60 = vpop.f32.mrf.mxu0  ;;  %v4738_v50 = vld [vmem:[%s8686_s3 + $0x4f0] sm:$0xff] }
 0x12b   : > { %v1209_v28 = vpop.f32.mrf.mxu1  ;;  %v1229_v32 = vadd.f32 %v1122_v60, %v896_v57  ;;  %v1257_v14 = vadd.f32 %v6248_v59, %v1228_v29 }
 0x12c   : > { %v1262_v61 = vadd.f32 %v1253_v51, %v1233_v58  ;;  %v1230_v62 = vadd.f32 %v1209_v28, %v983_v56  ;;  %v1126_v0 = vpop.f32.mrf.mxu0 }
 0x12d   : > { %v5393_v2 = vpop.f32.mrf.mxu1  ;;  %v1258_v4 = vadd.f32 %v6245_v54, %v1229_v32  ;;  %v1231_v8 = vadd.f32 %v1126_v0, %v900_v1  ;;  %v6267_v35 = vmax.f32 %v1257_v14, 0.0  ;;  %v4735_v32 = vld [vmem:[%s8686_s3 + $0x4d8] sm:$0xff]  ;;  %v4780_v0 = vld [vmem:[%s8686_s3 + $0x640] sm:$0xff] }
 0x12e   : > { %v6250_v3 = vmax.f32 %v1262_v61, 0.0  ;;  %v1259_v5 = vadd.f32 %v1253_v51, %v1230_v62  ;;  %v1239_v9 = vadd.f32 %v5393_v2, %v998_v63  ;;  %v1128_v10 = vpop.f32.mrf.mxu0  ;;  %v1392_v14 = vld [vmem:[%s8686_s3 + $0x378] sm:$0xf] }
 0x12f   : > { %v1219_v11 = vpop.f32.mrf.mxu1  ;;  %v1260_v17 = vadd.f32 %v6248_v59, %v1231_v8  ;;  %v1232_v18 = vadd.f32 %v1128_v10, %v902_v7  ;;  %v6258_v27 = vmax.f32 %v1258_v4, 0.0  ;;  %v1522_v62 = vrot.slane %v6267_v35, 1  ;;  %v4732_v4 = vld [vmem:[%s8686_s3 + $0x4c0] sm:$0xff] }
 0x130   : > { %v6254_v15 = vmax.f32 %v1259_v5, 0.0  ;;  %v1236_v23 = vadd.f32 %v1219_v11, %v993_v6  ;;  %v1132_v25 = vpop.f32.mrf.mxu0  ;;  %v1529_v26 = vrot.slane %v6250_v3, 1  ;;  %v1268_v20 = vadd.f32 %v1253_v51, %v1239_v9  ;;  %v4729_v11 = vld [vmem:[%s8686_s3 + $0x4a8] sm:$0xff] }
 0x131   : > { %v1234_v30 = vadd.f32 %v1132_v25, %v906_v12  ;;  %v6261_v31 = vmax.f32 %v1260_v17, 0.0  ;;  %v1261_v21 = vadd.f32 %v6245_v54, %v1232_v18  ;;  %v1525_v57 = vrot.slane %v6258_v27, 1  ;;  %v4726_v17 = vld [vmem:[%s8686_s3 + $0x490] sm:$0xff]  ;;  %v1390_v18 = vld [vmem:[%s8686_s3 + $0x368] sm:$0xff]  ;;  %v4771_v25 = vld [vmem:[%s8686_s3 + $0x5f8] sm:$0xff] }
 0x132   : > { %v1528_v19 = vrot.slane %v6254_v15, 1  ;;  %v1265_v33 = vadd.f32 %v1253_v51, %v1236_v23  ;;  %v1134_v34 = vpop.f32.mrf.mxu0  ;;  %v6294_v55 = vmax.f32 %v1268_v20, 0.0  ;;  %v1387_v20 = vld [vmem:[%s8686_s3 + $0x350] sm:$0xff] }
 0x133   : > { %v1263_v36 = vadd.f32 %v6248_v59, %v1234_v30  ;;  %v1235_v37 = vadd.f32 %v1134_v34, %v908_v13  ;;  %v6277_v42 = vmax.f32 %v1261_v21, 0.0  ;;  %v1523_v44 = vrot.slane %v6261_v31, 1  ;;  %v4774_v13 = vld [vmem:[%s8686_s3 + $0x610] sm:$0xff]  ;;  %v4723_v21 = vld [vmem:[%s8686_s3 + $0x478] sm:$0xff] }
 0x134   : > { %v6271_v38 = vsel %vm628_vm0, %v1528_v19, %v1529_v26  ;;  %v6279_v45 = vmax.f32 %v1265_v33, 0.0  ;;  %v1138_v48 = vpop.f32.mrf.mxu0  ;;  %v6329_v7 = vrot.slane %v6294_v55, 1  ;;  %v4768_v33 = vld [vmem:[%s8686_s3 + $0x5e0] sm:$0xff] }
 0x135   : > { %4810 = vmatmul.mubr.msk.f32.vlgmr.msra.gmra.mxu1 %vm1551_vm4, %v6271_v38  ;;  %v6286_v51 = vmax.f32 %v1263_v36, 0.0  ;;  %v1264_v52 = vadd.f32 %v6245_v54, %v1235_v37  ;;  %v1237_v53 = vadd.f32 %v1138_v48, %v912_v16  ;;  %v1526_v58 = vrot.slane %v6277_v42, 1  ;;  %v4720_v36 = vld [vmem:[%s8686_s3 + $0x460] sm:$0xff]  ;;  %v1384_v37 = vld [vmem:[%s8686_s3 + $0x338] sm:$0xff]  ;;  %v4717_v48 = vld [vmem:[%s8686_s3 + $0x448] sm:$0xff] }
 0x136   : > { %5137 = vmatpush3.msra.mxu1 %v4741_v22  ;;  %1729 = vmatprep.mubr.f32.mxu1 %v8702_v47  ;;  %v1140_v56 = vpop.f32.mrf.mxu0  ;;  %v1535_v60 = vrot.slane %v6279_v45, 1  ;;  %v6317_v2 = vsel %vm628_vm0, %v1522_v62, %v1523_v44  ;;  %v1386_v22 = vld [vmem:[%s8686_s3 + $0x348] sm:$0xff]  ;;  %v1373_v62 = vld [vmem:[%s8686_s3 + $0x2e0] sm:$0xff] }
 0x137   : > { %5138 = vmatprep.subr.mxu1 %v4786_v39  ;;  %v6299_v28 = vmax.f32 %v1264_v52, 0.0  ;;  %v1266_v29 = vadd.f32 %v6248_v59, %v1237_v53  ;;  %v1238_v61 = vadd.f32 %v1140_v56, %v914_v41  ;;  %v1527_v63 = vsel %vm628_vm0, %v1525_v57, %v1526_v58  ;;  %v4765_v39 = vld [vmem:[%s8686_s3 + $0x5c8] sm:$0xff]  ;;  %v1383_v41 = vld [vmem:[%s8686_s3 + $0x330] sm:$0xff]  ;;  %v1380_v53 = vld [vmem:[%s8686_s3 + $0x318] sm:$0xff] }
 0x138   : > { %5139 = vmatpush3.msra.mxu1 %v4738_v50  ;;  %v6308_v1 = vsel %vm628_vm0, %v1529_v26, %v1535_v60  ;;  %1634 = vmatprep.mubr.f32.mxu0 %v1527_v63  ;;  %v1531_v6 = vrot.slane %v6286_v51, 1  ;;  %v6345_v12 = vsel %vm628_vm0, %v1535_v60, %v6329_v7  ;;  %v1389_v26 = vld [vmem:[%s8686_s3 + $0x360] sm:$0xff]  ;;  %v4762_v52 = vld [vmem:[%s8686_s3 + $0x5b0] sm:$0xff]  ;;  %v4759_v56 = vld [vmem:[%s8686_s3 + $0x598] sm:$0xff] }
 0x139   : > { %5140 = vmatprep.subr.mxu1 %v4783_v24  ;;  %v1267_v59 = vadd.f32 %v6245_v54, %v1238_v61  ;;  %4811 = vmatmul.mubr.msk.f32.gmra.mxu1 %vm1551_vm4, %v6308_v1  ;;  %v1533_v5 = vrot.slane %v6299_v28, 1  ;;  %v4777_v54 = vld [vmem:[%s8686_s3 + $0x628] sm:$0xff]  ;;  %v6331_v8 = vmax.f32 %v1266_v29, 0.0  ;;  %v1381_v50 = vld [vmem:[%s8686_s3 + $0x320] sm:$0xff]  ;;  %v4714_v24 = vld [vmem:[%s8686_s3 + $0x430] sm:$0xff] }
 0x13a   : > { %5141 = vmatpush3.msra.mxu1 %v4735_v32  ;;  %1635 = vmatmul.mubr.f32.vlgmr.msra.gmra.mxu0 %v6317_v2  ;;  %v6356_v16 = vsel %vm628_vm0, %v1523_v44, %v1531_v6  ;;  %v1378_v44 = vld [vmem:[%s8686_s3 + $0x308] sm:$0xff]  ;;  %v1377_v57 = vld [vmem:[%s8686_s3 + $0x300] sm:$0xff]  ;;  %v1376_v60 = vld [vmem:[%s8686_s3 + $0x2f8] sm:$0xff] }
 0x13b   : > { %v6333_v9 = vmax.f32 %v1267_v59, 0.0  ;;  %5142 = vmatprep.subr.mxu1 %v4780_v0  ;;  %1735 = vmatprep.mubr.f32.mxu1 %v8702_v47  ;;  %v6337_v10 = vsel %vm628_vm0, %v1526_v58, %v1533_v5  ;;  %v6380_v30 = vrot.slane %v6331_v8, 1  ;;  %v4711_v58 = vld [vmem:[%s8686_s3 + $0x418] sm:$0xff]  ;;  %v4756_v29 = vld [vmem:[%s8686_s3 + $0x580] sm:$0xff]  ;;  %v4705_v59 = vld [vmem:[%s8686_s3 + $0x3e8] sm:$0xff] }
 0x13c   : > { %5143 = vmatpush3.msra.mxu1 %v4732_v4  ;;  %1640 = vmatprep.mubr.f32.mxu0 %v6337_v10  ;;  %v1328_v61 = vld [vmem:[%s8686_s3 + $0x178] sm:$0xff]  ;;  %v4708_v32 = vld [vmem:[%s8686_s3 + $0x400] sm:$0xff]  ;;  %v1370_v4 = vld [vmem:[%s8686_s3 + $0x2c8] sm:$0xff] }
 0x13d   : > { %5144 = vmatprep.subr.mxu1 %v4777_v54  ;;  %4812 = vmatmul.mubr.msk.f32.gmra.mxu1 %vm1551_vm4, %v6345_v12  ;;  %v6365_v23 = vrot.slane %v6333_v9, 1  ;;  %v6397_v34 = vsel %vm628_vm0, %v1531_v6, %v6380_v30  ;;  %v1325_v0 = vld [vmem:[%s8686_s3 + $0x160] sm:$0xff]  ;;  %v1322_v6 = vld [vmem:[%s8686_s3 + $0x148] sm:$0xff]  ;;  %v4702_v54 = vld [vmem:[%s8686_s3 + $0x3d0] sm:$0xff] }
 0x13e   : > { %5145 = vmatpush3.msra.mxu1 %v4729_v11  ;;  %1641 = vmatmul.mubr.f32.gmra.mxu0 %v6356_v16  ;;  %v1367_v11 = vld [vmem:[%s8686_s3 + $0x2b0] sm:$0xff] }
 0x13f   : > { %5146 = vmatprep.subr.mxu1 %v4774_v13  ;;  %4820 = vmatpush1.msk.msra.mxu0 %vm1560_vm3, %v1392_v14  ;;  %v6377_v19 = vsel %vm628_vm0, %v1533_v5, %v6365_v23  ;;  %v4750_v5 = vld [vmem:[%s8686_s3 + $0x550] sm:$0xff]  ;;  %v4747_v13 = vld [vmem:[%s8686_s3 + $0x538] sm:$0xff] }
 0x140   : > { %5147 = vmatpush3.msra.mxu1 %v4726_v17  ;;  %2046 = vmatprep.subr.mxu0 %v1390_v18  ;;  %v1319_v14 = vld [vmem:[%s8686_s3 + $0x130] sm:$0xff]  ;;  %v4699_v17 = vld [vmem:[%s8686_s3 + $0x3b8] sm:$0xff] }
 0x141   : > { %1741 = vmatprep.mubr.f32.mxu1 %v8702_v47  ;;  %5148 = vmatprep.subr.mxu1 %v4771_v25  ;;  %v1364_v18 = vld [vmem:[%s8686_s3 + $0x298] sm:$0xff]  ;;  %v4744_v25 = vld [vmem:[%s8686_s3 + $0x520] sm:$0xff] }
 0x142   : > { %2047 = vmatpush1.msra.mxu0 %v1389_v26  ;;  %1646 = vmatprep.mubr.f32.mxu0 %v6377_v19  ;;  %v1316_v26 = vld [vmem:[%s8686_s3 + $0x118] sm:$0xff] }
 0x143   : > { %4813 = vmatmul.mubr.msk.f32.gmra.mxu1 %vm1551_vm4, %v6329_v7  ;;  %2048 = vmatprep.subr.mxu0 %v1387_v20  ;;  %v4696_v20 = vld [vmem:[%s8686_s3 + $0x3a0] sm:$0xff] }
 0x144   : > { %5149 = vmatpush3.msra.mxu1 %v4723_v21  ;;  %1647 = vmatmul.mubr.f32.gmra.mxu0 %v6397_v34  ;;  %v1361_v21 = vld [vmem:[%s8686_s3 + $0x280] sm:$0xff] }
 0x145   : > { %5150 = vmatprep.subr.mxu1 %v4768_v33  ;;  %1812 = vmatprep.mubr.f32.mxu1 %v1527_v63  ;;  %v4753_v63 = vld [vmem:[%s8686_s3 + $0x568] sm:$0xff]  ;;  %v1313_v33 = vld [vmem:[%s8686_s3 + $0x100] sm:$0xff] }
 0x146   : > { %2049 = vmatpush1.msra.mxu0 %v1386_v22  ;;  %1652 = vmatprep.mubr.f32.mxu0 %v6365_v23  ;;  %v1358_v22 = vld [vmem:[%s8686_s3 + $0x268] sm:$0xff] }
 0x147   : > { %5151 = vmatpush3.msra.mxu1 %v4720_v36  ;;  %2050 = vmatprep.subr.mxu0 %v1384_v37  ;;  %v4807_v36 = vld [vmem:[%s8686_s3 + $0x718] sm:$0xf]  ;;  %v1310_v37 = vld [vmem:[%s8686_s3 + $0xe8] sm:$0xff] }
 0x148   : > { %5152 = vmatprep.subr.mxu1 %v4765_v39  ;;  %2051 = vmatpush1.msra.mxu0 %v1383_v41  ;;  %v1355_v39 = vld [vmem:[%s8686_s3 + $0x250] sm:$0xff]  ;;  %v1352_v41 = vld [vmem:[%s8686_s3 + $0x238] sm:$0xff] }
 0x149   : > { %5153 = vmatpush3.msra.mxu1 %v4717_v48  ;;  %2052 = vmatprep.subr.mxu0 %v1381_v50  ;;  %v1304_v48 = vld [vmem:[%s8686_s3 + $0xb8] sm:$0xff]  ;;  %v4801_v50 = vld [vmem:[%s8686_s3 + $0x6e8] sm:$0xff] }
 0x14a   : > { %1653 = vmatmul.mubr.f32.gmra.mxu0 %v6380_v30  ;;  %5154 = vmatprep.subr.mxu1 %v4762_v52  ;;  %v1301_v52 = vld [vmem:[%s8686_s3 + $0xa0] sm:$0xff] }
 0x14b   : > { %2053 = vmatpush1.msra.mxu0 %v1380_v53  ;;  %5155 = vmatpush3.msra.mxu1 %v4714_v24  ;;  %v4798_v53 = vld [vmem:[%s8686_s3 + $0x6d0] sm:$0xff]  ;;  %v1298_v24 = vld [vmem:[%s8686_s3 + $0x88] sm:$0xff] }
 0x14c   : > { %2054 = vmatprep.subr.mxu0 %v1378_v44  ;;  %5156 = vmatprep.subr.mxu1 %v4759_v56  ;;  %v4795_v44 = vld [vmem:[%s8686_s3 + $0x6b8] sm:$0xff]  ;;  %v1295_v56 = vld [vmem:[%s8686_s3 + $0x70] sm:$0xff] }
 0x14d   : > { %2055 = vmatpush1.msra.mxu0 %v1377_v57  ;;  %5157 = vmatpush3.msra.mxu1 %v4711_v58  ;;  %v4792_v57 = vld [vmem:[%s8686_s3 + $0x6a0] sm:$0xff]  ;;  %v1292_v58 = vld [vmem:[%s8686_s3 + $0x58] sm:$0xff] }
 0x14e   : > { %2088 = vmatprep.mubr.f32.mxu0 %v8702_v47  ;;  %5190 = vmatprep.subr.mxu0 %v1376_v60  ;;  %v1327_v60 = vld [vmem:[%s8686_s3 + $0x170] sm:$0xff] }
 0x14f   : > { %5158 = vmatprep.subr.mxu1 %v4756_v29  ;;  %4821 = vmatmul.mubr.msk.f32.vlgmr.msra.gmra.mxu0 %vm1551_vm4, %v6254_v15  ;;  %v1326_v29 = vld [vmem:[%s8686_s3 + $0x168] sm:$0xff] }
 0x150   : > { %5191 = vmatpush3.msra.mxu0 %v1328_v61  ;;  %5159 = vmatpush3.msra.mxu1 %v4708_v32  ;;  %v1289_v61 = vld [vmem:[%s8686_s3 + $0x40] sm:$0xff]  ;;  %v1334_v32 = vld [vmem:[%s8686_s3 + $0x1a8] sm:$0xff] }
 0x151   : > { %5192 = vmatprep.subr.mxu0 %v1373_v62  ;;  %5160 = vmatprep.subr.mxu1 %v4753_v63  ;;  %v1323_v62 = vld [vmem:[%s8686_s3 + $0x150] sm:$0xff]  ;;  %v1286_v63 = vld [vmem:[%s8686_s3 + $0x28] sm:$0xff] }
 0x152   : > { %5193 = vmatpush3.msra.mxu0 %v1325_v0  ;;  %5161 = vmatpush3.msra.mxu1 %v4705_v59  ;;  %v1321_v0 = vld [vmem:[%s8686_s3 + $0x140] sm:$0xff]  ;;  %v1320_v59 = vld [vmem:[%s8686_s3 + $0x138] sm:$0xff] }
 0x153   : > { %2094 = vmatprep.mubr.f32.mxu0 %v8702_v47  ;;  %5194 = vmatprep.subr.mxu0 %v1370_v4  ;;  %v1283_v4 = vld [vmem:[%s8686_s3 + $0x10] sm:$0xff] }
 0x154   : > { %5162 = vmatprep.subr.mxu1 %v4750_v5  ;;  %4822 = vmatmul.mubr.msk.f32.gmra.mxu0 %vm1551_vm4, %v6250_v3  ;;  %v1317_v5 = vld [vmem:[%s8686_s3 + $0x120] sm:$0xff] }
 0x155   : > { %5195 = vmatpush3.msra.mxu0 %v1322_v6  ;;  %5163 = vmatpush3.msra.mxu1 %v4702_v54  ;;  %v1315_v6 = vld [vmem:[%s8686_s3 + $0x110] sm:$0xff]  ;;  %v1314_v54 = vld [vmem:[%s8686_s3 + $0x108] sm:$0xff] }
 0x156   : > { %5196 = vmatprep.subr.mxu0 %v1367_v11  ;;  %5164 = vmatprep.subr.mxu1 %v4747_v13  ;;  %v1312_v11 = vld [vmem:[%s8686_s3 + $0xf8] sm:$0xff]  ;;  %v1311_v13 = vld [vmem:[%s8686_s3 + $0xf0] sm:$0xff] }
 0x157   : > { %5197 = vmatpush3.msra.mxu0 %v1319_v14  ;;  %5165 = vmatpush3.msra.mxu1 %v4699_v17  ;;  %v1391_v14 = vld [vmem:[%s8686_s3 + $0x370] sm:$0xff]  ;;  %v1309_v17 = vld [vmem:[%s8686_s3 + $0xe0] sm:$0xff] }
 0x158   : > { %2100 = vmatprep.mubr.f32.mxu0 %v8702_v47  ;;  %5198 = vmatprep.subr.mxu0 %v1364_v18  ;;  %v1308_v18 = vld [vmem:[%s8686_s3 + $0xd8] sm:$0xff] }
 0x159   : > { %5166 = vmatprep.subr.mxu1 %v4744_v25  ;;  %4823 = vmatmul.mubr.msk.f32.gmra.mxu0 %vm1551_vm4, %v6279_v45  ;;  %v1388_v25 = vld [vmem:[%s8686_s3 + $0x358] sm:$0xff] }
 0x15a   : > { %5199 = vmatpush3.msra.mxu0 %v1316_v26  ;;  %5167 = vmatpush3.msra.mxu1 %v4696_v20  ;;  %v1306_v26 = vld [vmem:[%s8686_s3 + $0xc8] sm:$0xff]  ;;  %v1305_v20 = vld [vmem:[%s8686_s3 + $0xc0] sm:$0xff] }
 0x15b   : > { %5200 = vmatprep.subr.mxu0 %v1361_v21  ;;  %1813 = vmatmul.mubr.f32.vlgmr.msra.gmra.mxu1 %v6317_v2  ;;  %v1307_v2 = vld [vmem:[%s8686_s3 + $0xd0] sm:$0xff]  ;;  %v1385_v21 = vld [vmem:[%s8686_s3 + $0x340] sm:$0xff] }
 0x15c   : > { %5201 = vmatpush3.msra.mxu0 %v1313_v33  ;;  %1817 = vmatprep.mubr.f32.mxu1 %v6337_v10  ;;  %v4804_v10 = vld [vmem:[%s8686_s3 + $0x700] sm:$0xff]  ;;  %v1303_v33 = vld [vmem:[%s8686_s3 + $0xb0] sm:$0xff] }
 0x15d   : > { %2106 = vmatprep.mubr.f32.mxu0 %v8702_v47  ;;  %5202 = vmatprep.subr.mxu0 %v1358_v22  ;;  %v1302_v22 = vld [vmem:[%s8686_s3 + $0xa8] sm:$0xff] }
 0x15e   : > { %4824 = vmatmul.mubr.msk.f32.gmra.mxu0 %vm1551_vm4, %v6294_v55  ;;  %5394 = vmatprep.subr.msk.mxu1 %vm1560_vm3, %v4807_v36 }
 0x15f   : > { %5203 = vmatpush3.msra.mxu0 %v1310_v37  ;;  %2177 = vmatprep.mubr.f32.mxu0 %v6258_v27  ;;  %v1300_v37 = vld [vmem:[%s8686_s3 + $0x98] sm:$0xff] }
 0x160   : > { %5204 = vmatprep.subr.mxu0 %v1355_v39  ;;  %1818 = vmatmul.mubr.f32.gmra.mxu1 %v6356_v16  ;;  %v1349_v16 = vld [vmem:[%s8686_s3 + $0x220] sm:$0xff]  ;;  %v1299_v39 = vld [vmem:[%s8686_s3 + $0x90] sm:$0xff] }
 0x161   : > { %5395 = vmatpush3.msk.msra.mxu1 %vm1560_vm3, %v4807_v36  ;;  %5205 = vmatpush3.msra.mxu0 %v1307_v2  ;;  %v1382_v36 = vld [vmem:[%s8686_s3 + $0x328] sm:$0xff]  ;;  %v1379_v2 = vld [vmem:[%s8686_s3 + $0x310] sm:$0xff] }
 0x162   : > { %1822 = vmatprep.mubr.f32.mxu1 %v6377_v19  ;;  %5396 = vmatprep.subr.mxu1 %v4804_v10  ;;  %v1346_v19 = vld [vmem:[%s8686_s3 + $0x208] sm:$0xff] }
 0x163   : > { %5206 = vmatprep.subr.mxu0 %v1352_v41  ;;  %5397 = vmatpush3.msra.mxu1 %v4804_v10  ;;  %v1297_v10 = vld [vmem:[%s8686_s3 + $0x80] sm:$0xff]  ;;  %v1296_v41 = vld [vmem:[%s8686_s3 + $0x78] sm:$0xff] }
 0x164   : > { %5207 = vmatpush3.msra.mxu0 %v1304_v48  ;;  %5398 = vmatprep.subr.mxu1 %v4801_v50  ;;  %v4942_v48 = vld [vmem:[%s8686_s3 + $0xaa0] sm:$0xf] }
 0x165   : > { %5208 = vmatprep.subr.mxu0 %v1349_v16  ;;  %1823 = vmatmul.mubr.f32.gmra.mxu1 %v6397_v34  ;;  %v1343_v34 = vld [vmem:[%s8686_s3 + $0x1f0] sm:$0xff]  ;;  %v4941_v16 = vld [vmem:[%s8686_s3 + $0xa98] sm:$0xf] }
 0x166   : > { %5399 = vmatpush3.msra.mxu1 %v4801_v50  ;;  %5209 = vmatpush3.msra.mxu0 %v1301_v52  ;;  %v1294_v50 = vld [vmem:[%s8686_s3 + $0x68] sm:$0xff]  ;;  %v1293_v52 = vld [vmem:[%s8686_s3 + $0x60] sm:$0xff] }
 0x167   : > { %1827 = vmatprep.mubr.f32.mxu1 %v6365_v23  ;;  %5400 = vmatprep.subr.mxu1 %v4798_v53  ;;  %v1340_v23 = vld [vmem:[%s8686_s3 + $0x1d8] sm:$0xff] }
 0x168   : > { %5210 = vmatprep.subr.mxu0 %v1346_v19  ;;  %5401 = vmatpush3.msra.mxu1 %v4798_v53  ;;  %v4939_v53 = vld [vmem:[%s8686_s3 + $0xa88] sm:$0xff]  ;;  %v1291_v19 = vld [vmem:[%s8686_s3 + $0x50] sm:$0xff] }
 0x169   : > { %5211 = vmatpush3.msra.mxu0 %v1298_v24  ;;  %5402 = vmatprep.subr.mxu1 %v4795_v44  ;;  %v4938_v24 = vld [vmem:[%s8686_s3 + $0xa80] sm:$0xff] }
 0x16a   : > { %5212 = vmatprep.subr.mxu0 %v1343_v34  ;;  %1828 = vmatmul.mubr.f32.gmra.mxu1 %v6380_v30  ;;  %v1337_v30 = vld [vmem:[%s8686_s3 + $0x1c0] sm:$0xff]  ;;  %v4936_v34 = vld [vmem:[%s8686_s3 + $0xa70] sm:$0xff] }
 0x16b   : > { %5403 = vmatpush3.msra.mxu1 %v4795_v44  ;;  %5213 = vmatpush3.msra.mxu0 %v1295_v56  ;;  %v1290_v44 = vld [vmem:[%s8686_s3 + $0x48] sm:$0xff]  ;;  %v1288_v56 = vld [vmem:[%s8686_s3 + $0x38] sm:$0xff] }
 0x16c   : > { %5404 = vmatprep.subr.mxu1 %v4792_v57  ;;  %5406 = vmatprep.mubr.msk.f32.mxu1 %vm1551_vm4, %v6271_v38  ;;  %v1324_v38 = vld [vmem:[%s8686_s3 + $0x158] sm:$0xff] }
 0x16d   : > { %5214 = vmatprep.subr.mxu0 %v1340_v23  ;;  %5405 = vmatpush3.msra.mxu1 %v4792_v57  ;;  %v4935_v57 = vld [vmem:[%s8686_s3 + $0xa68] sm:$0xff]  ;;  %v1287_v23 = vld [vmem:[%s8686_s3 + $0x30] sm:$0xff] }
 0x16e   : > { %5215 = vmatpush3.msra.mxu0 %v1292_v58  ;;  %1935 = vmatprep.subr.mxu1 %v1327_v60  ;;  %v4933_v58 = vld [vmem:[%s8686_s3 + $0xa58] sm:$0xff]  ;;  %v1285_v60 = vld [vmem:[%s8686_s3 + $0x20] sm:$0xff] }
 0x16f   : > { %5216 = vmatprep.subr.mxu0 %v1337_v30  ;;  %5407 = vmatmul.mubr.msk.f32.vlgmr.msra.gmra.mxu1 %vm1551_vm4, %v6308_v1  ;;  %v1331_v1 = vld [vmem:[%s8686_s3 + $0x190] sm:$0xff] }
 0x170   : > { %1936 = vmatpush1.msra.mxu1 %v1326_v29  ;;  %5217 = vmatpush3.msra.mxu0 %v1289_v61  ;;  %v4932_v30 = vld [vmem:[%s8686_s3 + $0xa50] sm:$0xff]  ;;  %v1284_v29 = vld [vmem:[%s8686_s3 + $0x18] sm:$0xff]  ;;  %v4930_v61 = vld [vmem:[%s8686_s3 + $0xa40] sm:$0xff] }
 0x171   : > { %5409 = vmatprep.mubr.msk.f32.mxu1 %vm1551_vm4, %v6345_v12  ;;  %1937 = vmatprep.subr.mxu1 %v1324_v38  ;;  %v1318_v12 = vld [vmem:[%s8686_s3 + $0x128] sm:$0xff] }
 0x172   : > { %5218 = vmatprep.subr.mxu0 %v1334_v32  ;;  %1938 = vmatpush1.msra.mxu1 %v1323_v62  ;;  %v1282_v38 = vld [vmem:[%s8686_s3 + $0x8] sm:$0xff]  ;;  %v4929_v32 = vld [vmem:[%s8686_s3 + $0xa38] sm:$0xff]  ;;  %v1281_v62 = vld [vmem:[%s8686_s3] sm:$0xff] }
 0x173   : > { %5219 = vmatpush3.msra.mxu0 %v1286_v63  ;;  %1939 = vmatprep.subr.mxu1 %v1321_v0  ;;  %v2404_v63 = vrot.slane %v6254_v15, 2  ;;  %v4927_v0 = vld [vmem:[%s8686_s3 + $0xa28] sm:$0xff] }
 0x174   : > { %5220 = vmatprep.subr.mxu0 %v1331_v1  ;;  %5410 = vmatmul.mubr.msk.f32.gmra.mxu1 %vm1551_vm4, %v6329_v7  ;;  %v1394_v7 = vld [vmem:[%s8686_s3 + $0x388] sm:$0xf]  ;;  %v1375_v1 = vld [vmem:[%s8686_s3 + $0x2f0] sm:$0xff] }
 0x175   : > { %1940 = vmatpush1.msra.mxu1 %v1320_v59  ;;  %5221 = vmatpush3.msra.mxu0 %v1283_v4  ;;  %v4926_v59 = vld [vmem:[%s8686_s3 + $0xa20] sm:$0xff]  ;;  %v2405_v4 = vrot.slane %v6250_v3, 2 }
 0x176   : > { %1941 = vmatprep.subr.mxu1 %v1318_v12  ;;  %1999 = vmatprep.mubr.f32.mxu1 %v6258_v27  ;;  %v4925_v12 = vld [vmem:[%s8686_s3 + $0xa18] sm:$0xff] }
 0x177   : > { %2178 = vmatmul.mubr.f32.vlgmr.msra.gmra.mxu0 %v6267_v35  ;;  %1942 = vmatpush1.msra.mxu1 %v1317_v5  ;;  %v1372_v5 = vld [vmem:[%s8686_s3 + $0x2d8] sm:$0xff] }
 0x178   : > { %2182 = vmatprep.mubr.f32.mxu0 %v6277_v42  ;;  %1943 = vmatprep.subr.mxu1 %v1315_v6  ;;  %v4877_v6 = vld [vmem:[%s8686_s3 + $0x898] sm:$0xff] }
 0x179   : > { %1944 = vmatpush1.msra.mxu1 %v1314_v54  ;;  %5412 = vmatprep.subr.msk.mxu0 %vm1560_vm3, %v1394_v7  ;;  %v1371_v54 = vld [vmem:[%s8686_s3 + $0x2d0] sm:$0xff] }
 0x17a   : > { %1945 = vmatprep.subr.mxu1 %v1312_v11  ;;  %5413 = vmatpush3.msk.msra.mxu0 %vm1560_vm3, %v1394_v7  ;;  %v4922_v7 = vld [vmem:[%s8686_s3 + $0xa00] sm:$0xff] }
 0x17b   : > { %2183 = vmatmul.mubr.f32.gmra.mxu0 %v6261_v31  ;;  %1946 = vmatpush1.msra.mxu1 %v1311_v13  ;;  %v1369_v11 = vld [vmem:[%s8686_s3 + $0x2c0] sm:$0xff]  ;;  %v2411_v13 = vrot.slane %v6279_v45, 2 }
 0x17c   : > { %2187 = vmatprep.mubr.f32.mxu0 %v6299_v28  ;;  %5414 = vmatprep.subr.mxu0 %v1391_v14 }
 0x17d   : > { %1947 = vmatprep.subr.mxu1 %v1309_v17  ;;  %5415 = vmatpush3.msra.mxu0 %v1391_v14  ;;  %v4874_v14 = vld [vmem:[%s8686_s3 + $0x880] sm:$0xff]  ;;  %v1368_v17 = vld [vmem:[%s8686_s3 + $0x2b8] sm:$0xff] }
 0x17e   : > { %1948 = vmatpush1.msra.mxu1 %v1308_v18  ;;  %5416 = vmatprep.subr.mxu0 %v1388_v25  ;;  %v4919_v18 = vld [vmem:[%s8686_s3 + $0x9e8] sm:$0xff] }
 0x17f   : > { %1949 = vmatprep.subr.mxu1 %v1306_v26  ;;  %2188 = vmatmul.mubr.f32.gmra.mxu0 %v6286_v51  ;;  %v4871_v26 = vld [vmem:[%s8686_s3 + $0x868] sm:$0xff] }
 0x180   : > { %5417 = vmatpush3.msra.mxu0 %v1388_v25  ;;  %1950 = vmatpush1.msra.mxu1 %v1305_v20  ;;  %v6835_v25 = vsel %vm1038_vm2, %v2405_v4, %v2411_v13  ;;  %v1365_v20 = vld [vmem:[%s8686_s3 + $0x2a0] sm:$0xff] }
 0x181   : > { %2192 = vmatprep.mubr.f32.mxu0 %v6333_v9  ;;  %5418 = vmatprep.subr.mxu0 %v1385_v21 }
 0x182   : > { %1951 = vmatprep.subr.mxu1 %v1303_v33  ;;  %5419 = vmatpush3.msra.mxu0 %v1385_v21  ;;  %v4916_v21 = vld [vmem:[%s8686_s3 + $0x9d0] sm:$0xff] }
 0x183   : > { %1952 = vmatpush1.msra.mxu1 %v1302_v22  ;;  %5420 = vmatprep.subr.mxu0 %v1382_v36  ;;  %v1363_v33 = vld [vmem:[%s8686_s3 + $0x290] sm:$0xff] }
 0x184   : > { %1953 = vmatprep.subr.mxu1 %v1300_v37  ;;  %2193 = vmatmul.mubr.f32.gmra.mxu0 %v6331_v8  ;;  %v4868_v22 = vld [vmem:[%s8686_s3 + $0x850] sm:$0xff]  ;;  %v6858_v37 = vrot.slane %v6294_v55, 2 }
 0x185   : > { %5421 = vmatpush3.msra.mxu0 %v1382_v36  ;;  %1954 = vmatpush1.msra.mxu1 %v1299_v39  ;;  %v1362_v36 = vld [vmem:[%s8686_s3 + $0x288] sm:$0xff]  ;;  %v4913_v39 = vld [vmem:[%s8686_s3 + $0x9b8] sm:$0xff] }
 0x186   : > { %5422 = vmatprep.subr.mxu0 %v1379_v2  ;;  %5424 = vmatprep.mubr.msk.f32.mxu0 %vm1551_vm4, %v6254_v15  ;;  %v1374_v15 = vld [vmem:[%s8686_s3 + $0x2e8] sm:$0xff] }
 0x187   : > { %1955 = vmatprep.subr.mxu1 %v1297_v10  ;;  %5423 = vmatpush3.msra.mxu0 %v1379_v2  ;;  %v1360_v2 = vld [vmem:[%s8686_s3 + $0x278] sm:$0xff]  ;;  %v6869_v10 = vsel %vm1038_vm2, %v2411_v13, %v6858_v37 }
 0x188   : > { %1956 = vmatpush1.msra.mxu1 %v1296_v41  ;;  %4944 = vmatprep.subr.msk.mxu0 %vm1560_vm3, %v4942_v48  ;;  %v1359_v41 = vld [vmem:[%s8686_s3 + $0x270] sm:$0xff]  ;;  %v4910_v48 = vld [vmem:[%s8686_s3 + $0x9a0] sm:$0xff]  ;;  %v4841_v13 = vld [vmem:[%s8686_s3 + $0x778] sm:$0xff] }
 0x189   : > { %1957 = vmatprep.subr.mxu1 %v1294_v50  ;;  %5425 = vmatmul.mubr.msk.f32.vlgmr.msra.gmra.mxu0 %vm1551_vm4, %v6250_v3  ;;  %v6804_v3 = vsel %vm1038_vm2, %v2404_v63, %v2405_v4  ;;  %v1357_v50 = vld [vmem:[%s8686_s3 + $0x260] sm:$0xff]  ;;  %v4847_v4 = vld [vmem:[%s8686_s3 + $0x7a8] sm:$0xff] }
 0x18a   : > { %4945 = vmatpush1.msk.msra.mxu0 %vm1560_vm3, %v4941_v16  ;;  %1958 = vmatpush1.msra.mxu1 %v1293_v52  ;;  %v4862_v16 = vld [vmem:[%s8686_s3 + $0x820] sm:$0xff]  ;;  %v1356_v52 = vld [vmem:[%s8686_s3 + $0x258] sm:$0xff] }
 0x18b   : > { %5427 = vmatprep.mubr.msk.f32.mxu0 %vm1551_vm4, %v6279_v45  ;;  %2555 = vmatprep.subr.mxu0 %v4939_v53  ;;  %v1366_v45 = vld [vmem:[%s8686_s3 + $0x2a8] sm:$0xff]  ;;  %v2402_v53 = vrot.slane %v6277_v42, 2  ;;  %v4850_v63 = vld [vmem:[%s8686_s3 + $0x7c0] sm:$0xff] }
 0x18c   : > { %1959 = vmatprep.subr.mxu1 %v1291_v19  ;;  %2556 = vmatpush1.msra.mxu0 %v4938_v24  ;;  %v4907_v19 = vld [vmem:[%s8686_s3 + $0x988] sm:$0xff] }
 0x18d   : > { %1960 = vmatpush1.msra.mxu1 %v1290_v44  ;;  %2557 = vmatprep.subr.mxu0 %v4936_v34  ;;  %v1354_v24 = vld [vmem:[%s8686_s3 + $0x248] sm:$0xff]  ;;  %v2401_v34 = vrot.slane %v6258_v27, 2  ;;  %v1351_v27 = vld [vmem:[%s8686_s3 + $0x230] sm:$0xff] }
 0x18e   : > { %1961 = vmatprep.subr.mxu1 %v1288_v56  ;;  %5428 = vmatmul.mubr.msk.f32.gmra.mxu0 %vm1551_vm4, %v6294_v55  ;;  %v4865_v55 = vld [vmem:[%s8686_s3 + $0x838] sm:$0xff]  ;;  %v4859_v44 = vld [vmem:[%s8686_s3 + $0x808] sm:$0xff]  ;;  %v1353_v56 = vld [vmem:[%s8686_s3 + $0x240] sm:$0xff] }
 0x18f   : > { %2558 = vmatpush1.msra.mxu0 %v4935_v57  ;;  %1962 = vmatpush1.msra.mxu1 %v1287_v23  ;;  %v4904_v57 = vld [vmem:[%s8686_s3 + $0x970] sm:$0xff]  ;;  %v6914_v23 = vsel %vm1038_vm2, %v2401_v34, %v2402_v53  ;;  %v2407_v34 = vrot.slane %v6286_v51, 2 }
 0x190   : > { %2559 = vmatprep.subr.mxu0 %v4933_v58  ;;  %1963 = vmatprep.subr.mxu1 %v1285_v60  ;;  %v4856_v58 = vld [vmem:[%s8686_s3 + $0x7f0] sm:$0xff]  ;;  %v1350_v60 = vld [vmem:[%s8686_s3 + $0x228] sm:$0xff] }
 0x191   : > { %2560 = vmatpush1.msra.mxu0 %v4932_v30  ;;  %1964 = vmatpush1.msra.mxu1 %v1284_v29  ;;  %v4901_v30 = vld [vmem:[%s8686_s3 + $0x958] sm:$0xff] }
 0x192   : > { %2561 = vmatprep.subr.mxu0 %v4930_v61  ;;  %1965 = vmatprep.subr.mxu1 %v1282_v38  ;;  %v1348_v29 = vld [vmem:[%s8686_s3 + $0x218] sm:$0xff]  ;;  %v1347_v38 = vld [vmem:[%s8686_s3 + $0x210] sm:$0xff] }
 0x193   : > { %2562 = vmatpush1.msra.mxu0 %v4929_v32  ;;  %1966 = vmatpush1.msra.mxu1 %v1281_v62  ;;  %v4853_v61 = vld [vmem:[%s8686_s3 + $0x7d8] sm:$0xff]  ;;  %v4898_v32 = vld [vmem:[%s8686_s3 + $0x940] sm:$0xff] }
 0x194   : > { %2563 = vmatprep.subr.mxu0 %v4927_v0  ;;  %1967 = vmatprep.subr.mxu1 %v1375_v1  ;;  %v1345_v62 = vld [vmem:[%s8686_s3 + $0x200] sm:$0xff]  ;;  %v1344_v0 = vld [vmem:[%s8686_s3 + $0x1f8] sm:$0xff]  ;;  %v4895_v1 = vld [vmem:[%s8686_s3 + $0x928] sm:$0xff] }
 0x195   : > { %2564 = vmatpush1.msra.mxu0 %v4926_v59  ;;  %2597 = vmatprep.mubr.f32.mxu0 %v8702_v47  ;;  %v1342_v59 = vld [vmem:[%s8686_s3 + $0x1e8] sm:$0xff] }
 0x196   : > { %1968 = vmatpush2.msra.mxu1 %v1374_v15  ;;  %4946 = vmatmul.mubr.msk.f32.vlgmr.msra.gmra.mxu0 %vm1551_vm4, %v6804_v3  ;;  %v1341_v15 = vld [vmem:[%s8686_s3 + $0x1e0] sm:$0xff] }
 0x197   : > { %5244 = vmatprep.subr.mxu0 %v4925_v12  ;;  %1969 = vmatprep.subr.mxu1 %v1372_v5  ;;  %v4892_v12 = vld [vmem:[%s8686_s3 + $0x910] sm:$0xff] }
 0x198   : > { %5245 = vmatpush3.msra.mxu0 %v4877_v6  ;;  %1970 = vmatpush2.msra.mxu1 %v1371_v54  ;;  %v1339_v5 = vld [vmem:[%s8686_s3 + $0x1d0] sm:$0xff]  ;;  %v1338_v54 = vld [vmem:[%s8686_s3 + $0x1c8] sm:$0xff] }
 0x199   : > { %5246 = vmatprep.subr.mxu0 %v4922_v7  ;;  %1971 = vmatprep.subr.mxu1 %v1369_v11  ;;  %v4844_v6 = vld [vmem:[%s8686_s3 + $0x790] sm:$0xff]  ;;  %v4889_v7 = vld [vmem:[%s8686_s3 + $0x8f8] sm:$0xff] }
 0x19a   : > { %2603 = vmatprep.mubr.f32.mxu0 %v8702_v47  ;;  %5247 = vmatpush3.msra.mxu0 %v4874_v14  ;;  %v1336_v11 = vld [vmem:[%s8686_s3 + $0x1b8] sm:$0xff]  ;;  %v1335_v14 = vld [vmem:[%s8686_s3 + $0x1b0] sm:$0xff] }
 0x19b   : > { %1972 = vmatpush2.msra.mxu1 %v1368_v17  ;;  %4947 = vmatmul.mubr.msk.f32.gmra.mxu0 %vm1551_vm4, %v6835_v25  ;;  %v4886_v17 = vld [vmem:[%s8686_s3 + $0x8e0] sm:$0xff] }
 0x19c   : > { %5248 = vmatprep.subr.mxu0 %v4919_v18  ;;  %1973 = vmatprep.subr.mxu1 %v1366_v45  ;;  %v1333_v18 = vld [vmem:[%s8686_s3 + $0x1a0] sm:$0xff] }
 0x19d   : > { %5249 = vmatpush3.msra.mxu0 %v4871_v26  ;;  %1974 = vmatpush2.msra.mxu1 %v1365_v20  ;;  %v4838_v45 = vld [vmem:[%s8686_s3 + $0x760] sm:$0xff]  ;;  %v1332_v26 = vld [vmem:[%s8686_s3 + $0x198] sm:$0xff]  ;;  %v4883_v20 = vld [vmem:[%s8686_s3 + $0x8c8] sm:$0xff] }
 0x19e   : > { %5250 = vmatprep.subr.mxu0 %v4916_v21  ;;  %1975 = vmatprep.subr.mxu1 %v1363_v33  ;;  %v1330_v21 = vld [vmem:[%s8686_s3 + $0x188] sm:$0xff] }
 0x19f   : > { %2609 = vmatprep.mubr.f32.mxu0 %v8702_v47  ;;  %5251 = vmatpush3.msra.mxu0 %v4868_v22  ;;  %v4835_v33 = vld [vmem:[%s8686_s3 + $0x748] sm:$0xff]  ;;  %v1329_v22 = vld [vmem:[%s8686_s3 + $0x180] sm:$0xff] }
 0x1a0   : > { %1976 = vmatpush2.msra.mxu1 %v1362_v36  ;;  %4948 = vmatmul.mubr.msk.f32.gmra.mxu0 %vm1551_vm4, %v6869_v10  ;;  %v4880_v36 = vld [vmem:[%s8686_s3 + $0x8b0] sm:$0xff] }
 0x1a1   : > { %5252 = vmatprep.subr.mxu0 %v4913_v39  ;;  %1977 = vmatprep.subr.mxu1 %v1360_v2  ;;  %v4876_v39 = vld [vmem:[%s8686_s3 + $0x890] sm:$0xff]  ;;  %v2399_v2 = vrot.slane %v6261_v31, 2 }
 0x1a2   : > { %5253 = vmatpush3.msra.mxu0 %v4865_v55  ;;  %1978 = vmatpush2.msra.mxu1 %v1359_v41  ;;  %v4832_v55 = vld [vmem:[%s8686_s3 + $0x730] sm:$0xff]  ;;  %v2409_v41 = vrot.slane %v6299_v28, 2 }
 0x1a3   : > { %5254 = vmatprep.subr.mxu0 %v4910_v48  ;;  %1979 = vmatprep.subr.mxu1 %v1357_v50  ;;  %v4875_v48 = vld [vmem:[%s8686_s3 + $0x888] sm:$0xff]  ;;  %v2398_v50 = vrot.slane %v6267_v35, 2 }
 0x1a4   : > { %2615 = vmatprep.mubr.f32.mxu0 %v8702_v47  ;;  %5255 = vmatpush3.msra.mxu0 %v4862_v16  ;;  %v4873_v16 = vld [vmem:[%s8686_s3 + $0x878] sm:$0xff] }
 0x1a5   : > { %1980 = vmatpush2.msra.mxu1 %v1356_v52  ;;  %4949 = vmatmul.mubr.msk.f32.gmra.mxu0 %vm1551_vm4, %v6858_v37  ;;  %v7031_v52 = vsel %vm1038_vm2, %v2398_v50, %v2399_v2  ;;  %v4903_v50 = vld [vmem:[%s8686_s3 + $0x968] sm:$0xff] }
 0x1a6   : > { %5256 = vmatprep.subr.mxu0 %v4907_v19  ;;  %1981 = vmatprep.subr.mxu1 %v1354_v24  ;;  %v4872_v19 = vld [vmem:[%s8686_s3 + $0x870] sm:$0xff]  ;;  %v4943_v24 = vld [vmem:[%s8686_s3 + $0xaa8] sm:$0xf] }
 0x1a7   : > { %5257 = vmatpush3.msra.mxu0 %v4859_v44  ;;  %2686 = vmatprep.mubr.f32.mxu0 %v6914_v23  ;;  %v4870_v44 = vld [vmem:[%s8686_s3 + $0x860] sm:$0xff] }
 0x1a8   : > { %1982 = vmatpush2.msra.mxu1 %v1353_v56  ;;  %5258 = vmatprep.subr.mxu0 %v4904_v57  ;;  %v4869_v56 = vld [vmem:[%s8686_s3 + $0x858] sm:$0xff]  ;;  %v7054_v57 = vrot.slane %v6333_v9, 2 }
 0x1a9   : > { %1983 = vmatprep.subr.mxu1 %v1351_v27  ;;  %5259 = vmatpush3.msra.mxu0 %v4856_v58  ;;  %v4866_v27 = vld [vmem:[%s8686_s3 + $0x840] sm:$0xff]  ;;  %v4940_v58 = vld [vmem:[%s8686_s3 + $0xa90] sm:$0xff] }
 0x1aa   : > { %1984 = vmatpush2.msra.mxu1 %v1350_v60  ;;  %5260 = vmatprep.subr.mxu0 %v4901_v30  ;;  %v7080_v60 = vrot.slane %v6331_v8, 2  ;;  %v4863_v30 = vld [vmem:[%s8686_s3 + $0x828] sm:$0xff] }
 0x1ab   : > { %1985 = vmatprep.subr.mxu1 %v1348_v29  ;;  %5261 = vmatpush3.msra.mxu0 %v4853_v61  ;;  %v4937_v29 = vld [vmem:[%s8686_s3 + $0xa78] sm:$0xff] }
 0x1ac   : > { %1986 = vmatpush2.msra.mxu1 %v1347_v38  ;;  %5262 = vmatprep.subr.mxu0 %v4898_v32  ;;  %v4861_v61 = vld [vmem:[%s8686_s3 + $0x818] sm:$0xff]  ;;  %v7097_v38 = vsel %vm1038_vm2, %v2407_v34, %v7080_v60  ;;  %v4934_v32 = vld [vmem:[%s8686_s3 + $0xa60] sm:$0xff] }
 0x1ad   : > { %1987 = vmatprep.subr.mxu1 %v1345_v62  ;;  %5263 = vmatpush3.msra.mxu0 %v4850_v63  ;;  %v4857_v62 = vld [vmem:[%s8686_s3 + $0x7f8] sm:$0xff]  ;;  %v4931_v63 = vld [vmem:[%s8686_s3 + $0xa48] sm:$0xff] }
 0x1ae   : > { %1988 = vmatpush2.msra.mxu1 %v1344_v0  ;;  %5264 = vmatprep.subr.mxu0 %v4895_v1  ;;  %v4855_v0 = vld [vmem:[%s8686_s3 + $0x7e8] sm:$0xff]  ;;  %v4854_v1 = vld [vmem:[%s8686_s3 + $0x7e0] sm:$0xff] }
 0x1af   : > { %1989 = vmatprep.subr.mxu1 %v1342_v59  ;;  %5265 = vmatpush3.msra.mxu0 %v4847_v4  ;;  %v4852_v59 = vld [vmem:[%s8686_s3 + $0x7d0] sm:$0xff]  ;;  %v4849_v4 = vld [vmem:[%s8686_s3 + $0x7b8] sm:$0xff] }
 0x1b0   : > { %1990 = vmatpush2.msra.mxu1 %v1341_v15  ;;  %5266 = vmatprep.subr.mxu0 %v4892_v12  ;;  %v4848_v15 = vld [vmem:[%s8686_s3 + $0x7b0] sm:$0xff]  ;;  %v4845_v12 = vld [vmem:[%s8686_s3 + $0x798] sm:$0xff] }
 0x1b1   : > { %1991 = vmatprep.subr.mxu1 %v1339_v5  ;;  %5267 = vmatpush3.msra.mxu0 %v4844_v6  ;;  %v4843_v5 = vld [vmem:[%s8686_s3 + $0x788] sm:$0xff] }
 0x1b2   : > { %1992 = vmatpush2.msra.mxu1 %v1338_v54  ;;  %5268 = vmatprep.subr.mxu0 %v4889_v7  ;;  %v4839_v6 = vld [vmem:[%s8686_s3 + $0x768] sm:$0xff]  ;;  %v4837_v54 = vld [vmem:[%s8686_s3 + $0x758] sm:$0xff]  ;;  %v4834_v7 = vld [vmem:[%s8686_s3 + $0x740] sm:$0xff] }
 0x1b3   : > { %1993 = vmatprep.subr.mxu1 %v1336_v11  ;;  %5269 = vmatpush3.msra.mxu0 %v4841_v13  ;;  %v4833_v11 = vld [vmem:[%s8686_s3 + $0x738] sm:$0xff]  ;;  %v4831_v13 = vld [vmem:[%s8686_s3 + $0x728] sm:$0xff] }
 0x1b4   : > { %1994 = vmatpush2.msra.mxu1 %v1335_v14  ;;  %5270 = vmatprep.subr.mxu0 %v4886_v17  ;;  %v4830_v14 = vld [vmem:[%s8686_s3 + $0x720] sm:$0xff]  ;;  %v4924_v17 = vld [vmem:[%s8686_s3 + $0xa10] sm:$0xff] }
 0x1b5   : > { %1995 = vmatprep.subr.mxu1 %v1333_v18  ;;  %5271 = vmatpush3.msra.mxu0 %v4838_v45  ;;  %v4923_v18 = vld [vmem:[%s8686_s3 + $0xa08] sm:$0xff]  ;;  %v4921_v45 = vld [vmem:[%s8686_s3 + $0x9f8] sm:$0xff] }
 0x1b6   : > { %1996 = vmatpush2.msra.mxu1 %v1332_v26  ;;  %5272 = vmatprep.subr.mxu0 %v4883_v20  ;;  %v4920_v26 = vld [vmem:[%s8686_s3 + $0x9f0] sm:$0xff]  ;;  %v4918_v20 = vld [vmem:[%s8686_s3 + $0x9e0] sm:$0xff] }
 0x1b7   : > { %1997 = vmatprep.subr.mxu1 %v1330_v21  ;;  %5273 = vmatpush3.msra.mxu0 %v4835_v33  ;;  %v4917_v21 = vld [vmem:[%s8686_s3 + $0x9d8] sm:$0xff]  ;;  %v4915_v33 = vld [vmem:[%s8686_s3 + $0x9c8] sm:$0xff] }
 0x1b8   : > { %1998 = vmatpush2.msra.mxu1 %v1329_v22  ;;  %5274 = vmatprep.subr.mxu0 %v4880_v36  ;;  %v4914_v22 = vld [vmem:[%s8686_s3 + $0x9c0] sm:$0xff]  ;;  %v4912_v36 = vld [vmem:[%s8686_s3 + $0x9b0] sm:$0xff] }
 0x1b9   : > { %2000 = vmatmul.mubr.f32.vlgmr.msra.gmra.mxu1 %v6267_v35  ;;  %2444 = vmatprep.subr.mxu1 %v4876_v39  ;;  %v7043_v35 = vsel %vm1038_vm2, %v2402_v53, %v2409_v41  ;;  %v7063_v53 = vsel %vm1038_vm2, %v2399_v2, %v2407_v34  ;;  %v4911_v39 = vld [vmem:[%s8686_s3 + $0x9a8] sm:$0xff]  ;;  %v4909_v2 = vld [vmem:[%s8686_s3 + $0x998] sm:$0xff]  ;;  %v4896_v34 = vld [vmem:[%s8686_s3 + $0x930] sm:$0xff] }
 0x1ba   : > { %5275 = vmatpush3.msra.mxu0 %v4832_v55  ;;  %2005 = vmatprep.mubr.f32.mxu1 %v6277_v42  ;;  %v4867_v42 = vld [vmem:[%s8686_s3 + $0x848] sm:$0xff]  ;;  %v4908_v55 = vld [vmem:[%s8686_s3 + $0x990] sm:$0xff] }
 0x1bb   : > { %2445 = vmatpush1.msra.mxu1 %v4875_v48  ;;  %2687 = vmatmul.mubr.f32.vlgmr.msra.gmra.mxu0 %v7031_v52  ;;  %v4905_v48 = vld [vmem:[%s8686_s3 + $0x978] sm:$0xff] }
 0x1bc   : > { %2446 = vmatprep.subr.mxu1 %v4873_v16  ;;  %2691 = vmatprep.mubr.f32.mxu0 %v7043_v35  ;;  %v4902_v16 = vld [vmem:[%s8686_s3 + $0x960] sm:$0xff] }
 0x1bd   : > { %2447 = vmatpush1.msra.mxu1 %v4872_v19  ;;  %5430 = vmatprep.subr.msk.mxu0 %vm1560_vm3, %v4943_v24  ;;  %v4900_v19 = vld [vmem:[%s8686_s3 + $0x950] sm:$0xff] }
 0x1be   : > { %2006 = vmatmul.mubr.f32.gmra.mxu1 %v6261_v31  ;;  %2448 = vmatprep.subr.mxu1 %v4870_v44  ;;  %v7074_v31 = vsel %vm1038_vm2, %v2409_v41, %v7054_v57  ;;  %v4906_v41 = vld [vmem:[%s8686_s3 + $0x980] sm:$0xff]  ;;  %v4897_v44 = vld [vmem:[%s8686_s3 + $0x938] sm:$0xff] }
 0x1bf   : > { %2011 = vmatprep.mubr.f32.mxu1 %v6299_v28  ;;  %2449 = vmatpush1.msra.mxu1 %v4869_v56  ;;  %v4864_v28 = vld [vmem:[%s8686_s3 + $0x830] sm:$0xff]  ;;  %v4894_v56 = vld [vmem:[%s8686_s3 + $0x920] sm:$0xff] }
 0x1c0   : > { %2692 = vmatmul.mubr.f32.gmra.mxu0 %v7063_v53  ;;  %2450 = vmatprep.subr.mxu1 %v4867_v42  ;;  %v4893_v42 = vld [vmem:[%s8686_s3 + $0x918] sm:$0xff] }
 0x1c1   : > { %2696 = vmatprep.mubr.f32.mxu0 %v7074_v31  ;;  %5431 = vmatpush3.msk.msra.mxu0 %vm1560_vm3, %v4943_v24  ;;  %v4899_v24 = vld [vmem:[%s8686_s3 + $0x948] sm:$0xff] }
 0x1c2   : > { %2451 = vmatpush1.msra.mxu1 %v4866_v27  ;;  %5432 = vmatprep.subr.mxu0 %v4940_v58  ;;  %v4891_v27 = vld [vmem:[%s8686_s3 + $0x908] sm:$0xff] }
 0x1c3   : > { %2012 = vmatmul.mubr.f32.gmra.mxu1 %v6286_v51  ;;  %2452 = vmatprep.subr.mxu1 %v4864_v28  ;;  %v4860_v51 = vld [vmem:[%s8686_s3 + $0x810] sm:$0xff] }
 0x1c4   : > { %5433 = vmatpush3.msra.mxu0 %v4940_v58  ;;  %2017 = vmatprep.mubr.f32.mxu1 %v6333_v9  ;;  %v4858_v9 = vld [vmem:[%s8686_s3 + $0x800] sm:$0xff]  ;;  %v4888_v28 = vld [vmem:[%s8686_s3 + $0x8f0] sm:$0xff] }
 0x1c5   : > { %2453 = vmatpush1.msra.mxu1 %v4863_v30  ;;  %2697 = vmatmul.mubr.f32.gmra.mxu0 %v7097_v38  ;;  %v4890_v58 = vld [vmem:[%s8686_s3 + $0x900] sm:$0xff]  ;;  %v4887_v30 = vld [vmem:[%s8686_s3 + $0x8e8] sm:$0xff] }
 0x1c6   : > { %5434 = vmatprep.subr.mxu0 %v4937_v29  ;;  %2454 = vmatprep.subr.mxu1 %v4861_v61 }
 0x1c7   : > { %2701 = vmatprep.mubr.f32.mxu0 %v7054_v57  ;;  %5435 = vmatpush3.msra.mxu0 %v4937_v29  ;;  %v4885_v29 = vld [vmem:[%s8686_s3 + $0x8d8] sm:$0xff] }
 0x1c8   : > { %2455 = vmatpush1.msra.mxu1 %v4860_v51  ;;  %5436 = vmatprep.subr.mxu0 %v4934_v32  ;;  %v4884_v51 = vld [vmem:[%s8686_s3 + $0x8d0] sm:$0xff] }
 0x1c9   : > { %2018 = vmatmul.mubr.f32.gmra.mxu1 %v6331_v8  ;;  %2456 = vmatprep.subr.mxu1 %v4858_v9  ;;  %v4928_v8 = vld [vmem:[%s8686_s3 + $0xa30] sm:$0xff]  ;;  %v4881_v9 = vld [vmem:[%s8686_s3 + $0x8b8] sm:$0xff] }
 0x1ca   : > { %5437 = vmatpush3.msra.mxu0 %v4934_v32  ;;  %2457 = vmatpush1.msra.mxu1 %v4857_v62  ;;  %v4882_v32 = vld [vmem:[%s8686_s3 + $0x8c0] sm:$0xff]  ;;  %v4879_v62 = vld [vmem:[%s8686_s3 + $0x8a8] sm:$0xff] }
 0x1cb   : > { %2508 = vmatprep.mubr.f32.mxu1 %v6914_v23  ;;  %2702 = vmatmul.mubr.f32.gmra.mxu0 %v7080_v60  ;;  %v4851_v23 = vld [vmem:[%s8686_s3 + $0x7c8] sm:$0xff] }
 0x1cc   : > { %5438 = vmatprep.subr.mxu0 %v4931_v63  ;;  %2458 = vmatprep.subr.mxu1 %v4855_v0 }
 0x1cd   : > { %5439 = vmatpush3.msra.mxu0 %v4931_v63  ;;  %5442 = vmatprep.mubr.msk.f32.mxu0 %vm1551_vm4, %v6804_v3  ;;  %v4846_v3 = vld [vmem:[%s8686_s3 + $0x7a0] sm:$0xff] }
 0x1ce   : > { %2459 = vmatpush1.msra.mxu1 %v4854_v1  ;;  %5440 = vmatprep.subr.mxu0 %v4928_v8  ;;  %v4878_v1 = vld [vmem:[%s8686_s3 + $0x8a0] sm:$0xff] }
 0x1cf   : > { %2460 = vmatprep.subr.mxu1 %v4852_v59  ;;  %5441 = vmatpush3.msra.mxu0 %v4928_v8 }
 0x1d0   : > { %2461 = vmatpush1.msra.mxu1 %v4851_v23  ;;  %5443 = vmatmul.mubr.msk.f32.vlgmr.msra.gmra.mxu0 %vm1551_vm4, %v6835_v25  ;;  %v4842_v25 = vld [vmem:[%s8686_s3 + $0x780] sm:$0xff] }
 0x1d1   : > { %2462 = vmatprep.subr.mxu1 %v4849_v4  ;;  %5445 = vmatprep.mubr.msk.f32.mxu0 %vm1551_vm4, %v6869_v10  ;;  %v4840_v10 = vld [vmem:[%s8686_s3 + $0x770] sm:$0xff] }
 0x1d2   : > { %2463 = vmatpush1.msra.mxu1 %v4848_v15 }
 0x1d3   : > { %2464 = vmatprep.subr.mxu1 %v4846_v3 }
 0x1d4   : > { %2465 = vmatpush1.msra.mxu1 %v4845_v12  ;;  %5446 = vmatmul.mubr.msk.f32.gmra.mxu0 %vm1551_vm4, %v6858_v37  ;;  %v4836_v37 = vld [vmem:[%s8686_s3 + $0x750] sm:$0xff] }
 0x1d5   : > { %2466 = vmatprep.subr.mxu1 %v4843_v5  ;;  %2985 = vmatprep.mubr.f32.mxu0 %v8702_v47 }
 0x1d6   : > { %2467 = vmatpush1.msra.mxu1 %v4842_v25 }
 0x1d7   : > { %2468 = vmatprep.subr.mxu1 %v4840_v10 }
 0x1d8   : > { %2469 = vmatpush1.msra.mxu1 %v4839_v6 }
 0x1d9   : > { %2470 = vmatprep.subr.mxu1 %v4837_v54 }
 0x1da   : > { %2471 = vmatpush1.msra.mxu1 %v4836_v37 }
 0x1db   : > { %2472 = vmatprep.subr.mxu1 %v4834_v7 }
 0x1dc   : > { %2473 = vmatpush1.msra.mxu1 %v4833_v11 }
 0x1dd   : > { %2474 = vmatprep.subr.mxu1 %v4831_v13 }
 0x1de   : > { %2475 = vmatpush1.msra.mxu1 %v4830_v14 }
 0x1df   : > { %2476 = vmatprep.subr.mxu1 %v4924_v17 }
 0x1e0   : > { %2477 = vmatpush2.msra.mxu1 %v4923_v18 }
 0x1e1   : > { %2478 = vmatprep.subr.mxu1 %v4921_v45 }
 0x1e2   : > { %2479 = vmatpush2.msra.mxu1 %v4920_v26 }
 0x1e3   : > { %2480 = vmatprep.subr.mxu1 %v4918_v20 }
 0x1e4   : > { %2481 = vmatpush2.msra.mxu1 %v4917_v21  ;;  %v3104_v21 = vld [vmem:[%s8689_s6 + $0xf8] sm:$0xff] }
 0x1e5   : > { %2482 = vmatprep.subr.mxu1 %v4915_v33  ;;  %v3103_v33 = vld [vmem:[%s8689_s6 + $0xf0] sm:$0xff] }
 0x1e6   : > { %2483 = vmatpush2.msra.mxu1 %v4914_v22  ;;  %v3102_v22 = vld [vmem:[%s8689_s6 + $0xe8] sm:$0xff] }
 0x1e7   : > { %2484 = vmatprep.subr.mxu1 %v4912_v36  ;;  %v3101_v36 = vld [vmem:[%s8689_s6 + $0xe0] sm:$0xff] }
 0x1e8   : > { %2485 = vmatpush2.msra.mxu1 %v4911_v39 }
 0x1e9   : > { %2486 = vmatprep.subr.mxu1 %v4909_v2  ;;  %v3100_v2 = vld [vmem:[%s8689_s6 + $0xd8] sm:$0xff] }
 0x1ea   : > { %2487 = vmatpush2.msra.mxu1 %v4908_v55 }
 0x1eb   : > { %2488 = vmatprep.subr.mxu1 %v4906_v41  ;;  %v3099_v41 = vld [vmem:[%s8689_s6 + $0xd0] sm:$0xff] }
 0x1ec   : > { %2489 = vmatpush2.msra.mxu1 %v4905_v48  ;;  %v3098_v48 = vld [vmem:[%s8689_s6 + $0xc8] sm:$0xff] }
 0x1ed   : > { %2490 = vmatprep.subr.mxu1 %v4903_v50  ;;  %v3097_v50 = vld [vmem:[%s8689_s6 + $0xc0] sm:$0xff] }
 0x1ee   : > { %2491 = vmatpush2.msra.mxu1 %v4902_v16 }
 0x1ef   : > { %2492 = vmatprep.subr.mxu1 %v4900_v19  ;;  %v3096_v19 = vld [vmem:[%s8689_s6 + $0xb8] sm:$0xff] }
 0x1f0   : > { %2493 = vmatpush2.msra.mxu1 %v4899_v24 }
 0x1f1   : > { %2494 = vmatprep.subr.mxu1 %v4897_v44  ;;  %v3095_v44 = vld [vmem:[%s8689_s6 + $0xb0] sm:$0xff] }
 0x1f2   : > { %2495 = vmatpush2.msra.mxu1 %v4896_v34  ;;  %v3094_v34 = vld [vmem:[%s8689_s6 + $0xa8] sm:$0xff] }
 0x1f3   : > { %2496 = vmatprep.subr.mxu1 %v4894_v56 }
 0x1f4   : > { %2497 = vmatpush2.msra.mxu1 %v4893_v42  ;;  %v3093_v42 = vld [vmem:[%s8689_s6 + $0xa0] sm:$0xff] }
 0x1f5   : > { %2498 = vmatprep.subr.mxu1 %v4891_v27  ;;  %v1725_v61 = vpop.f32.mrf.mxu1 }
 0x1f6   : > { %2499 = vmatpush2.msra.mxu1 %v4890_v58  ;;  %v3092_v58 = vld [vmem:[%s8689_s6 + $0x98] sm:$0xff] }
 0x1f7   : > { %2500 = vmatprep.subr.mxu1 %v4888_v28  ;;  %v1727_v63 = vpop.f32.mrf.mxu1  ;;  %v3091_v28 = vld [vmem:[%s8689_s6 + $0x90] sm:$0xff] }
 0x1f8   : > { %2501 = vmatpush2.msra.mxu1 %v4887_v30  ;;  %v3090_v30 = vld [vmem:[%s8689_s6 + $0x88] sm:$0xff] }
 0x1f9   : > { %2502 = vmatprep.subr.mxu1 %v4885_v29  ;;  %v1731_v4 = vpop.f32.mrf.mxu1 }
 0x1fa   : > { %2503 = vmatpush2.msra.mxu1 %v4884_v51  ;;  %v1636_v0 = vpop.f32.mrf.mxu0 }
 0x1fb   : > { %2504 = vmatprep.subr.mxu1 %v4882_v32  ;;  %v7281_v8 = vadd.f32 %v1725_v61, %v1636_v0  ;;  %v7330_v17 = vpop.f32.mrf.mxu1  ;;  %v3089_v61 = vld [vmem:[%s8689_s6 + $0x80] sm:$0xff]  ;;  %v3088_v32 = vld [vmem:[%s8689_s6 + $0x78] sm:$0xff] }
 0x1fc   : > { %2505 = vmatpush2.msra.mxu1 %v4881_v9  ;;  %v1638_v59 = vpop.f32.mrf.mxu0  ;;  %v3087_v9 = vld [vmem:[%s8689_s6 + $0x70] sm:$0xff]  ;;  %v3085_v0 = vld [vmem:[%s8689_s6 + $0x60] sm:$0xff] }
 0x1fd   : > { %2506 = vmatprep.subr.mxu1 %v4879_v62  ;;  %v7283_v23 = vadd.f32 %v1727_v63, %v1638_v59  ;;  %v7334_v45 = vpop.f32.mrf.mxu1  ;;  %v3086_v62 = vld [vmem:[%s8689_s6 + $0x68] sm:$0xff]  ;;  %v3084_v59 = vld [vmem:[%s8689_s6 + $0x58] sm:$0xff] }
 0x1fe   : > { %2507 = vmatpush2.msra.mxu1 %v4878_v1  ;;  %v1642_v15 = vpop.f32.mrf.mxu0 }
 0x1ff   : > { %2509 = vmatmul.mubr.f32.vlgmr.msra.gmra.mxu1 %v7031_v52  ;;  %v7286_v3 = vadd.f32 %v1731_v4, %v1642_v15  ;;  %v7338_v20 = vpop.f32.mrf.mxu1  ;;  %3150 = vmatprep.subr.mxu1 %v3104_v21  ;;  %v3083_v4 = vld [vmem:[%s8689_s6 + $0x50] sm:$0xff]  ;;  %v3082_v21 = vld [vmem:[%s8689_s6 + $0x48] sm:$0xff] }
 0x200   : > { %2514 = vmatprep.mubr.f32.mxu1 %v7043_v35  ;;  %v7294_v12 = vpop.f32.mrf.mxu0  ;;  %3151 = vmatpush1.msra.mxu1 %v3103_v33 }
 0x201   : > { %3152 = vmatprep.subr.mxu1 %v3102_v22  ;;  %v3081_v22 = vld [vmem:[%s8689_s6 + $0x40] sm:$0xff] }
 0x202   : > { %3153 = vmatpush1.msra.mxu1 %v3101_v36  ;;  %v3080_v36 = vld [vmem:[%s8689_s6 + $0x38] sm:$0xff] }
 0x203   : > { %2515 = vmatmul.mubr.f32.gmra.mxu1 %v7063_v53  ;;  %v7357_v55 = vpop.f32.mrf.mxu1  ;;  %3154 = vmatprep.subr.mxu1 %v3100_v2  ;;  %v3079_v2 = vld [vmem:[%s8689_s6 + $0x30] sm:$0xff] }
 0x204   : > { %2520 = vmatprep.mubr.f32.mxu1 %v7074_v31  ;;  %v7296_v5 = vpop.f32.mrf.mxu0  ;;  %3155 = vmatpush1.msra.mxu1 %v3099_v41 }
 0x205   : > { %v7373_v24 = vpop.f32.mrf.mxu1  ;;  %3156 = vmatprep.subr.mxu1 %v3098_v48  ;;  %v3078_v48 = vld [vmem:[%s8689_s6 + $0x28] sm:$0xff] }
 0x206   : > { %v7298_v25 = vpop.f32.mrf.mxu0  ;;  %3157 = vmatpush1.msra.mxu1 %v3097_v50 }
 0x207   : > { %2521 = vmatmul.mubr.f32.gmra.mxu1 %v7097_v38  ;;  %3158 = vmatprep.subr.mxu1 %v3096_v19  ;;  %v3077_v19 = vld [vmem:[%s8689_s6 + $0x20] sm:$0xff] }
 0x208   : > { %2526 = vmatprep.mubr.f32.mxu1 %v7054_v57  ;;  %3159 = vmatpush1.msra.mxu1 %v3095_v44  ;;  %v3076_v44 = vld [vmem:[%s8689_s6 + $0x18] sm:$0xff] }
 0x209   : > { %3160 = vmatprep.subr.mxu1 %v3094_v34  ;;  %v3075_v34 = vld [vmem:[%s8689_s6 + $0x10] sm:$0xff] }
 0x20a   : > { %v7300_v52 = vpop.f32.mrf.mxu0  ;;  %3161 = vmatpush1.msra.mxu1 %v3093_v42 }
 0x20b   : > { %2527 = vmatmul.mubr.f32.gmra.mxu1 %v7080_v60  ;;  %3162 = vmatprep.subr.mxu1 %v3092_v58  ;;  %v3074_v58 = vld [vmem:[%s8689_s6 + $0x8] sm:$0xff] }
 0x20c   : > { %v7302_v10 = vpop.f32.mrf.mxu0  ;;  %3163 = vmatpush1.msra.mxu1 %v3091_v28 }
 0x20d   : > { %3164 = vmatprep.subr.mxu1 %v3090_v30  ;;  %v3073_v30 = vld [vmem:[%s8689_s6] sm:$0xff] }
 0x20e   : > { %3165 = vmatpush1.msra.mxu1 %v3089_v61  ;;  %v3136_v61 = vld [vmem:[%s8689_s6 + $0x1f8] sm:$0xff] }
 0x20f   : > { %v7304_v35 = vpop.f32.mrf.mxu0  ;;  %3166 = vmatprep.subr.mxu1 %v3088_v32  ;;  %v3135_v32 = vld [vmem:[%s8689_s6 + $0x1f0] sm:$0xff] }
 0x210   : > { %3167 = vmatpush1.msra.mxu1 %v3087_v9 }
 0x211   : > { %v7306_v53 = vpop.f32.mrf.mxu0  ;;  %3168 = vmatprep.subr.mxu1 %v3086_v62  ;;  %v3134_v62 = vld [vmem:[%s8689_s6 + $0x1e8] sm:$0xff] }
 0x212   : > { %3169 = vmatpush1.msra.mxu1 %v3085_v0 }
 0x213   : > { %3170 = vmatprep.subr.mxu1 %v3084_v59  ;;  %v3133_v59 = vld [vmem:[%s8689_s6 + $0x1e0] sm:$0xff] }
 0x214   : > { %v7308_v31 = vpop.f32.mrf.mxu0  ;;  %3171 = vmatpush1.msra.mxu1 %v3083_v4  ;;  %v3132_v4 = vld [vmem:[%s8689_s6 + $0x1d8] sm:$0xff] }
 0x215   : > { %3172 = vmatprep.subr.mxu1 %v3082_v21  ;;  %v3131_v21 = vld [vmem:[%s8689_s6 + $0x1d0] sm:$0xff] }
 0x216   : > { %v7310_v38 = vpop.f32.mrf.mxu0  ;;  %3173 = vmatpush1.msra.mxu1 %v3081_v22 }
 0x217   : > { %3174 = vmatprep.subr.mxu1 %v3080_v36  ;;  %v3130_v36 = vld [vmem:[%s8689_s6 + $0x1c8] sm:$0xff] }
 0x218   : > { %3175 = vmatpush1.msra.mxu1 %v3079_v2 }
 0x219   : > { %v7312_v57 = vpop.f32.mrf.mxu0  ;;  %3176 = vmatprep.subr.mxu1 %v3078_v48  ;;  %v3129_v48 = vld [vmem:[%s8689_s6 + $0x1c0] sm:$0xff] }
 0x21a   : > { %8710 = vst [vmem:[#allocation3_spill] sm:$0xff] %v7312_v57  ;;  %3177 = vmatpush1.msra.mxu1 %v3077_v19  ;;  %v3128_v19 = vld [vmem:[%s8689_s6 + $0x1b8] sm:$0xff] }
 0x21b   : > { %v7314_v60 = vpop.f32.mrf.mxu0  ;;  %v7381_v56 = vpop.f32.mrf.mxu1  ;;  %3178 = vmatprep.subr.mxu1 %v3076_v44  ;;  %v3127_v44 = vld [vmem:[%s8689_s6 + $0x1b0] sm:$0xff] }
 0x21c   : > { %8711 = vst [vmem:[#allocation4_spill] sm:$0xff] %v7314_v60  ;;  %3179 = vmatpush1.msra.mxu1 %v3075_v34 }
 0x21d   : > { %v7397_v29 = vpop.f32.mrf.mxu1  ;;  %3180 = vmatprep.subr.mxu1 %v3074_v58  ;;  %v3126_v58 = vld [vmem:[%s8689_s6 + $0x1a8] sm:$0xff] }
 0x21e   : > { %v7316_v6 = vpop.f32.mrf.mxu0  ;;  %3181 = vmatpush1.msra.mxu1 %v3073_v30 }
 0x21f   : > { %8712 = vst [vmem:[#allocation5_spill] sm:$0xff] %v7316_v6  ;;  %3182 = vmatprep.subr.mxu1 %v3136_v61  ;;  %v3125_v61 = vld [vmem:[%s8689_s6 + $0x1a0] sm:$0xff] }
 0x220   : > { %v7318_v54 = vpop.f32.mrf.mxu0  ;;  %v7413_v63 = vpop.f32.mrf.mxu1  ;;  %3183 = vmatpush2.msra.mxu1 %v3135_v32  ;;  %v3124_v32 = vld [vmem:[%s8689_s6 + $0x198] sm:$0xff] }
 0x221   : > { %8713 = vst [vmem:[#allocation6_spill] sm:$0xff] %v7318_v54  ;;  %3184 = vmatprep.subr.mxu1 %v3134_v62  ;;  %v3123_v62 = vld [vmem:[%s8689_s6 + $0x190] sm:$0xff] }
 0x222   : > { %v7431_v33 = vpop.f32.mrf.mxu1  ;;  %3185 = vmatpush2.msra.mxu1 %v3133_v59 }
 0x223   : > { %3186 = vmatprep.subr.mxu1 %v3132_v4  ;;  %v3122_v4 = vld [vmem:[%s8689_s6 + $0x188] sm:$0xff] }
 0x224   : > { %3187 = vmatpush2.msra.mxu1 %v3131_v21 }
 0x225   : > { %v7447_v50 = vpop.f32.mrf.mxu1  ;;  %3188 = vmatprep.subr.mxu1 %v3130_v36  ;;  %v3121_v36 = vld [vmem:[%s8689_s6 + $0x180] sm:$0xff] }
 0x226   : > { %3189 = vmatpush2.msra.mxu1 %v3129_v48  ;;  %v3120_v48 = vld [vmem:[%s8689_s6 + $0x178] sm:$0xff] }
 0x227   : > { %v7463_v28 = vpop.f32.mrf.mxu1  ;;  %3190 = vmatprep.subr.mxu1 %v3128_v19  ;;  %v3119_v19 = vld [vmem:[%s8689_s6 + $0x170] sm:$0xff] }
 0x228   : > { %3191 = vmatpush2.msra.mxu1 %v3127_v44 }
 0x229   : > { %3192 = vmatprep.subr.mxu1 %v3126_v58  ;;  %v3118_v58 = vld [vmem:[%s8689_s6 + $0x168] sm:$0xff] }
 0x22a   : > { %v7479_v0 = vpop.f32.mrf.mxu1  ;;  %3193 = vmatpush2.msra.mxu1 %v3125_v61 }
 0x22b   : > { %3194 = vmatprep.subr.mxu1 %v3124_v32  ;;  %v3117_v32 = vld [vmem:[%s8689_s6 + $0x160] sm:$0xff] }
 0x22c   : > { %v7495_v2 = vpop.f32.mrf.mxu1  ;;  %3195 = vmatpush2.msra.mxu1 %v3123_v62 }
 0x22d   : > { %3196 = vmatprep.subr.mxu1 %v3122_v4  ;;  %v3116_v4 = vld [vmem:[%s8689_s6 + $0x158] sm:$0xff] }
 0x22e   : > { %3197 = vmatpush2.msra.mxu1 %v3121_v36  ;;  %v3115_v36 = vld [vmem:[%s8689_s6 + $0x150] sm:$0xff] }
 0x22f   : > { %v7511_v30 = vpop.f32.mrf.mxu1  ;;  %3198 = vmatprep.subr.mxu1 %v3120_v48  ;;  %v3114_v48 = vld [vmem:[%s8689_s6 + $0x148] sm:$0xff] }
 0x230   : > { %3199 = vmatpush2.msra.mxu1 %v3119_v19  ;;  %v3113_v19 = vld [vmem:[%s8689_s6 + $0x140] sm:$0xff] }
 0x231   : > { %v7527_v21 = vpop.f32.mrf.mxu1  ;;  %3200 = vmatprep.subr.mxu1 %v3118_v58  ;;  %v3112_v58 = vld [vmem:[%s8689_s6 + $0x138] sm:$0xff] }
 0x232   : > { %3201 = vmatpush2.msra.mxu1 %v3117_v32  ;;  %v3111_v32 = vld [vmem:[%s8689_s6 + $0x130] sm:$0xff] }
 0x233   : > { %3202 = vmatprep.subr.mxu1 %v3116_v4  ;;  %v3110_v4 = vld [vmem:[%s8689_s6 + $0x128] sm:$0xff] }
 0x234   : > { %v5411_v61 = vpop.f32.mrf.mxu1  ;;  %3203 = vmatpush2.msra.mxu1 %v3115_v36  ;;  %v3109_v36 = vld [vmem:[%s8689_s6 + $0x120] sm:$0xff] }
 0x235   : > { %3204 = vmatprep.subr.mxu1 %v3114_v48 }
 0x236   : > { %v1909_v47 = vpop.f32.mrf.mxu1  ;;  %3205 = vmatpush2.msra.mxu1 %v3113_v19 }
 0x237   : > { %v7320_v37 = vpop.f32.mrf.mxu0  ;;  %3206 = vmatprep.subr.mxu1 %v3112_v58 }
 0x238   : > { %3207 = vmatpush2.msra.mxu1 %v3111_v32  ;;  %v1734_v32 = vadd.f32 %v7330_v17, %v7294_v12 }
 0x239   : > { %v7322_v7 = vpop.f32.mrf.mxu0  ;;  %3208 = vmatprep.subr.mxu1 %v3110_v4  ;;  %v1738_v4 = vadd.f32 %v7334_v45, %v7296_v5 }
 0x23a   : > { %3209 = vmatpush2.msra.mxu1 %v3109_v36  ;;  %v1740_v36 = vadd.f32 %v7338_v20, %v7298_v25  ;;  %v5224_v12 = vadd.f32 %v7322_v7, %v7320_v37  ;;  %v5176_v25 = vadd.f32 %v7463_v28, %v7447_v50  ;;  %v1746_v37 = vadd.f32 %v7373_v24, %v7302_v10 }
 0x23b   : > { %v7324_v11 = vpop.f32.mrf.mxu0 }
 0x23d   : > { %v7326_v13 = vpop.f32.mrf.mxu0 }
 0x23e   : > { %v5227_v45 = vadd.f32 %v7326_v13, %v7324_v11 }
 0x23f   : > { %v7328_v14 = vpop.f32.mrf.mxu0 }
 0x241   : > { %v7332_v18 = vpop.f32.mrf.mxu0 }
 0x242   : > { %v5230_v20 = vadd.f32 %v7332_v18, %v7328_v14 }
 0x244   : > { %v7336_v26 = vpop.f32.mrf.mxu0 }
 0x246   : > { %v7352_v39 = vpop.f32.mrf.mxu0 }
 0x247   : > { %v5233_v11 = vadd.f32 %v7352_v39, %v7336_v26 }
 0x249   : > { %v7368_v16 = vpop.f32.mrf.mxu0 }
 0x24b   : > { %v7386_v27 = vpop.f32.mrf.mxu0 }
 0x24c   : > { %8714 = vst [vmem:[#allocation7_spill] sm:$0xff] %v7386_v27 }
 0x24e   : > { %v7402_v51 = vpop.f32.mrf.mxu0 }
 0x250   : > { %v7418_v1 = vpop.f32.mrf.mxu0 }
 0x256   : > { %v7426_v15 = vpop.f32.mrf.mxu0 }
 0x258   : > { %v7442_v41 = vpop.f32.mrf.mxu0 }
 0x25b   : > { %v7458_v42 = vpop.f32.mrf.mxu0 }
 0x25d   : > { %v7474_v9 = vpop.f32.mrf.mxu0 }
 0x260   : > { %v7490_v22 = vpop.f32.mrf.mxu0 }
 0x261   : > { %8715 = vst [vmem:[#allocation8_spill] sm:$0xff] %v7490_v22 }
 0x262   : > { %v7506_v34 = vpop.f32.mrf.mxu0 }
 0x263   : > { %8716 = vst [vmem:[#allocation9_spill] sm:$0xff] %v7506_v34 }
 0x265   : > { %v7522_v59 = vpop.f32.mrf.mxu0 }
 0x266   : > { %8717 = vst [vmem:[#allocation10_spill] sm:$0xff] %v7522_v59 }
 0x267   : > { %v7538_v44 = vpop.f32.mrf.mxu0 }
 0x268   : > { %8718 = vst [vmem:[#allocation11_spill] sm:$0xff] %v7538_v44 }
 0x279   : > { %v2001_v27 = vpop.f32.mrf.mxu1 }
 0x27a   : > { %v2002_v5 = vadd.f32 %v2001_v27, %v7281_v8 }
 0x27b   : > { %v7546_v62 = vpop.f32.mrf.mxu0  ;;  %v2003_v59 = vpop.f32.mrf.mxu1 }
 0x27c   : > { %v2004_v7 = vadd.f32 %v2003_v59, %v7283_v23  ;;  %v2091_v10 = vadd.f32 %v7304_v35, %v2002_v5 }
 0x27d   : > { %v7560_v43 = vpop.f32.mrf.mxu0 }
 0x27e   : > { %8719 = vst [vmem:[#allocation12_spill] sm:$0xff] %v7560_v43  ;;  %v2007_v34 = vpop.f32.mrf.mxu1 }
 0x280   : > { %v7574_v44 = vpop.f32.mrf.mxu0  ;;  %v2009_v19 = vpop.f32.mrf.mxu1 }
 0x281   : > { %v2010_v50 = vadd.f32 %v2009_v19, %v1734_v32 }
 0x282   : > { %v7576_v48 = vpop.f32.mrf.mxu0 }
 0x283   : > { %v2013_v6 = vpop.f32.mrf.mxu1 }
 0x285   : > { %v7578_v54 = vpop.f32.mrf.mxu0  ;;  %v2015_v60 = vpop.f32.mrf.mxu1 }
 0x286   : > { %8720 = vst [vmem:[#allocation13_spill] sm:$0xff] %v7578_v54  ;;  %v1744_v54 = vadd.f32 %v7357_v55, %v7300_v52  ;;  %v5179_v52 = vadd.f32 %v7495_v2, %v7479_v0  ;;  %v2093_v0 = vadd.f32 %v7306_v53, %v2004_v7  ;;  %v2016_v2 = vadd.f32 %v2015_v60, %v1740_v36 }
 0x287   : > { %v7580_v22 = vpop.f32.mrf.mxu0 }
 0x288   : > { %8721 = vst [vmem:[#allocation14_spill] sm:$0xff] %v7580_v22  ;;  %v5173_v22 = vadd.f32 %v7431_v33, %v7413_v63  ;;  %v1915_v63 = vadd.f32 %v5411_v61, %v5179_v52  ;;  %v1910_v33 = vadd.f32 %v5176_v25, %v1909_v47 }
 0x289   : > { %v2019_v43 = vpop.f32.mrf.mxu1 }
 0x28a   : > { %v2190_v24 = vadd.f32 %v5230_v20, %v1910_v33  ;;  %v2195_v35 = vadd.f32 %v5233_v11, %v1915_v63  ;;  %v2020_v59 = vadd.f32 %v2019_v43, %v1744_v54  ;;  %v8725_v43 = vld [vmem:[#allocation12_spill] sm:$0xff]  ;;  %v8734_v33 = vld [vmem:[#allocation6_spill] sm:$0xff] }
 0x28b   : > { %v7582_v58 = vpop.f32.mrf.mxu0  ;;  %v2021_v55 = vpop.f32.mrf.mxu1  ;;  %v5278_v54 = vadd.f32 %v8725_v43, %v7546_v62 }
 0x28c   : > { %8722 = vst [vmem:[#allocation15_spill] sm:$0xff] %v7582_v58  ;;  %v2804_v58 = vld [vmem:[%s8687_s4] sm:$0x7]  ;;  %v2280_v19 = vadd.f32 %v7402_v51, %v2195_v35 }
 0x28d   : > { %v7584_v57 = vpop.f32.mrf.mxu0  ;;  %v7631_v28 = vrot.slane %v2804_v58, %v6240_v49  ;;  %v8726_v51 = vld [vmem:[#allocation3_spill] sm:$0xff]  ;;  %v8728_v5 = vld [vmem:[#allocation13_spill] sm:$0xff] }
 0x28e   : > { %8723 = vst [vmem:[#allocation16_spill] sm:$0xff] %v7584_v57  ;;  %v5170_v57 = vadd.f32 %v7397_v29, %v7381_v56  ;;  %v8724_v56 = vsub.s32 2, %v6230_v40  ;;  %v1905_v29 = vadd.f32 %v7511_v30, %v5173_v22  ;;  %v7636_v22 = vrot.slane %v2804_v58, %v6237_v46 }
 0x28f   : > { %v8729_v25 = vld [vmem:[#allocation14_spill] sm:$0xff] }
 0x290   : > { %v7604_v17 = vpop.f32.mrf.mxu0  ;;  %v1900_v8 = vadd.f32 %v5170_v57, %v7527_v21  ;;  %v7620_v27 = vrot.slane %v2804_v58, %v8724_v56  ;;  %v2008_v57 = vadd.f32 %v2007_v34, %v7286_v3  ;;  %v2185_v40 = vadd.f32 %v5227_v45, %v1905_v29  ;;  %v8730_v45 = vld [vmem:[#allocation5_spill] sm:$0xff] }
 0x291   : > { %v2099_v58 = vadd.f32 %v7310_v38, %v2010_v50  ;;  %v5284_v52 = vadd.f32 %v8729_v25, %v8728_v5  ;;  %v2109_v20 = vadd.f32 %v8730_v45, %v2020_v59 }
 0x292   : > { %v7625_v14 = vadd.f32 %v5224_v12, %v1900_v8  ;;  %v2773_v18 = vpop.f32.mrf.mxu0  ;;  %v7639_v3 = vadd.f32 %v7368_v16, %v2185_v40  ;;  %v2097_v30 = vadd.f32 %v7308_v31, %v2008_v57  ;;  %v2022_v12 = vadd.f32 %v2021_v55, %v1746_v37  ;;  %v8735_v57 = vld [vmem:[#allocation9_spill] sm:$0xff] }
 0x293   : > { %v8731_v8 = vld [vmem:[#allocation15_spill] sm:$0xff] }
 0x294   : > { %v5447_v21 = vpop.f32.mrf.mxu0  ;;  %v2111_v11 = vadd.f32 %v8734_v33, %v2022_v12 }
 0x295   : > { %v8732_v7 = vld [vmem:[#allocation16_spill] sm:$0xff] }
 0x296   : > { %v2783_v55 = vpop.f32.mrf.mxu0  ;;  %v5287_v62 = vadd.f32 %v8732_v7, %v8731_v8 }
 0x297   : > { %v2784_v50 = vadd.f32 %v5284_v52, %v2783_v55 }
 0x2bf   : > { %v2510_v13 = vpop.f32.mrf.mxu1 }
 0x2c0   : > { %v2600_v23 = vadd.f32 %v7426_v15, %v2510_v13  ;;  %v2014_v15 = vadd.f32 %v2013_v6, %v1738_v4 }
 0x2c1   : > { %v2512_v47 = vpop.f32.mrf.mxu1 }
 0x2c2   : > { %v2792_v26 = vadd.f32 %v2600_v23, %v2091_v10  ;;  %v2602_v39 = vadd.f32 %v7442_v41, %v2512_v47  ;;  %v2275_v41 = vadd.f32 %v7418_v1, %v2190_v24  ;;  %v2103_v4 = vadd.f32 %v8726_v51, %v2014_v15  ;;  %v8727_v1 = vld [vmem:[#allocation4_spill] sm:$0xff]  ;;  %v8736_v15 = vld [vmem:[#allocation10_spill] sm:$0xff]  ;;  %v8738_v51 = vld [vmem:[#allocation7_spill] sm:$0xff] }
 0x2c3   : > { %v2516_v34 = vpop.f32.mrf.mxu1  ;;  %v2105_v36 = vadd.f32 %v8727_v1, %v2016_v2  ;;  %v2789_v24 = vadd.f32 %v5447_v21, %v5287_v62 }
 0x2c4   : > { %v2793_v61 = vadd.f32 %v2602_v39, %v2093_v0  ;;  %v2606_v53 = vadd.f32 %v7458_v42, %v2516_v34  ;;  %v2821_v16 = vadd.f32 %v7631_v28, %v2792_v26  ;;  %v5281_v42 = vadd.f32 %v7576_v48, %v7574_v44  ;;  %v8733_v44 = vld [vmem:[#allocation8_spill] sm:$0xff] }
 0x2c5   : > { %v2518_v32 = vpop.f32.mrf.mxu1  ;;  %v2774_v34 = vadd.f32 %v5278_v54, %v2773_v18  ;;  %v2803_v12 = vadd.f32 %v2789_v24, %v2280_v19  ;;  %v2902_v24 = vld [vmem:[%s8688_s5] sm:$0xff] }
 0x2c6   : > { %v2822_v60 = vadd.f32 %v7636_v22, %v2793_v61  ;;  %v2795_v6 = vadd.f32 %v2606_v53, %v2097_v30  ;;  %v2608_v31 = vadd.f32 %v7474_v9, %v2518_v32  ;;  %v2833_v56 = vmax.f32 %v2821_v16, 0.0 }
 0x2c7   : > { %v2522_v38 = vpop.f32.mrf.mxu1  ;;  %v2779_v40 = vadd.f32 %v7604_v17, %v5281_v42  ;;  %v8737_v17 = vld [vmem:[#allocation11_spill] sm:$0xff]  ;;  %v2832_v45 = vadd.f32 %v7620_v27, %v2803_v12 }
 0x2c8   : > { %v2824_v37 = vadd.f32 %v7631_v28, %v2795_v6  ;;  %v2796_v9 = vadd.f32 %v2608_v31, %v2099_v58  ;;  %v2834_v29 = vmax.f32 %v2822_v60, 0.0  ;;  %v2612_v48 = vadd.f32 %v8733_v44, %v2522_v38  ;;  %v3138_v12 = vld [vmem:[%s8689_s6 + $0x208] sm:$0xff] }
 0x2c9   : > { %v2524_v63 = vpop.f32.mrf.mxu1  ;;  %v2857_v30 = vrot.slane %v2833_v56, 1  ;;  %v2800_v60 = vadd.f32 %v2784_v50, %v2275_v41  ;;  %v2797_v5 = vadd.f32 %v2779_v40, %v7639_v3  ;;  %v2844_v44 = vmax.f32 %v2832_v45, 0.0  ;;  %v3330_v45 = vld [vmem:[%s8690_s7 + $0xd0] sm:$0xff] }
 0x2ca   : > { %v2836_v13 = vmax.f32 %v2824_v37, 0.0  ;;  %v2825_v10 = vadd.f32 %v7636_v22, %v2796_v9  ;;  %v2614_v23 = vadd.f32 %v8735_v57, %v2524_v63  ;;  %v2798_v47 = vadd.f32 %v2612_v48, %v2103_v4 }
 0x2cb   : > { %v2528_v0 = vpop.f32.mrf.mxu1  ;;  %v2860_v59 = vrot.slane %v2834_v29, 1  ;;  %v2265_v4 = vadd.f32 %v8738_v51, %v7625_v14  ;;  %v2826_v62 = vadd.f32 %v7620_v27, %v2797_v5  ;;  %v3370_v51 = vld [vmem:[%s8690_s7 + $0x210] sm:$0xff] }
 0x2cc   : > { %v2858_v26 = vrot.slane %v2836_v13, 1  ;;  %v2837_v39 = vmax.f32 %v2825_v10, 0.0  ;;  %v2799_v35 = vadd.f32 %v2614_v23, %v2105_v36  ;;  %v2618_v2 = vadd.f32 %v8736_v15, %v2528_v0  ;;  %v3334_v5 = vld [vmem:[%s8690_s7 + $0xf0] sm:$0xff] }
 0x2cd   : > { %v2827_v61 = vadd.f32 %v7631_v28, %v2798_v47  ;;  %v2530_v53 = vpop.f32.mrf.mxu1  ;;  %v2794_v52 = vadd.f32 %v2774_v34, %v2265_v4  ;;  %v2876_v23 = vrot.slane %v2844_v44, 1  ;;  %v3369_v4 = vld [vmem:[%s8690_s7 + $0x208] sm:$0xff] }
 0x2ce   : > { %v2861_v58 = vrot.slane %v2837_v39, 1  ;;  %v2828_v16 = vadd.f32 %v7636_v22, %v2799_v35  ;;  %v2801_v32 = vadd.f32 %v2618_v2, %v2109_v20  ;;  %v2620_v21 = vadd.f32 %v8737_v17, %v2530_v53  ;;  %v2903_v35 = vld [vmem:[%s8688_s5 + $0x8] sm:$0x3f]  ;;  %v3105_v53 = vld [vmem:[%s8689_s6 + $0x100] sm:$0xff] }
 0x2cf   : > { %v2839_v6 = vmax.f32 %v2827_v61, 0.0  ;;  %v2859_v31 = vsel %vm628_vm0, %v2857_v30, %v2858_v26  ;;  %v2901_v47 = vmax.f32 %v2844_v44, %v2876_v23  ;;  %v3108_v30 = vld [vmem:[%s8689_s6 + $0x118] sm:$0xff]  ;;  %v3106_v61 = vld [vmem:[%s8689_s6 + $0x108] sm:$0xff]  ;;  %v3316_v44 = vld [vmem:[%s8690_s7 + $0x60] sm:$0xff] }
 0x2d0   : > { %v2840_v43 = vmax.f32 %v2828_v16, 0.0  ;;  %v2830_v42 = vadd.f32 %v7631_v28, %v2801_v32  ;;  %v2802_v18 = vadd.f32 %v2620_v21, %v2111_v11  ;;  %v2862_v54 = vsel %vm628_vm0, %v2860_v59, %v2861_v58  ;;  %v3107_v59 = vld [vmem:[%s8689_s6 + $0x110] sm:$0xff]  ;;  %3210 = vmatprep.subr.mxu1 %v3108_v30  ;;  %v3141_v16 = vld [vmem:[%s8689_s6 + $0x220] sm:$0xff]  ;;  %v3140_v32 = vld [vmem:[%s8689_s6 + $0x218] sm:$0xff] }
 0x2d1   : > { %v2866_v1 = vrot.slane %v2839_v6, 1  ;;  %v2891_v36 = vmax.f32 %v2834_v29, %v2862_v54  ;;  %v2890_v38 = vmax.f32 %v2833_v56, %v2859_v31  ;;  %v2829_v28 = vadd.f32 %v7620_v27, %v2800_v60  ;;  %3211 = vmatpush2.msra.mxu1 %v3107_v59  ;;  %v3373_v17 = vld [vmem:[%s8690_s7 + $0x228] sm:$0xff]  ;;  %v3139_v21 = vld [vmem:[%s8689_s6 + $0x210] sm:$0xff]  ;;  %v3137_v60 = vld [vmem:[%s8689_s6 + $0x200] sm:$0xff] }
 0x2d2   : > { %v2868_v25 = vrot.slane %v2840_v43, 1  ;;  %v2842_v19 = vmax.f32 %v2830_v42, 0.0  ;;  %v2831_v41 = vadd.f32 %v7636_v22, %v2802_v18  ;;  %v2823_v22 = vadd.f32 %v7620_v27, %v2794_v52  ;;  %3212 = vmatprep.subr.mxu1 %v3106_v61  ;;  %v3372_v42 = vld [vmem:[%s8690_s7 + $0x220] sm:$0xff]  ;;  %v3371_v18 = vld [vmem:[%s8690_s7 + $0x218] sm:$0xff]  ;;  %v3358_v61 = vld [vmem:[%s8690_s7 + $0x1b0] sm:$0xff] }
 0x2d3   : > { %v2867_v20 = vsel %vm628_vm0, %v2858_v26, %v2866_v1  ;;  %v2841_v56 = vmax.f32 %v2829_v28, 0.0  ;;  %3213 = vmatpush2.msra.mxu1 %v3105_v53  ;;  %v3331_v52 = vld [vmem:[%s8690_s7 + $0xd8] sm:$0xff]  ;;  %v3329_v28 = vld [vmem:[%s8690_s7 + $0xc8] sm:$0xff]  ;;  %v3360_v30 = vld [vmem:[%s8690_s7 + $0x1c0] sm:$0xff] }
 0x2d4   : > { %v2872_v55 = vrot.slane %v2842_v19, 1  ;;  %v2843_v37 = vmax.f32 %v2831_v41, 0.0  ;;  %v2869_v14 = vsel %vm628_vm0, %v2861_v58, %v2868_v25  ;;  %v2893_v9 = vmax.f32 %v2836_v13, %v2867_v20  ;;  %v3142_v58 = vld [vmem:[%s8689_s6 + $0x228] sm:$0xff]  ;;  %3477 = vmatprep.subr.mxu1 %v3373_v17  ;;  %v3332_v41 = vld [vmem:[%s8690_s7 + $0xe0] sm:$0xff]  ;;  %v3359_v59 = vld [vmem:[%s8690_s7 + $0x1b8] sm:$0xff] }
 0x2d5   : > { %v2894_v8 = vmax.f32 %v2837_v39, %v2869_v14  ;;  %v2838_v13 = vmax.f32 %v2826_v62, 0.0  ;;  %v2835_v10 = vmax.f32 %v2823_v22, 0.0  ;;  %v2870_v57 = vrot.slane %v2841_v56, 1  ;;  %v3328_v20 = vld [vmem:[%s8690_s7 + $0xc0] sm:$0xff]  ;;  %v3325_v14 = vld [vmem:[%s8690_s7 + $0xa8] sm:$0xff]  ;;  %v3319_v22 = vld [vmem:[%s8690_s7 + $0x78] sm:$0xff] }
 0x2d6   : > { %v2874_v7 = vrot.slane %v2843_v37, 1  ;;  %v2873_v3 = vsel %vm628_vm0, %v2866_v1, %v2872_v55  ;;  %v2899_v33 = vmax.f32 %v2842_v19, %v2872_v55  ;;  %v8739_v39 = vmov 0.0   ;;  %v3333_v19 = vld [vmem:[%s8690_s7 + $0xe8] sm:$0xff]  ;;  %v3327_v55 = vld [vmem:[%s8690_s7 + $0xb8] sm:$0xff]  ;;  %v3320_v62 = vld [vmem:[%s8690_s7 + $0x80] sm:$0xff] }
 0x2d7   : > { %v2896_v29 = vmax.f32 %v2839_v6, %v2873_v3  ;;  %v2864_v27 = vrot.slane %v2838_v13, 1  ;;  %v2863_v40 = vrot.slane %v2835_v10, 1  ;;  %v2877_v50 = vsel %vm628_vm0, %v2870_v57, %v2876_v23  ;;  %v3335_v6 = vld [vmem:[%s8690_s7 + $0xf8] sm:$0xff]  ;;  %v3321_v3 = vld [vmem:[%s8690_s7 + $0x88] sm:$0xff]  ;;  %v3308_v23 = vld [vmem:[%s8690_s7 + $0x20] sm:$0xff] }
 0x2d8   : > { %v2900_v48 = vmax.f32 %v2843_v37, %v2874_v7  ;;  %v2875_v63 = vsel %vm628_vm0, %v2868_v25, %v2874_v7  ;;  %v2898_v26 = vmax.f32 %v2841_v56, %v2877_v50  ;;  %v3326_v37 = vld [vmem:[%s8690_s7 + $0xb0] sm:$0xff]  ;;  %v3304_v50 = vld [vmem:[%s8690_s7] sm:$0xff]  ;;  %v3357_v53 = vld [vmem:[%s8690_s7 + $0x1a8] sm:$0xff] }
 0x2d9   : > { %v2897_v11 = vmax.f32 %v2840_v43, %v2875_v63  ;;  %v2871_v0 = vsel %vm628_vm0, %v2864_v27, %v2870_v57  ;;  %v2865_v15 = vsel %vm628_vm0, %v2863_v40, %v2864_v27  ;;  %v3322_v7 = vld [vmem:[%s8690_s7 + $0x90] sm:$0xff]  ;;  %v3309_v57 = vld [vmem:[%s8690_s7 + $0x28] sm:$0xff]  ;;  %v3307_v27 = vld [vmem:[%s8690_s7 + $0x18] sm:$0xff] }
 0x2da   : > { %4955 = vmatprep.subr.msk.mxu0 %vm2911_vm5, %v2900_v48  ;;  %v2895_v2 = vmax.f32 %v2838_v13, %v2871_v0  ;;  %v2892_v34 = vmax.f32 %v2835_v10, %v2865_v15  ;;  %v3318_v56 = vld [vmem:[%s8690_s7 + $0x70] sm:$0xff]  ;;  %v3315_v48 = vld [vmem:[%s8690_s7 + $0x58] sm:$0xff]  ;;  %v3353_v17 = vld [vmem:[%s8690_s7 + $0x188] sm:$0xff] }
 0x2db   : > { %4956 = vmatpush1.msk.msra.mxu0 %vm2911_vm5, %v2899_v33  ;;  %v3314_v63 = vld [vmem:[%s8690_s7 + $0x50] sm:$0xff]  ;;  %v3313_v33 = vld [vmem:[%s8690_s7 + $0x48] sm:$0xff]  ;;  %v3311_v13 = vld [vmem:[%s8690_s7 + $0x38] sm:$0xff] }
 0x2dc   : > { %2947 = vmatprep.subr.mxu0 %v2897_v11  ;;  %v3312_v11 = vld [vmem:[%s8690_s7 + $0x40] sm:$0xff]  ;;  %v3310_v10 = vld [vmem:[%s8690_s7 + $0x30] sm:$0xff]  ;;  %v3363_v15 = vld [vmem:[%s8690_s7 + $0x1d8] sm:$0xff] }
 0x2dd   : > { %2948 = vmatpush1.msra.mxu0 %v2896_v29  ;;  %v3317_v29 = vld [vmem:[%s8690_s7 + $0x68] sm:$0xff]  ;;  %v3306_v40 = vld [vmem:[%s8690_s7 + $0x10] sm:$0xff] }
 0x2de   : > { %2949 = vmatprep.subr.mxu0 %v2894_v8  ;;  %v3323_v8 = vld [vmem:[%s8690_s7 + $0x98] sm:$0xff]  ;;  %v3366_v0 = vld [vmem:[%s8690_s7 + $0x1f0] sm:$0xff] }
 0x2df   : > { %2950 = vmatpush1.msra.mxu0 %v2893_v9  ;;  %v3324_v9 = vld [vmem:[%s8690_s7 + $0xa0] sm:$0xff] }
 0x2e0   : > { %2951 = vmatprep.subr.mxu0 %v2891_v36  ;;  %v3368_v36 = vld [vmem:[%s8690_s7 + $0x200] sm:$0xff] }
 0x2e1   : > { %2952 = vmatpush1.msra.mxu0 %v2890_v38 }
 0x2e2   : > { %4957 = vmatmul.mubr.msk.f32.vlgmr.msra.gmra.mxu0 %vm2904_vm6, %v2902_v24  ;;  %5448 = vmatprep.subr.msk.mxu0 %vm2911_vm5, %v2901_v47 }
 0x2e3   : > { %5449 = vmatpush3.msk.msra.mxu0 %vm2911_vm5, %v2901_v47  ;;  %2991 = vmatprep.mubr.f32.mxu0 %v8739_v39  ;;  %v3367_v47 = vld [vmem:[%s8690_s7 + $0x1f8] sm:$0xff] }
 0x2e4   : > { %5450 = vmatprep.subr.mxu0 %v2898_v26 }
 0x2e5   : > { %5451 = vmatpush3.msra.mxu0 %v2898_v26  ;;  %v3365_v26 = vld [vmem:[%s8690_s7 + $0x1e8] sm:$0xff] }
 0x2e6   : > { %4958 = vmatmul.mubr.msk.f32.gmra.mxu0 %vm2904_vm6, %v2903_v35  ;;  %5452 = vmatprep.subr.mxu0 %v2895_v2 }
 0x2e7   : > { %5453 = vmatpush3.msra.mxu0 %v2895_v2  ;;  %5456 = vmatprep.mubr.msk.f32.mxu0 %vm2904_vm6, %v2902_v24  ;;  %v3305_v24 = vld [vmem:[%s8690_s7 + $0x8] sm:$0xff]  ;;  %v3362_v2 = vld [vmem:[%s8690_s7 + $0x1d0] sm:$0xff] }
 0x2e8   : > { %5454 = vmatprep.subr.mxu0 %v2892_v34 }
 0x2e9   : > { %5455 = vmatpush3.msra.mxu0 %v2892_v34  ;;  %v3361_v34 = vld [vmem:[%s8690_s7 + $0x1c8] sm:$0xff] }
 0x2ea   : > { %5457 = vmatmul.mubr.msk.f32.vlgmr.msra.gmra.mxu0 %vm2904_vm6, %v2903_v35  ;;  %3253 = vmatprep.subr.mxu0 %v3142_v58  ;;  %v3364_v35 = vld [vmem:[%s8690_s7 + $0x1e0] sm:$0xff] }
 0x2eb   : > { %3291 = vmatprep.mubr.f32.mxu0 %v8739_v39  ;;  %3254 = vmatpush1.msra.mxu0 %v3141_v16  ;;  %v3356_v58 = vld [vmem:[%s8690_s7 + $0x1a0] sm:$0xff]  ;;  %v3355_v16 = vld [vmem:[%s8690_s7 + $0x198] sm:$0xff] }
 0x2ec   : > { %3255 = vmatprep.subr.mxu0 %v3140_v32  ;;  %v3354_v32 = vld [vmem:[%s8690_s7 + $0x190] sm:$0xff] }
 0x2ed   : > { %3256 = vmatpush1.msra.mxu0 %v3139_v21  ;;  %v3352_v21 = vld [vmem:[%s8690_s7 + $0x180] sm:$0xff] }
 0x2ee   : > { %3257 = vmatprep.subr.mxu0 %v3138_v12  ;;  %v3351_v12 = vld [vmem:[%s8690_s7 + $0x178] sm:$0xff] }
 0x2ef   : > { %3258 = vmatpush1.msra.mxu0 %v3137_v60  ;;  %v3350_v60 = vld [vmem:[%s8690_s7 + $0x170] sm:$0xff] }
 0x2f0   : > { %3374 = vmatprep.subr.mxu0 %v3335_v6  ;;  %v3349_v6 = vld [vmem:[%s8690_s7 + $0x168] sm:$0xff] }
 0x3a2   : > { %v7740_v31 = vpop.f32.mrf.mxu0 }
 0x3a4   : > { %v2989_v43 = vpop.f32.mrf.mxu0 }
 0x3a5   : > { %3214 = vmatprep.mubr.f32.mxu1 %v2989_v43 }
 0x3a6   : > { %v7748_v54 = vpop.f32.mrf.mxu0  ;;  %3215 = vmatmul.mubr.f32.vlgmr.msra.gmra.mxu1 %v7740_v31 }
 0x3a7   : > { %3478 = vmatpush1.msra.mxu1 %v3372_v42  ;;  %v3347_v42 = vld [vmem:[%s8690_s7 + $0x158] sm:$0xff] }
 0x3a8   : > { %v7757_v1 = vpop.f32.mrf.mxu0  ;;  %3479 = vmatprep.subr.mxu1 %v3371_v18  ;;  %v3346_v18 = vld [vmem:[%s8690_s7 + $0x150] sm:$0xff] }
 0x3a9   : > { %3220 = vmatprep.mubr.f32.mxu1 %v7757_v1  ;;  %3480 = vmatpush1.msra.mxu1 %v3370_v51  ;;  %v3345_v51 = vld [vmem:[%s8690_s7 + $0x148] sm:$0xff] }
 0x3aa   : > { %v5458_v38 = vpop.f32.mrf.mxu0  ;;  %3221 = vmatmul.mubr.f32.gmra.mxu1 %v7748_v54  ;;  %3481 = vmatprep.subr.mxu1 %v3369_v4  ;;  %v3344_v4 = vld [vmem:[%s8690_s7 + $0x140] sm:$0xff] }
 0x3ab   : > { %3482 = vmatpush1.msra.mxu1 %v3368_v36  ;;  %3515 = vmatprep.mubr.f32.mxu1 %v8739_v39  ;;  %v3343_v36 = vld [vmem:[%s8690_s7 + $0x138] sm:$0xff] }
 0x3ac   : > { %v3064_v25 = vpop.f32.mrf.mxu0  ;;  %3589 = vmatprep.subr.mxu1 %v8739_v39 }
 0x3ad   : > { %4962 = vmatmul.mubr.msk.f32.vlgmr.msra.gmra.mxu0 %vm3143_vm7, %v3064_v25 }
 0x3ae   : > { %3375 = vmatpush1.msra.mxu0 %v3334_v5  ;;  %4964 = vmatmul.mubr.msk.f32.vlgmr.msra.gmra.mxu1 %vm3143_vm7, %v3064_v25  ;;  %v3341_v5 = vld [vmem:[%s8690_s7 + $0x128] sm:$0xff]  ;;  %v3340_v25 = vld [vmem:[%s8690_s7 + $0x120] sm:$0xff] }
 0x3af   : > { %3376 = vmatprep.subr.mxu0 %v3333_v19  ;;  %3297 = vmatprep.mubr.f32.mxu0 %v8739_v39  ;;  %v3339_v19 = vld [vmem:[%s8690_s7 + $0x118] sm:$0xff] }
 0x3b0   : > { %3377 = vmatpush1.msra.mxu0 %v3332_v41  ;;  %3521 = vmatprep.mubr.f32.mxu1 %v8739_v39  ;;  %v3338_v41 = vld [vmem:[%s8690_s7 + $0x110] sm:$0xff] }
 0x3b1   : > { %3378 = vmatprep.subr.mxu0 %v3331_v52  ;;  %4963 = vmatmul.mubr.msk.f32.gmra.mxu0 %vm3143_vm7, %v5458_v38  ;;  %v3337_v52 = vld [vmem:[%s8690_s7 + $0x108] sm:$0xff] }
 0x3b2   : > { %3379 = vmatpush1.msra.mxu0 %v3330_v45  ;;  %3438 = vmatprep.mubr.f32.mxu0 %v2989_v43  ;;  %v3348_v43 = vld [vmem:[%s8690_s7 + $0x160] sm:$0xff] }
 0x3b3   : > { %3380 = vmatprep.subr.mxu0 %v3329_v28  ;;  %4965 = vmatmul.mubr.msk.f32.gmra.mxu1 %vm3143_vm7, %v5458_v38  ;;  %v3342_v38 = vld [vmem:[%s8690_s7 + $0x130] sm:$0xff]  ;;  %v3336_v45 = vld [vmem:[%s8690_s7 + $0x100] sm:$0xff]  ;;  %v3547_v28 = vld [vmem:[%s8691_s8 + $0x78] sm:$0xff] }
 0x3b4   : > { %3381 = vmatpush1.msra.mxu0 %v3328_v20  ;;  %v3546_v20 = vld [vmem:[%s8691_s8 + $0x70] sm:$0xff] }
 0x3b5   : > { %3382 = vmatprep.subr.mxu0 %v3327_v55  ;;  %v4981_v55 = vld [vmem:[%s8691_s8 + $0x108] sm:$0xff] }
 0x3b6   : > { %3383 = vmatpush1.msra.mxu0 %v3326_v37  ;;  %3590 = vmatpush1.msra.mxu1 %v4981_v55  ;;  %v3544_v37 = vld [vmem:[%s8691_s8 + $0x60] sm:$0xff] }
 0x3b7   : > { %3384 = vmatprep.subr.mxu0 %v3325_v14  ;;  %3591 = vmatprep.subr.mxu1 %v8739_v39  ;;  %v4978_v14 = vld [vmem:[%s8691_s8 + $0xf0] sm:$0xff] }
 0x3b8   : > { %3385 = vmatpush1.msra.mxu0 %v3324_v9  ;;  %v3543_v9 = vld [vmem:[%s8691_s8 + $0x58] sm:$0xff] }
 0x3b9   : > { %3386 = vmatprep.subr.mxu0 %v3323_v8  ;;  %v4977_v8 = vld [vmem:[%s8691_s8 + $0xe8] sm:$0xff] }
 0x3ba   : > { %3387 = vmatpush1.msra.mxu0 %v3322_v7  ;;  %v3542_v7 = vld [vmem:[%s8691_s8 + $0x50] sm:$0xff] }
 0x3bb   : > { %3388 = vmatprep.subr.mxu0 %v3321_v3  ;;  %v4976_v3 = vld [vmem:[%s8691_s8 + $0xe0] sm:$0xff] }
 0x3bc   : > { %3389 = vmatpush1.msra.mxu0 %v3320_v62  ;;  %v3541_v62 = vld [vmem:[%s8691_s8 + $0x48] sm:$0xff] }
 0x3bd   : > { %3390 = vmatprep.subr.mxu0 %v3319_v22  ;;  %v4975_v22 = vld [vmem:[%s8691_s8 + $0xd8] sm:$0xff] }
 0x3be   : > { %3391 = vmatpush1.msra.mxu0 %v3318_v56  ;;  %v3540_v56 = vld [vmem:[%s8691_s8 + $0x40] sm:$0xff] }
 0x3bf   : > { %3392 = vmatprep.subr.mxu0 %v3317_v29  ;;  %v4974_v29 = vld [vmem:[%s8691_s8 + $0xd0] sm:$0xff] }
 0x3c0   : > { %3393 = vmatpush1.msra.mxu0 %v3316_v44  ;;  %v3539_v44 = vld [vmem:[%s8691_s8 + $0x38] sm:$0xff] }
 0x3c1   : > { %3394 = vmatprep.subr.mxu0 %v3315_v48  ;;  %v4973_v48 = vld [vmem:[%s8691_s8 + $0xc8] sm:$0xff] }
 0x3c2   : > { %3395 = vmatpush1.msra.mxu0 %v3314_v63  ;;  %v3538_v63 = vld [vmem:[%s8691_s8 + $0x30] sm:$0xff] }
 0x3c3   : > { %3396 = vmatprep.subr.mxu0 %v3313_v33  ;;  %v4972_v33 = vld [vmem:[%s8691_s8 + $0xc0] sm:$0xff] }
 0x3c4   : > { %3397 = vmatpush1.msra.mxu0 %v3312_v11  ;;  %v3537_v11 = vld [vmem:[%s8691_s8 + $0x28] sm:$0xff] }
 0x3c5   : > { %3398 = vmatprep.subr.mxu0 %v3311_v13  ;;  %v4971_v13 = vld [vmem:[%s8691_s8 + $0xb8] sm:$0xff] }
 0x3c6   : > { %3399 = vmatpush1.msra.mxu0 %v3310_v10  ;;  %v3536_v10 = vld [vmem:[%s8691_s8 + $0x20] sm:$0xff] }
 0x3c7   : > { %3400 = vmatprep.subr.mxu0 %v3309_v57  ;;  %v3535_v57 = vld [vmem:[%s8691_s8 + $0x18] sm:$0xff] }
 0x3c8   : > { %3401 = vmatpush1.msra.mxu0 %v3308_v23  ;;  %v3534_v23 = vld [vmem:[%s8691_s8 + $0x10] sm:$0xff] }
 0x3c9   : > { %3402 = vmatprep.subr.mxu0 %v3307_v27  ;;  %v4970_v27 = vld [vmem:[%s8691_s8 + $0xb0] sm:$0xff] }
 0x3ca   : > { %3403 = vmatpush1.msra.mxu0 %v3306_v40  ;;  %v3533_v40 = vld [vmem:[%s8691_s8 + $0x8] sm:$0xff] }
 0x3cb   : > { %3404 = vmatprep.subr.mxu0 %v3305_v24  ;;  %v4969_v24 = vld [vmem:[%s8691_s8 + $0xa8] sm:$0xff] }
 0x3cc   : > { %3405 = vmatpush1.msra.mxu0 %v3304_v50  ;;  %v3532_v50 = vld [vmem:[%s8691_s8] sm:$0xff] }
 0x3cd   : > { %3406 = vmatprep.subr.mxu0 %v3367_v47  ;;  %v4968_v47 = vld [vmem:[%s8691_s8 + $0xa0] sm:$0xff] }
 0x3ce   : > { %3407 = vmatpush2.msra.mxu0 %v3366_v0  ;;  %v3549_v0 = vld [vmem:[%s8691_s8 + $0x88] sm:$0xf] }
 0x3cf   : > { %3408 = vmatprep.subr.mxu0 %v3365_v26  ;;  %v4967_v26 = vld [vmem:[%s8691_s8 + $0x98] sm:$0xff] }
 0x3d0   : > { %3409 = vmatpush2.msra.mxu0 %v3364_v35  ;;  %v3548_v35 = vld [vmem:[%s8691_s8 + $0x80] sm:$0xff] }
 0x3d1   : > { %3410 = vmatprep.subr.mxu0 %v3363_v15  ;;  %v4966_v15 = vld [vmem:[%s8691_s8 + $0x90] sm:$0xff] }
 0x3d2   : > { %3411 = vmatpush2.msra.mxu0 %v3362_v2  ;;  %v4983_v2 = vld [vmem:[%s8691_s8 + $0x118] sm:$0xf] }
 0x3d3   : > { %3412 = vmatprep.subr.mxu0 %v3361_v34  ;;  %v4982_v34 = vld [vmem:[%s8691_s8 + $0x110] sm:$0xff] }
 0x3d4   : > { %3413 = vmatpush2.msra.mxu0 %v3360_v30 }
 0x3d5   : > { %3414 = vmatprep.subr.mxu0 %v3359_v59 }
 0x3d6   : > { %3415 = vmatpush2.msra.mxu0 %v3358_v61 }
 0x3d7   : > { %3416 = vmatprep.subr.mxu0 %v3357_v53 }
 0x3d8   : > { %3417 = vmatpush2.msra.mxu0 %v3356_v58 }
 0x3d9   : > { %3418 = vmatprep.subr.mxu0 %v3355_v16 }
 0x3da   : > { %3419 = vmatpush2.msra.mxu0 %v3354_v32 }
 0x3db   : > { %3420 = vmatprep.subr.mxu0 %v3353_v17 }
 0x3dc   : > { %3421 = vmatpush2.msra.mxu0 %v3352_v21 }
 0x3dd   : > { %3422 = vmatprep.subr.mxu0 %v3351_v12 }
 0x3de   : > { %3423 = vmatpush2.msra.mxu0 %v3350_v60 }
 0x3df   : > { %3424 = vmatprep.subr.mxu0 %v3349_v6 }
 0x3e0   : > { %3425 = vmatpush2.msra.mxu0 %v3348_v43 }
 0x3e1   : > { %3426 = vmatprep.subr.mxu0 %v3347_v42 }
 0x3e2   : > { %3427 = vmatpush2.msra.mxu0 %v3346_v18 }
 0x3e3   : > { %3428 = vmatprep.subr.mxu0 %v3345_v51 }
 0x3e4   : > { %3429 = vmatpush2.msra.mxu0 %v3344_v4 }
 0x3e5   : > { %3430 = vmatprep.subr.mxu0 %v3343_v36 }
 0x3e6   : > { %3431 = vmatpush2.msra.mxu0 %v3342_v38 }
 0x3e7   : > { %3432 = vmatprep.subr.mxu0 %v3341_v5 }
 0x3e8   : > { %3433 = vmatpush2.msra.mxu0 %v3340_v25 }
 0x3e9   : > { %3434 = vmatprep.subr.mxu0 %v3339_v19 }
 0x3ea   : > { %3435 = vmatpush2.msra.mxu0 %v3338_v41 }
 0x3eb   : > { %3436 = vmatprep.subr.mxu0 %v3337_v52 }
 0x3ec   : > { %3437 = vmatpush2.msra.mxu0 %v3336_v45 }
 0x3ed   : > { %3439 = vmatmul.mubr.f32.vlgmr.msra.gmra.mxu0 %v7740_v31  ;;  %3671 = vmatprep.subr.mxu0 %v8739_v39  ;;  %v4980_v31 = vld [vmem:[%s8691_s8 + $0x100] sm:$0xff] }
 0x3ee   : > { %3444 = vmatprep.mubr.f32.mxu0 %v7757_v1  ;;  %3672 = vmatpush1.msra.mxu0 %v3547_v28  ;;  %v4979_v1 = vld [vmem:[%s8691_s8 + $0xf8] sm:$0xff] }
 0x3ef   : > { %3673 = vmatprep.subr.mxu0 %v8739_v39  ;;  %3592 = vmatpush1.msra.mxu1 %v4980_v31 }
 0x3f0   : > { %3674 = vmatpush1.msra.mxu0 %v3546_v20  ;;  %3593 = vmatprep.subr.mxu1 %v8739_v39 }
 0x3f1   : > { %3445 = vmatmul.mubr.f32.gmra.mxu0 %v7748_v54  ;;  %v3545_v54 = vld [vmem:[%s8691_s8 + $0x68] sm:$0xff]  ;;  %3675 = vmatprep.subr.mxu0 %v8739_v39 }
 0x3f2   : > { %3676 = vmatpush1.msra.mxu0 %v3545_v54  ;;  %3594 = vmatpush1.msra.mxu1 %v4979_v1 }
 0x3f3   : > { %3677 = vmatprep.subr.mxu0 %v8739_v39  ;;  %3595 = vmatprep.subr.mxu1 %v8739_v39 }
 0x3f4   : > { %3678 = vmatpush1.msra.mxu0 %v3544_v37  ;;  %3596 = vmatpush1.msra.mxu1 %v4978_v14 }
 0x3f5   : > { %3679 = vmatprep.subr.mxu0 %v8739_v39  ;;  %3597 = vmatprep.subr.mxu1 %v8739_v39 }
 0x3f6   : > { %3680 = vmatpush1.msra.mxu0 %v3543_v9  ;;  %3598 = vmatpush1.msra.mxu1 %v4977_v8  ;;  %v5005_v9 = vld [vmem:[%s8691_s8 + $0x198] sm:$0xff] }
 0x3f7   : > { %3681 = vmatprep.subr.mxu0 %v8739_v39  ;;  %3599 = vmatprep.subr.mxu1 %v8739_v39 }
 0x3f8   : > { %3682 = vmatpush1.msra.mxu0 %v3542_v7  ;;  %3600 = vmatpush1.msra.mxu1 %v4976_v3  ;;  %v5004_v3 = vld [vmem:[%s8691_s8 + $0x190] sm:$0xff] }
 0x3f9   : > { %3683 = vmatprep.subr.mxu0 %v8739_v39  ;;  %3601 = vmatprep.subr.mxu1 %v8739_v39 }
 0x3fa   : > { %3684 = vmatpush1.msra.mxu0 %v3541_v62  ;;  %3602 = vmatpush1.msra.mxu1 %v4975_v22  ;;  %v5003_v22 = vld [vmem:[%s8691_s8 + $0x188] sm:$0xff] }
 0x3fb   : > { %3685 = vmatprep.subr.mxu0 %v8739_v39  ;;  %3603 = vmatprep.subr.mxu1 %v8739_v39 }
 0x3fc   : > { %3686 = vmatpush1.msra.mxu0 %v3540_v56  ;;  %3604 = vmatpush1.msra.mxu1 %v4974_v29  ;;  %v5002_v29 = vld [vmem:[%s8691_s8 + $0x180] sm:$0xff] }
 0x3fd   : > { %3687 = vmatprep.subr.mxu0 %v8739_v39  ;;  %3605 = vmatprep.subr.mxu1 %v8739_v39 }
 0x3fe   : > { %3688 = vmatpush1.msra.mxu0 %v3539_v44  ;;  %3606 = vmatpush1.msra.mxu1 %v4973_v48  ;;  %v5001_v44 = vld [vmem:[%s8691_s8 + $0x178] sm:$0xff]  ;;  %v5000_v48 = vld [vmem:[%s8691_s8 + $0x170] sm:$0xff] }
 0x3ff   : > { %3689 = vmatprep.subr.mxu0 %v8739_v39  ;;  %3607 = vmatprep.subr.mxu1 %v8739_v39 }
 0x400   : > { %3690 = vmatpush1.msra.mxu0 %v3538_v63  ;;  %3608 = vmatpush1.msra.mxu1 %v4972_v33  ;;  %v4999_v63 = vld [vmem:[%s8691_s8 + $0x168] sm:$0xff]  ;;  %v4998_v33 = vld [vmem:[%s8691_s8 + $0x160] sm:$0xff] }
 0x401   : > { %3691 = vmatprep.subr.mxu0 %v8739_v39  ;;  %3609 = vmatprep.subr.mxu1 %v8739_v39 }
 0x402   : > { %3692 = vmatpush1.msra.mxu0 %v3537_v11  ;;  %3610 = vmatpush1.msra.mxu1 %v4971_v13  ;;  %v4997_v11 = vld [vmem:[%s8691_s8 + $0x158] sm:$0xff]  ;;  %v4996_v13 = vld [vmem:[%s8691_s8 + $0x150] sm:$0xff] }
 0x403   : > { %3693 = vmatprep.subr.mxu0 %v8739_v39  ;;  %3611 = vmatprep.subr.mxu1 %v8739_v39 }
 0x404   : > { %3694 = vmatpush1.msra.mxu0 %v3536_v10  ;;  %3612 = vmatpush1.msra.mxu1 %v4970_v27  ;;  %v4995_v10 = vld [vmem:[%s8691_s8 + $0x148] sm:$0xff]  ;;  %v4992_v27 = vld [vmem:[%s8691_s8 + $0x130] sm:$0xff] }
 0x405   : > { %3695 = vmatprep.subr.mxu0 %v8739_v39  ;;  %3613 = vmatprep.subr.mxu1 %v8739_v39 }
 0x406   : > { %3696 = vmatpush1.msra.mxu0 %v3535_v57  ;;  %3614 = vmatpush1.msra.mxu1 %v4969_v24  ;;  %v4994_v57 = vld [vmem:[%s8691_s8 + $0x140] sm:$0xff] }
 0x407   : > { %3697 = vmatprep.subr.mxu0 %v8739_v39  ;;  %3615 = vmatprep.subr.mxu1 %v8739_v39  ;;  %v4990_v24 = vld [vmem:[%s8691_s8 + $0x120] sm:$0xff] }
 0x408   : > { %3698 = vmatpush1.msra.mxu0 %v3534_v23  ;;  %3616 = vmatpush1.msra.mxu1 %v4968_v47  ;;  %v4993_v23 = vld [vmem:[%s8691_s8 + $0x138] sm:$0xff] }
 0x409   : > { %3699 = vmatprep.subr.mxu0 %v8739_v39  ;;  %3617 = vmatprep.subr.mxu1 %v8739_v39 }
 0x40a   : > { %3700 = vmatpush1.msra.mxu0 %v3533_v40  ;;  %3618 = vmatpush1.msra.mxu1 %v4967_v26  ;;  %v4991_v40 = vld [vmem:[%s8691_s8 + $0x128] sm:$0xff] }
 0x40b   : > { %3701 = vmatprep.subr.mxu0 %v8739_v39  ;;  %3619 = vmatprep.subr.mxu1 %v8739_v39 }
 0x40c   : > { %3702 = vmatpush1.msra.mxu0 %v3532_v50  ;;  %3620 = vmatpush1.msra.mxu1 %v4966_v15  ;;  %v5007_v50 = vld [vmem:[%s8691_s8 + $0x1a8] sm:$0xf] }
 0x40d   : > { %3731 = vmatprep.subr.mxu0 %v8739_v39  ;;  %3649 = vmatprep.subr.mxu1 %v8739_v39  ;;  %v3897_v15 = vld [vmem:[%s8693_s10 + $0xe8] sm:$0xff] }
 0x40e   : > { %4987 = vmatpush2.msk.msra.mxu0 %vm1560_vm3, %v3549_v0  ;;  %4984 = vmatpush2.msk.msra.mxu1 %vm1560_vm3, %v4983_v2  ;;  %v5006_v0 = vld [vmem:[%s8691_s8 + $0x1a0] sm:$0xff] }
 0x40f   : > { %3733 = vmatprep.subr.mxu0 %v8739_v39  ;;  %3651 = vmatprep.subr.mxu1 %v8739_v39  ;;  %v3896_v2 = vld [vmem:[%s8693_s10 + $0xe0] sm:$0xff] }
 0x410   : > { %3734 = vmatpush2.msra.mxu0 %v3548_v35  ;;  %3652 = vmatpush2.msra.mxu1 %v4982_v34  ;;  %v3895_v34 = vld [vmem:[%s8693_s10 + $0xd8] sm:$0xff] }
 0x411   : > { %3780 = vmatprep.subr.mxu1 %v8739_v39 }
 0x466   : > { %v3216_v30 = vpop.f32.mrf.mxu1 }
 0x468   : > { %v3218_v59 = vpop.f32.mrf.mxu1 }
 0x46a   : > { %v3222_v61 = vpop.f32.mrf.mxu1 }
 0x46c   : > { %v3224_v58 = vpop.f32.mrf.mxu1 }
 0x46d   : > { %v3293_v53 = vpop.f32.mrf.mxu0 }
 0x46e   : > { %v3517_v32 = vpop.f32.mrf.mxu1  ;;  %v3294_v4 = vadd.f32 %v3293_v53, %v3216_v30  ;;  %v3894_v30 = vld [vmem:[%s8693_s10 + $0xd0] sm:$0xff] }
 0x46f   : > { %v3295_v16 = vpop.f32.mrf.mxu0  ;;  %v5040_v53 = vld [vmem:[%s8693_s10 + $0x1d0] sm:$0xff] }
 0x470   : > { %v3519_v21 = vpop.f32.mrf.mxu1  ;;  %v3296_v18 = vadd.f32 %v3295_v16, %v3218_v59  ;;  %v3893_v59 = vld [vmem:[%s8693_s10 + $0xc8] sm:$0xff] }
 0x471   : > { %v3299_v17 = vpop.f32.mrf.mxu0  ;;  %v5039_v16 = vld [vmem:[%s8693_s10 + $0x1c8] sm:$0xff] }
 0x472   : > { %v3300_v38 = vadd.f32 %v3299_v17, %v3222_v61  ;;  %v5041_v61 = vld [vmem:[%s8693_s10 + $0x1d8] sm:$0xff]  ;;  %v5038_v17 = vld [vmem:[%s8693_s10 + $0x1c0] sm:$0xff] }
 0x473   : > { %v3301_v12 = vpop.f32.mrf.mxu0  ;;  %v3523_v6 = vpop.f32.mrf.mxu1  ;;  %3941 = vmatprep.subr.mxu0 %v5041_v61 }
 0x474   : > { %v3302_v45 = vadd.f32 %v3301_v12, %v3224_v58  ;;  %v3892_v58 = vld [vmem:[%s8693_s10 + $0xc0] sm:$0xff]  ;;  %v3890_v12 = vld [vmem:[%s8693_s10 + $0xb0] sm:$0xff] }
 0x475   : > { %v3525_v19 = vpop.f32.mrf.mxu1 }
 0x4ad   : > { %v3440_v60 = vpop.f32.mrf.mxu0 }
 0x4ae   : > { %v3518_v43 = vadd.f32 %v3517_v32, %v3440_v60  ;;  %v3891_v32 = vld [vmem:[%s8693_s10 + $0xb8] sm:$0xff]  ;;  %v5036_v60 = vld [vmem:[%s8693_s10 + $0x1b0] sm:$0xff] }
 0x4af   : > { %v3442_v42 = vpop.f32.mrf.mxu0 }
 0x4b0   : > { %v3520_v51 = vadd.f32 %v3519_v21, %v3442_v42  ;;  %v8110_v41 = vmax.f32 %v3294_v4, %v3518_v43  ;;  %v5037_v21 = vld [vmem:[%s8693_s10 + $0x1b8] sm:$0xff]  ;;  %v5035_v43 = vld [vmem:[%s8693_s10 + $0x1a8] sm:$0xff]  ;;  %v3888_v42 = vld [vmem:[%s8693_s10 + $0xa0] sm:$0xff] }
 0x4b1   : > { %v3446_v36 = vpop.f32.mrf.mxu0  ;;  %v5033_v4 = vld [vmem:[%s8693_s10 + $0x198] sm:$0xff] }
 0x4b2   : > { %v3529_v5 = vmax.f32 %v3296_v18, %v3520_v51  ;;  %v3524_v25 = vadd.f32 %v3523_v6, %v3446_v36  ;;  %v3573_v37 = vrot.slane %v8110_v41, 1  ;;  %v3765_v26 = vrot.slane %v8110_v41, 2  ;;  %v3889_v6 = vld [vmem:[%s8693_s10 + $0xa8] sm:$0xff]  ;;  %v5034_v18 = vld [vmem:[%s8693_s10 + $0x1a0] sm:$0xff]  ;;  %v3887_v51 = vld [vmem:[%s8693_s10 + $0x98] sm:$0xff] }
 0x4b3   : > { %v3448_v52 = vpop.f32.mrf.mxu0  ;;  %v3886_v36 = vld [vmem:[%s8693_s10 + $0x90] sm:$0xff] }
 0x4b4   : > { %v8112_v28 = vmax.f32 %v3300_v38, %v3524_v25  ;;  %v3526_v20 = vadd.f32 %v3525_v19, %v3448_v52  ;;  %4988 = vmatprep.mubr.msk.f32.mxu0 %vm3581_vm8, %v3529_v5  ;;  %v3576_v54 = vrot.slane %v3529_v5, 1  ;;  %v3768_v62 = vrot.slane %v3529_v5, 2  ;;  %v5032_v38 = vld [vmem:[%s8693_s10 + $0x190] sm:$0xff]  ;;  %v3885_v5 = vld [vmem:[%s8693_s10 + $0x88] sm:$0xff]  ;;  %v3884_v19 = vld [vmem:[%s8693_s10 + $0x80] sm:$0xff] }
 0x4b5   : > { %3736 = vmatmul.mubr.f32.vlgmr.msra.gmra.mxu0 %v8110_v41  ;;  %v5031_v25 = vld [vmem:[%s8693_s10 + $0x188] sm:$0xff]  ;;  %v5030_v41 = vld [vmem:[%s8693_s10 + $0x180] sm:$0xff]  ;;  %v3883_v52 = vld [vmem:[%s8693_s10 + $0x78] sm:$0xff] }
 0x4b6   : > { %v8116_v55 = vmax.f32 %v3302_v45, %v3526_v20  ;;  %v3574_v31 = vrot.slane %v8112_v28, 1  ;;  %v3766_v47 = vrot.slane %v8112_v28, 2  ;;  %3942 = vmatpush1.msra.mxu0 %v5040_v53  ;;  %v5029_v45 = vld [vmem:[%s8693_s10 + $0x178] sm:$0xff]  ;;  %v5028_v20 = vld [vmem:[%s8693_s10 + $0x170] sm:$0xff] }
 0x4b7   : > { %3943 = vmatprep.subr.mxu0 %v5039_v16 }
 0x4b8   : > { %v3577_v1 = vrot.slane %v8116_v55, 1  ;;  %4989 = vmatprep.mubr.msk.f32.mxu0 %vm3581_vm8, %v8116_v55  ;;  %v3575_v8 = vsel %vm628_vm0, %v3573_v37, %v3574_v31  ;;  %v3769_v7 = vrot.slane %v8116_v55, 2  ;;  %v3767_v35 = vsel %vm1038_vm2, %v3765_v26, %v3766_v47  ;;  %3944 = vmatpush1.msra.mxu0 %v5038_v17  ;;  %v3881_v55 = vld [vmem:[%s8693_s10 + $0x68] sm:$0xff]  ;;  %v3879_v37 = vld [vmem:[%s8693_s10 + $0x58] sm:$0xff]  ;;  %v5012_v26 = vld [vmem:[%s8693_s10 + $0xf0] sm:$0xff] }
 0x4b9   : > { %3741 = vmatmul.mubr.f32.gmra.mxu0 %v8112_v28  ;;  %3945 = vmatprep.subr.mxu0 %v5037_v21  ;;  %v3882_v28 = vld [vmem:[%s8693_s10 + $0x70] sm:$0xff]  ;;  %v5011_v17 = vld [vmem:[%s8692_s9] ss:$0 sm:$0xff] }
 0x4ba   : > { %v3578_v14 = vsel %vm628_vm0, %v3576_v54, %v3577_v1  ;;  %4003 = vmatprep.mubr.f32.mxu0 %v8739_v39  ;;  %v3770_v56 = vsel %vm1038_vm2, %v3768_v62, %v3769_v7  ;;  %3946 = vmatpush1.msra.mxu0 %v5036_v60  ;;  %v3880_v54 = vld [vmem:[%s8693_s10 + $0x60] sm:$0xff]  ;;  %v5024_v62 = vld [vmem:[%s8693_s10 + $0x150] sm:$0xff] }
 0x4bb   : > { %4985 = vmatprep.mubr.msk.f32.mxu1 %vm3581_vm8, %v3578_v14  ;;  %3947 = vmatprep.subr.mxu0 %v5035_v43  ;;  %v5025_v14 = vld [vmem:[%s8693_s10 + $0x158] sm:$0xff] }
 0x4bc   : > { %3654 = vmatmul.mubr.f32.vlgmr.msra.gmra.mxu1 %v3575_v8  ;;  %3948 = vmatpush1.msra.mxu0 %v5034_v18  ;;  %v3877_v8 = vld [vmem:[%s8693_s10 + $0x48] sm:$0xff] }
 0x4bd   : > { %3781 = vmatpush1.msra.mxu1 %v5005_v9  ;;  %4986 = vmatprep.mubr.msk.f32.mxu1 %vm3581_vm8, %v3577_v1  ;;  %v5026_v1 = vld [vmem:[%s8693_s10 + $0x160] sm:$0xff]  ;;  %v3878_v9 = vld [vmem:[%s8693_s10 + $0x50] sm:$0xff] }
 0x4be   : > { %3782 = vmatprep.subr.mxu1 %v8739_v39  ;;  %3949 = vmatprep.subr.mxu0 %v5033_v4 }
 0x4bf   : > { %3783 = vmatpush1.msra.mxu1 %v5004_v3  ;;  %3950 = vmatpush1.msra.mxu0 %v5032_v38  ;;  %v3875_v3 = vld [vmem:[%s8693_s10 + $0x38] sm:$0xff] }
 0x4c0   : > { %3784 = vmatprep.subr.mxu1 %v8739_v39  ;;  %3659 = vmatmul.mubr.f32.gmra.mxu1 %v3574_v31  ;;  %v5027_v31 = vld [vmem:[%s8693_s10 + $0x168] sm:$0xff] }
 0x4c1   : > { %3785 = vmatpush1.msra.mxu1 %v5003_v22  ;;  %5009 = vmatprep.mubr.msk.f32.mxu1 %vm3581_vm8, %v3770_v56  ;;  %v3874_v22 = vld [vmem:[%s8693_s10 + $0x30] sm:$0xff]  ;;  %v5023_v56 = vld [vmem:[%s8693_s10 + $0x148] sm:$0xff] }
 0x4c2   : > { %3786 = vmatprep.subr.mxu1 %v8739_v39  ;;  %3951 = vmatprep.subr.mxu0 %v5031_v25  ;;  %v5074_v25 = vld [vmem:[%s8693_s10 + $0x2c0] sm:$0xff] }
 0x4c3   : > { %3787 = vmatpush1.msra.mxu1 %v5002_v29  ;;  %3952 = vmatpush1.msra.mxu0 %v5030_v41  ;;  %v3873_v29 = vld [vmem:[%s8693_s10 + $0x28] sm:$0xff]  ;;  %v5073_v41 = vld [vmem:[%s8693_s10 + $0x2b8] sm:$0xff] }
 0x4c4   : > { %3788 = vmatprep.subr.mxu1 %v8739_v39  ;;  %3953 = vmatprep.subr.mxu0 %v5029_v45  ;;  %v5071_v45 = vld [vmem:[%s8693_s10 + $0x2a8] sm:$0xff] }
 0x4c5   : > { %3789 = vmatpush1.msra.mxu1 %v5001_v44  ;;  %3954 = vmatpush1.msra.mxu0 %v5028_v20  ;;  %v5022_v44 = vld [vmem:[%s8693_s10 + $0x140] sm:$0xff]  ;;  %v5069_v20 = vld [vmem:[%s8693_s10 + $0x298] sm:$0xff] }
 0x4c6   : > { %3790 = vmatprep.subr.mxu1 %v8739_v39  ;;  %3955 = vmatprep.subr.mxu0 %v5027_v31  ;;  %v5067_v31 = vld [vmem:[%s8693_s10 + $0x288] sm:$0xff] }
 0x4c7   : > { %3791 = vmatpush1.msra.mxu1 %v5000_v48  ;;  %3956 = vmatpush1.msra.mxu0 %v5026_v1  ;;  %v3872_v48 = vld [vmem:[%s8693_s10 + $0x20] sm:$0xff]  ;;  %v5065_v1 = vld [vmem:[%s8693_s10 + $0x278] sm:$0xff] }
 0x4c8   : > { %3792 = vmatprep.subr.mxu1 %v8739_v39  ;;  %3957 = vmatprep.subr.mxu0 %v5025_v14  ;;  %v5063_v14 = vld [vmem:[%s8693_s10 + $0x268] sm:$0xff] }
 0x4c9   : > { %3793 = vmatpush1.msra.mxu1 %v4999_v63  ;;  %3958 = vmatpush1.msra.mxu0 %v5024_v62  ;;  %v5021_v63 = vld [vmem:[%s8693_s10 + $0x138] sm:$0xff]  ;;  %v5058_v62 = vld [vmem:[%s8693_s10 + $0x240] sm:$0xff] }
 0x4ca   : > { %3794 = vmatprep.subr.mxu1 %v8739_v39  ;;  %3959 = vmatprep.subr.mxu0 %v5023_v56  ;;  %v5056_v56 = vld [vmem:[%s8693_s10 + $0x230] sm:$0xff] }
 0x4cb   : > { %3795 = vmatpush1.msra.mxu1 %v4998_v33  ;;  %3960 = vmatpush1.msra.mxu0 %v5022_v44  ;;  %v3871_v33 = vld [vmem:[%s8693_s10 + $0x18] sm:$0xff]  ;;  %v5054_v44 = vld [vmem:[%s8693_s10 + $0x220] sm:$0xff] }
 0x4cc   : > { %3796 = vmatprep.subr.mxu1 %v8739_v39  ;;  %3961 = vmatprep.subr.mxu0 %v5021_v63  ;;  %v5052_v63 = vld [vmem:[%s8693_s10 + $0x210] sm:$0xff] }
 0x4cd   : > { %3797 = vmatpush1.msra.mxu1 %v4997_v11  ;;  %v5020_v11 = vld [vmem:[%s8693_s10 + $0x130] sm:$0xff] }
 0x4ce   : > { %3798 = vmatprep.subr.mxu1 %v8739_v39  ;;  %3962 = vmatpush1.msra.mxu0 %v5020_v11  ;;  %v5050_v11 = vld [vmem:[%s8693_s10 + $0x200] sm:$0xff] }
 0x4cf   : > { %3799 = vmatpush1.msra.mxu1 %v4996_v13  ;;  %v3870_v13 = vld [vmem:[%s8693_s10 + $0x10] sm:$0xff] }
 0x4d0   : > { %3800 = vmatprep.subr.mxu1 %v8739_v39 }
 0x4d1   : > { %3801 = vmatpush1.msra.mxu1 %v4995_v10  ;;  %v5019_v10 = vld [vmem:[%s8693_s10 + $0x128] sm:$0xff] }
 0x4d2   : > { %3802 = vmatprep.subr.mxu1 %v8739_v39  ;;  %3963 = vmatprep.subr.mxu0 %v5019_v10  ;;  %v5048_v10 = vld [vmem:[%s8693_s10 + $0x1f0] sm:$0xff] }
 0x4d3   : > { %3803 = vmatpush1.msra.mxu1 %v4994_v57  ;;  %v3869_v57 = vld [vmem:[%s8693_s10 + $0x8] sm:$0xff] }
 0x4d4   : > { %3804 = vmatprep.subr.mxu1 %v8739_v39 }
 0x4d5   : > { %3805 = vmatpush1.msra.mxu1 %v4993_v23  ;;  %v5018_v23 = vld [vmem:[%s8693_s10 + $0x120] sm:$0xff] }
 0x4d6   : > { %3806 = vmatprep.subr.mxu1 %v8739_v39  ;;  %3964 = vmatpush1.msra.mxu0 %v5018_v23  ;;  %v5047_v23 = vld [vmem:[%s8693_s10 + $0x1e8] sm:$0xff] }
 0x4d7   : > { %3807 = vmatpush1.msra.mxu1 %v4992_v27  ;;  %v3868_v27 = vld [vmem:[%s8693_s10] sm:$0xff] }
 0x4d8   : > { %3808 = vmatprep.subr.mxu1 %v8739_v39 }
 0x4d9   : > { %3809 = vmatpush1.msra.mxu1 %v4991_v40  ;;  %v5017_v40 = vld [vmem:[%s8693_s10 + $0x118] sm:$0xff] }
 0x4da   : > { %3810 = vmatprep.subr.mxu1 %v8739_v39  ;;  %3965 = vmatprep.subr.mxu0 %v5017_v40 }
 0x4db   : > { %3811 = vmatpush1.msra.mxu1 %v4990_v24  ;;  %v5016_v24 = vld [vmem:[%s8693_s10 + $0x110] sm:$0xff] }
 0x4dc   : > { %3840 = vmatprep.subr.mxu1 %v8739_v39  ;;  %3966 = vmatpush1.msra.mxu0 %v5016_v24 }
 0x4dd   : > { %5008 = vmatpush2.msk.msra.mxu1 %vm1560_vm3, %v5007_v50  ;;  %v5015_v50 = vld [vmem:[%s8693_s10 + $0x108] sm:$0xff] }
 0x4de   : > { %3842 = vmatprep.subr.mxu1 %v8739_v39  ;;  %3967 = vmatprep.subr.mxu0 %v5015_v50  ;;  %v4352_v50 = vld [vmem:[%s8696_s13 + $0x78] sm:$0xff] }
 0x4df   : > { %3843 = vmatpush2.msra.mxu1 %v5006_v0  ;;  %v5013_v0 = vld [vmem:[%s8693_s10 + $0xf8] sm:$0xff] }
 0x4e0   : > { %3845 = vmatmul.mubr.f32.vlgmr.msra.gmra.mxu1 %v3767_v35  ;;  %4022 = vmatprep.subr.mxu1 %v3897_v15  ;;  %v5075_v35 = vld [vmem:[%s8693_s10 + $0x2c8] sm:$0xff] }
 0x4e1   : > { %5010 = vmatprep.mubr.msk.f32.mxu1 %vm3581_vm8, %v3769_v7  ;;  %4023 = vmatpush1.msra.mxu1 %v3896_v2  ;;  %v3876_v7 = vld [vmem:[%s8693_s10 + $0x40] sm:$0xff] }
 0x4e2   : > { %4024 = vmatprep.subr.mxu1 %v3895_v34 }
 0x4e3   : > { %4025 = vmatpush1.msra.mxu1 %v3894_v30 }
 0x4e4   : > { %3850 = vmatmul.mubr.f32.gmra.mxu1 %v3766_v47  ;;  %4026 = vmatprep.subr.mxu1 %v3893_v59  ;;  %v5014_v47 = vld [vmem:[%s8693_s10 + $0x100] sm:$0xff] }
 0x4e5   : > { %4084 = vmatprep.mubr.f32.mxu1 %v8739_v39  ;;  %4027 = vmatpush1.msra.mxu1 %v3892_v58 }
 0x4e6   : > { %4028 = vmatprep.subr.mxu1 %v3891_v32  ;;  %3968 = vmatpush1.msra.mxu0 %v5014_v47  ;;  %v4351_v47 = vld [vmem:[%s8696_s13 + $0x70] sm:$0xff] }
 0x4e7   : > { %4029 = vmatpush1.msra.mxu1 %v3890_v12  ;;  %3969 = vmatprep.subr.mxu0 %v5013_v0  ;;  %v4350_v0 = vld [vmem:[%s8696_s13 + $0x68] sm:$0xff] }
 0x4e8   : > { %4030 = vmatprep.subr.mxu1 %v3889_v6  ;;  %3970 = vmatpush1.msra.mxu0 %v5012_v26  ;;  %v4349_v26 = vld [vmem:[%s8696_s13 + $0x60] sm:$0xff] }
 0x4e9   : > { %4031 = vmatpush1.msra.mxu1 %v3888_v42  ;;  %4137 = vmatprep.subr.mxu0 %v5075_v35  ;;  %v4348_v35 = vld [vmem:[%s8696_s13 + $0x58] sm:$0xff] }
 0x4ea   : > { %4032 = vmatprep.subr.mxu1 %v3887_v51 }
 0x4eb   : > { %4033 = vmatpush1.msra.mxu1 %v3886_v36 }
 0x4ec   : > { %4034 = vmatprep.subr.mxu1 %v3885_v5 }
 0x4ed   : > { %4035 = vmatpush1.msra.mxu1 %v3884_v19 }
 0x4ee   : > { %4036 = vmatprep.subr.mxu1 %v3883_v52  ;;  %v5072_v52 = vld [vmem:[%s8693_s10 + $0x2b0] sm:$0xff] }
 0x4ef   : > { %4037 = vmatpush1.msra.mxu1 %v3882_v28  ;;  %v5070_v28 = vld [vmem:[%s8693_s10 + $0x2a0] sm:$0xff] }
 0x4f0   : > { %4038 = vmatprep.subr.mxu1 %v3881_v55  ;;  %v5068_v55 = vld [vmem:[%s8693_s10 + $0x290] sm:$0xff] }
 0x4f1   : > { %4039 = vmatpush1.msra.mxu1 %v3880_v54  ;;  %v5066_v54 = vld [vmem:[%s8693_s10 + $0x280] sm:$0xff] }
 0x4f2   : > { %4040 = vmatprep.subr.mxu1 %v3879_v37  ;;  %v5064_v37 = vld [vmem:[%s8693_s10 + $0x270] sm:$0xff] }
 0x4f3   : > { %4041 = vmatpush1.msra.mxu1 %v3878_v9  ;;  %v5062_v9 = vld [vmem:[%s8693_s10 + $0x260] sm:$0xff] }
 0x4f4   : > { %4042 = vmatprep.subr.mxu1 %v3877_v8  ;;  %v5061_v8 = vld [vmem:[%s8693_s10 + $0x258] sm:$0xff] }
 0x4f5   : > { %4043 = vmatpush1.msra.mxu1 %v3876_v7  ;;  %v5060_v7 = vld [vmem:[%s8693_s10 + $0x250] sm:$0xff] }
 0x4f6   : > { %4044 = vmatprep.subr.mxu1 %v3875_v3  ;;  %v5059_v3 = vld [vmem:[%s8693_s10 + $0x248] sm:$0xff] }
 0x4f7   : > { %4045 = vmatpush1.msra.mxu1 %v3874_v22  ;;  %v5057_v22 = vld [vmem:[%s8693_s10 + $0x238] sm:$0xff] }
 0x4f8   : > { %4046 = vmatprep.subr.mxu1 %v3873_v29  ;;  %v5055_v29 = vld [vmem:[%s8693_s10 + $0x228] sm:$0xff] }
 0x4f9   : > { %4047 = vmatpush1.msra.mxu1 %v3872_v48  ;;  %v5053_v48 = vld [vmem:[%s8693_s10 + $0x218] sm:$0xff] }
 0x4fa   : > { %4048 = vmatprep.subr.mxu1 %v3871_v33  ;;  %v5051_v33 = vld [vmem:[%s8693_s10 + $0x208] sm:$0xff] }
 0x4fb   : > { %4049 = vmatpush1.msra.mxu1 %v3870_v13  ;;  %v5049_v13 = vld [vmem:[%s8693_s10 + $0x1f8] sm:$0xff] }
 0x4fc   : > { %4050 = vmatprep.subr.mxu1 %v3869_v57 }
 0x4fd   : > { %4051 = vmatpush1.msra.mxu1 %v3868_v27  ;;  %v5046_v27 = vld [vmem:[%s8693_s10 + $0x1e0] sm:$0xff] }
 0x575   : > { %v3737_v15 = vpop.f32.mrf.mxu0 }
 0x577   : > { %v3739_v2 = vpop.f32.mrf.mxu0 }
 0x578   : > { %v4346_v2 = vld [vmem:[%s8696_s13 + $0x48] sm:$0xff] }
 0x579   : > { %v3742_v34 = vpop.f32.mrf.mxu0 }
 0x57b   : > { %v3744_v30 = vpop.f32.mrf.mxu0 }
 0x57c   : > { %v3655_v59 = vpop.f32.mrf.mxu1  ;;  %v4344_v30 = vld [vmem:[%s8696_s13 + $0x38] sm:$0xff] }
 0x57d   : > { %v3738_v16 = vadd.f32 %v3737_v15, %v3655_v59  ;;  %v4347_v15 = vld [vmem:[%s8696_s13 + $0x50] sm:$0xff] }
 0x57e   : > { %v3657_v61 = vpop.f32.mrf.mxu1  ;;  %v4343_v59 = vld [vmem:[%s8696_s13 + $0x30] sm:$0xff] }
 0x57f   : > { %v4342_v61 = vld [vmem:[%s8696_s13 + $0x28] sm:$0xff] }
 0x580   : > { %v3660_v53 = vpop.f32.mrf.mxu1 }
 0x581   : > { %v3743_v60 = vadd.f32 %v3742_v34, %v3660_v53  ;;  %v4345_v34 = vld [vmem:[%s8696_s13 + $0x40] sm:$0xff] }
 0x582   : > { %v3662_v58 = vpop.f32.mrf.mxu1  ;;  %v4341_v53 = vld [vmem:[%s8696_s13 + $0x20] sm:$0xff] }
 0x583   : > { %v4340_v58 = vld [vmem:[%s8696_s13 + $0x18] sm:$0xff] }
 0x5a0   : > { %v3846_v32 = vpop.f32.mrf.mxu1 }
 0x5a1   : > { %v3855_v21 = vadd.f32 %v3846_v32, %v3738_v16  ;;  %v4339_v16 = vld [vmem:[%s8696_s13 + $0x10] sm:$0xff]  ;;  %v4338_v32 = vld [vmem:[%s8696_s13 + $0x8] sm:$0xff] }
 0x5a2   : > { %v3848_v12 = vpop.f32.mrf.mxu1 }
 0x5a3   : > { %v3864_v6 = vadd.f32 %v5011_v17, %v3855_v21  ;;  %v4355_v21 = vld [vmem:[%s8696_s13 + $0x90] sm:$0x3f] }
 0x5a4   : > { %v3851_v43 = vpop.f32.mrf.mxu1 }
 0x5a5   : > { %v8399_v42 = vmax.f32 %v3864_v6, 0.0  ;;  %v3856_v18 = vadd.f32 %v3851_v43, %v3743_v60 }
 0x5a6   : > { %v3853_v51 = vpop.f32.mrf.mxu1 }
 0x5a7   : > { %v3865_v4 = vadd.f32 %v5011_v17, %v3856_v18  ;;  %5044 = vmatmul.mubr.msk.f32.vlgmr.msra.gmra.mxu1 %vm3934_vm9, %v8399_v42  ;;  %v3931_v38 = vrot.slane %v8399_v42, 1  ;;  %v4128_v40 = vrot.slane %v8399_v42, 2  ;;  %v4337_v17 = vld [vmem:[%s8696_s13] sm:$0xff] }
 0x5a8   : > { %4090 = vmatprep.mubr.f32.mxu1 %v8739_v39  ;;  %v4216_v51 = vld [vmem:[%s8694_s11] sm:$0x3] }
 0x5a9   : > { %v8404_v36 = vmax.f32 %v3865_v4, 0.0 }
 0x5ab   : > { %v3932_v5 = vrot.slane %v8404_v36, 1  ;;  %5045 = vmatmul.mubr.msk.f32.gmra.mxu1 %vm3934_vm9, %v8404_v36  ;;  %v4129_v57 = vrot.slane %v8404_v36, 2 }
 0x5ac   : > { %4330 = vmatprep.mubr.f32.mxu1 %v8739_v39 }
 0x5ad   : > { %v3933_v19 = vsel %vm628_vm0, %v3931_v38, %v3932_v5  ;;  %v4130_v24 = vsel %vm1038_vm2, %v4128_v40, %v4129_v57  ;;  %v4446_v40 = vld [vmem:[%s8697_s14 + $0x68] sm:$0xff] }
 0x5ae   : > { %5042 = vmatmul.mubr.msk.f32.vlgmr.msra.gmra.mxu0 %vm3934_vm9, %v3933_v19  ;;  %v4221_v19 = vrot.slane %v4216_v51, %v6240_v49 }
 0x5af   : > { %4138 = vmatpush1.msra.mxu0 %v5074_v25  ;;  %4009 = vmatprep.mubr.f32.mxu0 %v8739_v39 }
 0x5b0   : > { %4139 = vmatprep.subr.mxu0 %v5073_v41  ;;  %v4225_v41 = vrot.slane %v4216_v51, %v6237_v46 }
 0x5b1   : > { %4140 = vmatpush1.msra.mxu0 %v5072_v52 }
 0x5b2   : > { %4141 = vmatprep.subr.mxu0 %v5071_v45  ;;  %5043 = vmatmul.mubr.msk.f32.gmra.mxu0 %vm3934_vm9, %v3932_v5 }
 0x5b3   : > { %4142 = vmatpush1.msra.mxu0 %v5070_v28  ;;  %4199 = vmatprep.mubr.f32.mxu0 %v8739_v39 }
 0x5b4   : > { %4143 = vmatprep.subr.mxu0 %v5069_v20 }
 0x5b5   : > { %4144 = vmatpush1.msra.mxu0 %v5068_v55 }
 0x5b6   : > { %4145 = vmatprep.subr.mxu0 %v5067_v31 }
 0x5b7   : > { %4146 = vmatpush1.msra.mxu0 %v5066_v54 }
 0x5b8   : > { %4147 = vmatprep.subr.mxu0 %v5065_v1 }
 0x5b9   : > { %4148 = vmatpush1.msra.mxu0 %v5064_v37 }
 0x5ba   : > { %4149 = vmatprep.subr.mxu0 %v5063_v14 }
 0x5bb   : > { %4150 = vmatpush1.msra.mxu0 %v5062_v9 }
 0x5bc   : > { %4151 = vmatprep.subr.mxu0 %v5061_v8 }
 0x5bd   : > { %4152 = vmatpush1.msra.mxu0 %v5060_v7 }
 0x5be   : > { %4153 = vmatprep.subr.mxu0 %v5059_v3 }
 0x5bf   : > { %4154 = vmatpush1.msra.mxu0 %v5058_v62 }
 0x5c0   : > { %4155 = vmatprep.subr.mxu0 %v5057_v22 }
 0x5c1   : > { %4156 = vmatpush1.msra.mxu0 %v5056_v56 }
 0x5c2   : > { %4157 = vmatprep.subr.mxu0 %v5055_v29 }
 0x5c3   : > { %4158 = vmatpush1.msra.mxu0 %v5054_v44 }
 0x5c4   : > { %4159 = vmatprep.subr.mxu0 %v5053_v48 }
 0x5c5   : > { %4160 = vmatpush1.msra.mxu0 %v5052_v63 }
 0x5c6   : > { %4161 = vmatprep.subr.mxu0 %v5051_v33 }
 0x5c7   : > { %4162 = vmatpush1.msra.mxu0 %v5050_v11 }
 0x5c8   : > { %4163 = vmatprep.subr.mxu0 %v5049_v13 }
 0x5c9   : > { %4164 = vmatpush1.msra.mxu0 %v5048_v10 }
 0x5ca   : > { %4165 = vmatprep.subr.mxu0 %v5047_v23  ;;  %v4448_v23 = vld [vmem:[%s8697_s14 + $0x78] sm:$0xff] }
 0x5cb   : > { %4166 = vmatpush1.msra.mxu0 %v5046_v27  ;;  %v4447_v27 = vld [vmem:[%s8697_s14 + $0x70] sm:$0xff] }
 0x5cc   : > { %5076 = vmatmul.mubr.msk.f32.vlgmr.msra.gmra.mxu0 %vm3934_vm9, %v4130_v24  ;;  %4363 = vmatprep.subr.mxu0 %v8739_v39  ;;  %v4445_v24 = vld [vmem:[%s8697_s14 + $0x60] sm:$0xff] }
 0x5cd   : > { %4205 = vmatprep.mubr.f32.mxu0 %v8739_v39  ;;  %4364 = vmatpush1.msra.mxu0 %v4352_v50  ;;  %v4444_v50 = vld [vmem:[%s8697_s14 + $0x58] sm:$0xff] }
 0x5ce   : > { %4365 = vmatprep.subr.mxu0 %v8739_v39 }
 0x5cf   : > { %4366 = vmatpush1.msra.mxu0 %v4351_v47  ;;  %v4443_v47 = vld [vmem:[%s8697_s14 + $0x50] sm:$0xff] }
 0x5d0   : > { %5077 = vmatmul.mubr.msk.f32.gmra.mxu0 %vm3934_vm9, %v4129_v57  ;;  %4367 = vmatprep.subr.mxu0 %v8739_v39  ;;  %v4254_v57 = vld [vmem:[%s8695_s12] sm:$0x1f] }
 0x5d1   : > { %4368 = vmatpush1.msra.mxu0 %v4350_v0  ;;  %v4442_v0 = vld [vmem:[%s8697_s14 + $0x48] sm:$0xff] }
 0x5d2   : > { %4369 = vmatprep.subr.mxu0 %v8739_v39 }
 0x5d3   : > { %4370 = vmatpush1.msra.mxu0 %v4349_v26  ;;  %v4441_v26 = vld [vmem:[%s8697_s14 + $0x40] sm:$0xff] }
 0x5d4   : > { %4371 = vmatprep.subr.mxu0 %v8739_v39 }
 0x5d5   : > { %4372 = vmatpush1.msra.mxu0 %v4348_v35  ;;  %v4440_v35 = vld [vmem:[%s8697_s14 + $0x38] sm:$0xff] }
 0x5d6   : > { %4373 = vmatprep.subr.mxu0 %v8739_v39 }
 0x5d7   : > { %4374 = vmatpush1.msra.mxu0 %v4347_v15  ;;  %v4439_v15 = vld [vmem:[%s8697_s14 + $0x30] sm:$0xff] }
 0x5d8   : > { %4375 = vmatprep.subr.mxu0 %v8739_v39 }
 0x5d9   : > { %4376 = vmatpush1.msra.mxu0 %v4346_v2  ;;  %v4438_v2 = vld [vmem:[%s8697_s14 + $0x28] sm:$0xff] }
 0x5da   : > { %4377 = vmatprep.subr.mxu0 %v8739_v39 }
 0x5db   : > { %4378 = vmatpush1.msra.mxu0 %v4345_v34  ;;  %v4437_v34 = vld [vmem:[%s8697_s14 + $0x20] sm:$0xff] }
 0x5dc   : > { %4379 = vmatprep.subr.mxu0 %v8739_v39 }
 0x5dd   : > { %4380 = vmatpush1.msra.mxu0 %v4344_v30  ;;  %v4436_v30 = vld [vmem:[%s8697_s14 + $0x18] sm:$0xff] }
 0x5de   : > { %4381 = vmatprep.subr.mxu0 %v8739_v39 }
 0x5df   : > { %4382 = vmatpush1.msra.mxu0 %v4343_v59  ;;  %v4435_v59 = vld [vmem:[%s8697_s14 + $0x10] sm:$0xff] }
 0x5e0   : > { %4383 = vmatprep.subr.mxu0 %v8739_v39 }
 0x5e1   : > { %4384 = vmatpush1.msra.mxu0 %v4342_v61  ;;  %v4434_v61 = vld [vmem:[%s8697_s14 + $0x8] sm:$0xff] }
 0x5e2   : > { %4385 = vmatprep.subr.mxu0 %v8739_v39 }
 0x5e3   : > { %4386 = vmatpush1.msra.mxu0 %v4341_v53  ;;  %v4433_v53 = vld [vmem:[%s8697_s14] sm:$0xff] }
 0x5e4   : > { %4387 = vmatprep.subr.mxu0 %v8739_v39 }
 0x5e5   : > { %4388 = vmatpush1.msra.mxu0 %v4340_v58  ;;  %v4451_v58 = vld [vmem:[%s8697_s14 + $0x90] sm:$0x3f] }
 0x5e6   : > { %4389 = vmatprep.subr.mxu0 %v8739_v39 }
 0x5e7   : > { %4390 = vmatpush1.msra.mxu0 %v4339_v16  ;;  %v4354_v16 = vld [vmem:[%s8696_s13 + $0x88] sm:$0xff] }
 0x5e8   : > { %4391 = vmatprep.subr.mxu0 %v8739_v39 }
 0x5e9   : > { %4392 = vmatpush1.msra.mxu0 %v4338_v32  ;;  %v4450_v32 = vld [vmem:[%s8697_s14 + $0x88] sm:$0xff] }
 0x5ea   : > { %4393 = vmatprep.subr.mxu0 %v8739_v39 }
 0x5eb   : > { %4394 = vmatpush1.msra.mxu0 %v4337_v17  ;;  %v4353_v17 = vld [vmem:[%s8696_s13 + $0x80] sm:$0xff] }
 0x5ec   : > { %4421 = vmatprep.subr.mxu0 %v8739_v39 }
 0x5ed   : > { %5081 = vmatpush2.msk.msra.mxu0 %vm1038_vm2, %v4355_v21  ;;  %v4449_v21 = vld [vmem:[%s8697_s14 + $0x80] sm:$0xff] }
 0x5ee   : > { %4423 = vmatprep.subr.mxu0 %v8739_v39 }
 0x5ef   : > { %4424 = vmatpush2.msra.mxu0 %v4354_v16 }
 0x5f0   : > { %4425 = vmatprep.subr.mxu0 %v8739_v39 }
 0x5f1   : > { %4426 = vmatpush2.msra.mxu0 %v4353_v17 }
 0x667   : > { %v4086_v6 = vpop.f32.mrf.mxu1 }
 0x669   : > { %v4088_v42 = vpop.f32.mrf.mxu1 }
 0x66b   : > { %v4092_v36 = vpop.f32.mrf.mxu1 }
 0x66d   : > { %v4094_v20 = vpop.f32.mrf.mxu1 }
 0x66e   : > { %v4005_v12 = vpop.f32.mrf.mxu0 }
 0x66f   : > { %v4087_v4 = vadd.f32 %v4086_v6, %v4005_v12 }
 0x670   : > { %v4007_v60 = vpop.f32.mrf.mxu0 }
 0x671   : > { %v4089_v5 = vadd.f32 %v4088_v42, %v4007_v60 }
 0x672   : > { %v4011_v43 = vpop.f32.mrf.mxu0 }
 0x673   : > { %v4093_v45 = vadd.f32 %v4092_v36, %v4011_v43 }
 0x674   : > { %v4013_v18 = vpop.f32.mrf.mxu0 }
 0x675   : > { %v4095_v31 = vadd.f32 %v4094_v20, %v4013_v18 }
 0x68c   : > { %v4201_v38 = vpop.f32.mrf.mxu0 }
 0x68d   : > { %v4212_v25 = vadd.f32 %v4201_v38, %v4087_v4 }
 0x68e   : > { %v4203_v52 = vpop.f32.mrf.mxu0 }
 0x68f   : > { %v4213_v28 = vadd.f32 %v4203_v52, %v4089_v5  ;;  %v4228_v54 = vadd.f32 %v4221_v19, %v4212_v25 }
 0x690   : > { %v4207_v55 = vpop.f32.mrf.mxu0 }
 0x691   : > { %v4229_v1 = vadd.f32 %v4225_v41, %v4213_v28  ;;  %v4214_v37 = vadd.f32 %v4207_v55, %v4093_v45  ;;  %v4232_v7 = vmax.f32 %v4228_v54, 0.0  ;;  %v4540_v28 = vld [vmem:[#allocation2] sm:$0x1] }
 0x692   : > { %v4209_v14 = vpop.f32.mrf.mxu0 }
 0x693   : > { %v4230_v9 = vadd.f32 %v4221_v19, %v4214_v37  ;;  %v4215_v8 = vadd.f32 %v4209_v14, %v4095_v31  ;;  %v4233_v3 = vmax.f32 %v4229_v1, 0.0  ;;  %v4240_v29 = vrot.slane %v4232_v7, 1 }
 0x695   : > { %v4234_v62 = vmax.f32 %v4230_v9, 0.0  ;;  %v4231_v22 = vadd.f32 %v4225_v41, %v4215_v8  ;;  %v4243_v46 = vrot.slane %v4233_v3, 1 }
 0x697   : > { %v4241_v56 = vrot.slane %v4234_v62, 1  ;;  %v4235_v49 = vmax.f32 %v4231_v22, 0.0 }
 0x699   : > { %v4244_v44 = vrot.slane %v4235_v49, 1  ;;  %v4242_v33 = vsel %vm628_vm0, %v4240_v29, %v4241_v56  ;;  %v4252_v11 = vmax.f32 %v4234_v62, %v4241_v56 }
 0x69a   : > { %v4250_v10 = vmax.f32 %v4232_v7, %v4242_v33 }
 0x69b   : > { %v4253_v48 = vmax.f32 %v4235_v49, %v4244_v44  ;;  %v4245_v63 = vsel %vm628_vm0, %v4243_v46, %v4244_v44 }
 0x69c   : > { %v4251_v13 = vmax.f32 %v4233_v3, %v4245_v63 }
 0x69d   : > { %5078 = vmatprep.subr.msk.mxu1 %vm4259_vm10, %v4253_v48 }
 0x69e   : > { %5079 = vmatpush1.msk.msra.mxu1 %vm4259_vm10, %v4252_v11 }
 0x69f   : > { %4296 = vmatprep.subr.mxu1 %v4251_v13 }
 0x6a0   : > { %4297 = vmatpush1.msra.mxu1 %v4250_v10 }
 0x6a1   : > { %5080 = vmatmul.mubr.msk.f32.vlgmr.msra.gmra.mxu1 %vm4255_vm11, %v4254_v57  ;;  %4455 = vmatprep.subr.mxu1 %v8739_v39 }
 0x6a2   : > { %4456 = vmatpush1.msra.mxu1 %v4448_v23 }
 0x6a3   : > { %4457 = vmatprep.subr.mxu1 %v8739_v39 }
 0x6a4   : > { %4458 = vmatpush1.msra.mxu1 %v4447_v27 }
 0x6a5   : > { %4459 = vmatprep.subr.mxu1 %v8739_v39 }
 0x6a6   : > { %4460 = vmatpush1.msra.mxu1 %v4446_v40 }
 0x6a7   : > { %4461 = vmatprep.subr.mxu1 %v8739_v39 }
 0x6a8   : > { %4462 = vmatpush1.msra.mxu1 %v4445_v24 }
 0x6a9   : > { %4463 = vmatprep.subr.mxu1 %v8739_v39 }
 0x6aa   : > { %4464 = vmatpush1.msra.mxu1 %v4444_v50 }
 0x6ab   : > { %4465 = vmatprep.subr.mxu1 %v8739_v39 }
 0x6ac   : > { %4466 = vmatpush1.msra.mxu1 %v4443_v47 }
 0x6ad   : > { %4467 = vmatprep.subr.mxu1 %v8739_v39 }
 0x6ae   : > { %4468 = vmatpush1.msra.mxu1 %v4442_v0 }
 0x6af   : > { %4469 = vmatprep.subr.mxu1 %v8739_v39 }
 0x6b0   : > { %4470 = vmatpush1.msra.mxu1 %v4441_v26 }
 0x6b1   : > { %4471 = vmatprep.subr.mxu1 %v8739_v39 }
 0x6b2   : > { %4472 = vmatpush1.msra.mxu1 %v4440_v35 }
 0x6b3   : > { %4473 = vmatprep.subr.mxu1 %v8739_v39 }
 0x6b4   : > { %4474 = vmatpush1.msra.mxu1 %v4439_v15 }
 0x6b5   : > { %4475 = vmatprep.subr.mxu1 %v8739_v39 }
 0x6b6   : > { %4476 = vmatpush1.msra.mxu1 %v4438_v2 }
 0x6b7   : > { %4477 = vmatprep.subr.mxu1 %v8739_v39 }
 0x6b8   : > { %4478 = vmatpush1.msra.mxu1 %v4437_v34 }
 0x6b9   : > { %4479 = vmatprep.subr.mxu1 %v8739_v39 }
 0x6ba   : > { %4480 = vmatpush1.msra.mxu1 %v4436_v30 }
 0x6bb   : > { %4481 = vmatprep.subr.mxu1 %v8739_v39 }
 0x6bc   : > { %4482 = vmatpush1.msra.mxu1 %v4435_v59 }
 0x6bd   : > { %4483 = vmatprep.subr.mxu1 %v8739_v39 }
 0x6be   : > { %4484 = vmatpush1.msra.mxu1 %v4434_v61 }
 0x6bf   : > { %4485 = vmatprep.subr.mxu1 %v8739_v39 }
 0x6c0   : > { %4486 = vmatpush1.msra.mxu1 %v4433_v53 }
 0x6c1   : > { %4513 = vmatprep.subr.mxu1 %v8739_v39 }
 0x6c2   : > { %5083 = vmatpush2.msk.msra.mxu1 %vm1038_vm2, %v4451_v58 }
 0x6c3   : > { %4515 = vmatprep.subr.mxu1 %v8739_v39 }
 0x6c4   : > { %4516 = vmatpush2.msra.mxu1 %v4450_v32 }
 0x6c5   : > { %4517 = vmatprep.subr.mxu1 %v8739_v39  ;;  %v4526_v39 = vld [vmem:[%s8698_s15] sm:$0x1f] }
 0x6c6   : > { %4518 = vmatpush2.msra.mxu1 %v4449_v21 }
 0x761   : > { %v4332_v12 = vpop.f32.mrf.mxu1 }
 0x763   : > { %v4334_v60 = vpop.f32.mrf.mxu1 }
 0x764   : > { %5082 = vmatprep.mubr.msk.f32.mxu0 %vm4356_vm12, %v4334_v60  ;;  %5084 = vmatprep.mubr.msk.f32.mxu1 %vm4356_vm12, %v4334_v60 }
 0x765   : > { %4428 = vmatmul.mubr.f32.vlgmr.msra.gmra.mxu0 %v4332_v12  ;;  %4520 = vmatmul.mubr.f32.vlgmr.msra.gmra.mxu1 %v4332_v12 }
 0x825   : > { %v4429_v6 = vpop.f32.mrf.mxu0  ;;  %v4521_v43 = vpop.f32.mrf.mxu1 }
 0x826   : > { %v4525_v42 = vmax.f32 %v4429_v6, %v4521_v43 }
 0x827   : > { %v4431_v18 = vpop.f32.mrf.mxu0  ;;  %v4523_v51 = vpop.f32.mrf.mxu1 }
 0x828   : > { %v4527_v4 = vmul.f32 %v4526_v39, %v4525_v42 }
 0x82a   : > { %v4529_v36 = vsel %vm4528_vm13, %v4527_v4, 0.0 }
 0x82b   : > { %v4530_v38 = vrot.slane %v4529_v36, 4 }
 0x82d   : > { %v4531_v5 = vadd.f32 %v4530_v38, %v4529_v36 }
 0x82f   : > { %v4532_v25 = vrot.slane %v4531_v5, 2 }
 0x831   : > { %v4533_v19 = vadd.f32 %v4532_v25, %v4531_v5 }
 0x833   : > { %v4534_v41 = vrot.slane %v4533_v19, 1 }
 0x835   : > { %v4535_v52 = vadd.f32 %v4534_v41, %v4533_v19 }
 0x837   : > { %v4537_v45 = vsel %vm4536_vm14, %v4535_v52, 0.0 }
 0x838   : > { %4538 = vadd.xlane.f32.xlu0 %v4537_v45 }
 0x8c1   : > { %v4539_v20 = vpop.xlane.xlu0 %4538 }
 0x8c2   : > { %v4541_v55 = vadd.f32 %v4540_v28, %v4539_v20 }
 0x8c4   : > { %4543 = vst.msk [vmem:[%s546_s16] sm:$0x1] %vm4542_vm15, %v4541_v55 }
 0x8c5 PF: > { %s29_s26 = sadd.s32 1, %s5474_s26  }
 0x8c6   : > { %p26_p4 = scmp.ge.s32.totalorder %s29_s26, 4  }
 0x8c8   :  { %28 = sbr.rel (!%p26_p4) target bundleno = 3 (0x3), region = 126 }

</bundles_post_ra>
